<compile_context>
chip_gen: v6e
topology: v6e:2x2x1
jax: 0.10.0
libtpu: 0.0.40
codegen_flags: <defaults>
</compile_context>

<pallas_src>
from typing import Optional, Sequence, Tuple

import jax
import jax.numpy as jnp
from jax.experimental import pallas as pl
from jax.experimental.pallas import tpu as pltpu

LEAKY_SLOPE = 0.01   # nn.LeakyReLU default negative_slope
LANE = 128           # TPU lane width (last-dim quantum)

# Narrow set of errors that indicate "single-buffered weight spec not
# supported on this Pallas build" — anything else (e.g. VMEM OOM) propagates.
_FALLBACK_ERRORS: Tuple[type, ...] = (TypeError, ValueError, NotImplementedError)
if hasattr(pltpu, "LoweringException"):
    _FALLBACK_ERRORS = _FALLBACK_ERRORS + (pltpu.LoweringException,)


def _round_up(n: int, m: int) -> int:
    return ((n + m - 1) // m) * m


def _default_vmem_limit_bytes() -> int:
    """Generation-aware scoped-VMEM limit (v5e/v6e: 128 MiB phys, v7x: 64 MiB)."""
    cap = 0
    try:
        cap = int(pltpu.get_tpu_info().vmem_capacity_bytes)
    except Exception:            # query is best-effort; fall back to tightest chip
        cap = 0
    if cap <= 0:
        cap = 64 * 1024 * 1024   # assume v7x-sized VMEM if the query fails
    return max(32 * 1024 * 1024, cap * 3 // 4)   # ~25% headroom for scratch/spill


def _choose_batch_tile(batch: int, requested: int) -> int:
    """Batch tile: multiple of 128, >=2 grid steps when possible, low padding."""
    requested = max(LANE, _round_up(requested, LANE))
    bt = min(requested, _round_up(batch, LANE))
    # v7x has 2 TensorCores; make the "parallel" batch axis have >= 2 steps
    # whenever there is more than one lane-dense tile worth of rows.
    if batch > LANE and pl.cdiv(batch, bt) < 2:
        bt = max(LANE, _round_up(pl.cdiv(batch, 2), LANE))
    # Balance tiles so the batch padding stays below one tile of waste.
    n = pl.cdiv(batch, bt)
    bt = max(LANE, _round_up(pl.cdiv(batch, n), LANE))
    return bt


def _make_resfnn_kernel(residual_flags: Tuple[bool, ...],
                        padded_out_dims: Tuple[int, ...]):
    """Kernel for a fixed layer configuration.

    Ref order: x_ref, biases_ref, w_0, ..., w_L, out_ref; w_L is the output
    Linear that follows the Tanh.  biases_ref packs every layer's zero-padded
    bias as one (n_layers, max_out_p) f32 array.
    """
    n_hidden = len(residual_flags)

    def kernel(*refs):
        x_ref, b_ref = refs[0], refs[1]
        w_refs = refs[2:-1]
        out_ref = refs[-1]

        # Elementwise math in f32 (v5e VPU has no bf16); matmul operands are
        # cast to the weights' dtype (bf16 by default) with an f32 accumulator.
        h = x_ref[...].astype(jnp.float32)

        def dense(h, i):
            w = w_refs[i][...]                                      # (in_p, out_p)
            b = b_ref[i:i + 1, :padded_out_dims[i]].astype(jnp.float32)
            prec = jax.lax.Precision.HIGHEST if w.dtype == jnp.float32 else None
            return jnp.dot(h.astype(w.dtype), w,
                           preferred_element_type=jnp.float32,
                           precision=prec) + b

        for i in range(n_hidden):
            y = dense(h, i)
            y = jnp.maximum(y, LEAKY_SLOPE * y)           # LeakyReLU: mul+max (VPU)
            h = h + y if residual_flags[i] else y         # static residual flag

        h = jnp.tanh(h)                                   # EUP
        out_ref[...] = dense(h, n_hidden).astype(out_ref.dtype)

    return kernel


def init_resfnn_params(key, input_dim: int, output_dim: int,
                       hidden_dims: Sequence[int]):
    """PyTorch-style uniform(+-1/sqrt(fan_in)) init; W stored as (in, out)."""
    dims = [input_dim] + list(hidden_dims) + [output_dim]
    params = []
    for i in range(len(dims) - 1):
        fan_in, fan_out = dims[i], dims[i + 1]
        key, kw, kb = jax.random.split(key, 3)
        bound = 1.0 / float(fan_in) ** 0.5
        w = jax.random.uniform(kw, (fan_in, fan_out), jnp.float32, -bound, bound)
        b = jax.random.uniform(kb, (1, fan_out), jnp.float32, -bound, bound)
        params.append((w, b))
    return params


def _pallas_call_resfnn(kernel, xp, biases, weights, batch_tile, in_p, out_p,
                        out_dtype, weight_pipeline_mode, vmem_limit_bytes):
    Bp = xp.shape[0]
    n_grid = Bp // batch_tile

    const_map = lambda i: (0, 0)
    wb_kwargs = {}
    if weight_pipeline_mode is not None:
        # Constant index_map: the block never changes → one VMEM copy suffices.
        wb_kwargs = dict(pipeline_mode=weight_pipeline_mode)

    in_specs = [pl.BlockSpec((batch_tile, in_p), lambda i: (i, 0)),
                pl.BlockSpec(biases.shape, const_map, **wb_kwargs)]
    for w in weights:
        in_specs.append(pl.BlockSpec(w.shape, const_map, **wb_kwargs))
    out_spec = pl.BlockSpec((batch_tile, out_p), lambda i: (i, 0))

    return pl.pallas_call(
        kernel,
        out_shape=jax.ShapeDtypeStruct((Bp, out_p), out_dtype),
        grid_spec=pltpu.PrefetchScalarGridSpec(
            num_scalar_prefetch=0,
            grid=(n_grid,),
            in_specs=in_specs,
            out_specs=out_spec,
        ),
        compiler_params=pltpu.CompilerParams(
            dimension_semantics=("parallel",),   # batch steps shard across TCs
            vmem_limit_bytes=vmem_limit_bytes,
        ),
    )(xp, biases, *weights)


def resfnn_forward(x, params, input_dim: int, output_dim: int,
                   hidden_dims: Sequence[int], flatten: bool = False,
                   batch_tile: int = 1024,
                   compute_dtype=jnp.bfloat16,
                   single_buffer_weights: bool = True,
                   vmem_limit_bytes: Optional[int] = None,
                   out_dtype=None):
    """Pallas-backed ResFNN forward.

    x: (B, input_dim) (or any (B, ...) with flatten=True).
    params: list of (W, b) with W as (in, out), b as (1, out) or (out,).
    compute_dtype=bfloat16 quantizes weights / wire activations; pass
    compute_dtype=float32 for exact parity with the PyTorch module.
    """
    if flatten:
        x = x.reshape(x.shape[0], -1)
    assert x.shape[-1] == input_dim, (x.shape, input_dim)
    if out_dtype is None:
        out_dtype = compute_dtype
    if vmem_limit_bytes is None:
        vmem_limit_bytes = _default_vmem_limit_bytes()

    B = x.shape[0]
    dims = [input_dim] + list(hidden_dims) + [output_dim]
    n_layers = len(dims) - 1
    # Residual connection only when consecutive *original* dims match
    # (mirrors ResidualBlock); lane padding must not change this decision.
    residual_flags = tuple(dims[i] == dims[i + 1] for i in range(len(hidden_dims)))
    padded = [_round_up(d, LANE) for d in dims]    # lane-dense feature dims
    in_p, out_p = padded[0], padded[-1]
    max_out_p = max(padded[1:])

    # --- pad & cast parameters (zero padding keeps the math exact) ---------
    weights = []
    biases = jnp.zeros((n_layers, max_out_p), jnp.float32)
    for i, (w, b) in enumerate(params):
        in_d, out_d = dims[i], dims[i + 1]
        w = jnp.asarray(w).reshape(in_d, out_d).astype(compute_dtype)
        wp = jnp.zeros((padded[i], padded[i + 1]), compute_dtype)
        weights.append(wp.at[:in_d, :out_d].set(w))
        b = jnp.asarray(b).reshape(out_d).astype(jnp.float32)
        biases = biases.at[i, :out_d].set(b)

    # --- input on the wire in compute_dtype; fused pad+cast only if needed --
    bt = _choose_batch_tile(B, batch_tile)
    Bp = _round_up(B, bt)
    x_wire = x if x.dtype == compute_dtype else x.astype(compute_dtype)
    if Bp != B or in_p != input_dim:
        xp = jnp.zeros((Bp, in_p), compute_dtype).at[:B, :input_dim].set(x_wire)
    else:
        xp = x_wire

    kernel = _make_resfnn_kernel(residual_flags, tuple(padded[1:]))

    pipeline_mode = None
    if single_buffer_weights and hasattr(pl, "Buffered"):
        pipeline_mode = pl.Buffered(1)

    try:
        out_padded = _pallas_call_resfnn(
            kernel, xp, biases, weights, bt, in_p, out_p, out_dtype,
            pipeline_mode, vmem_limit_bytes)
    except _FALLBACK_ERRORS:
        if pipeline_mode is None:
            raise
        # Only the single-buffered weight spec was rejected; retry with the
        # default (double-buffered) pipeline.  Real OOM / runtime errors are
        # not in _FALLBACK_ERRORS and propagate above.
        out_padded = _pallas_call_resfnn(
            kernel, xp, biases, weights, bt, in_p, out_p, out_dtype,
            None, vmem_limit_bytes)

    # Strip batch and lane padding.
    return out_padded[:B, :output_dim]


def resfnn_reference(x, params, hidden_dims, flatten=False):
    """Pure-JAX reference (f32, highest-precision matmuls) for checking."""
    if flatten:
        x = x.reshape(x.shape[0], -1)
    h = x
    for i, hd in enumerate(hidden_dims):
        w, b = params[i]
        y = jnp.dot(h, w, precision=jax.lax.Precision.HIGHEST) \
            + jnp.asarray(b).reshape(1, -1)
        y = jnp.where(y > 0, y, LEAKY_SLOPE * y)
        h = h + y if h.shape[-1] == hd else y
    h = jnp.tanh(h)
    w, b = params[-1]
    return jnp.dot(h, w, precision=jax.lax.Precision.HIGHEST) \
        + jnp.asarray(b).reshape(1, -1)


if __name__ == "__main__":
    # Small deterministic config: two hidden layers, second has a residual add.
    input_dim, output_dim = 16, 8
    hidden_dims = (32, 32)
    B = 16

    key = jax.random.PRNGKey(0)
    kx, kp = jax.random.split(key)
    x = jax.random.normal(kx, (B, input_dim), dtype=jnp.float32)
    params = init_resfnn_params(kp, input_dim, output_dim, hidden_dims)

    ref = resfnn_reference(x, params, hidden_dims)

    # 1) f32 compute path: faithful check against the pure-JAX reference.
    out_f32 = jax.block_until_ready(
        resfnn_forward(x, params, input_dim, output_dim, hidden_dims,
                       compute_dtype=jnp.float32))
    assert out_f32.shape == (B, output_dim)
    assert jnp.allclose(out_f32, ref, atol=1e-4, rtol=1e-4), "f32 mismatch"

    # 2) bf16 compute path (default, MXU/HBM-friendly): looser tolerance.
    out_bf16 = jax.block_until_ready(
        resfnn_forward(x, params, input_dim, output_dim, hidden_dims,
                       compute_dtype=jnp.bfloat16))
    assert out_bf16.shape == (B, output_dim)
    assert jnp.allclose(out_bf16.astype(jnp.float32), ref,
                        atol=1e-1, rtol=1e-1), "bf16 mismatch"

    # 3) flatten path: (B, 4, 4) flattened to (B, 16) must match the f32 run.
    out_flat = jax.block_until_ready(
        resfnn_forward(x.reshape(B, 4, 4), params, input_dim, output_dim,
                       hidden_dims, flatten=True, compute_dtype=jnp.float32))
    assert jnp.allclose(out_flat, out_f32, atol=1e-6, rtol=1e-6), "flatten mismatch"

    print("KERNEL_OK")
</pallas_src>

<mosaic_0001>
module attributes {stable_mosaic.version = 11 : i64} {
  func.func @kernel(%arg0: i32, %arg1: memref<128x128xf32, #tpu.memory_space<vmem>>, %arg2: memref<3x128xf32, #tpu.memory_space<vmem>>, %arg3: memref<128x128xf32, #tpu.memory_space<vmem>>, %arg4: memref<128x128xf32, #tpu.memory_space<vmem>>, %arg5: memref<128x128xf32, #tpu.memory_space<vmem>>, %arg6: memref<128x128xf32, #tpu.memory_space<vmem>>) attributes {dimension_semantics = [#tpu.dimension_semantics<parallel>], iteration_bounds = array<i64: 1>, scalar_prefetch = 0 : i64, scratch_operands = 0 : i64, tpu.core_type = #tpu.core_type<tc>, window_params = [{transform_indices = @transform_0, window_bounds = array<i64: 128, 128>}, {pipeline_mode = #tpu.pipeline_mode<synchronous>, transform_indices = @transform_1, window_bounds = array<i64: 3, 128>}, {pipeline_mode = #tpu.pipeline_mode<synchronous>, transform_indices = @transform_2, window_bounds = array<i64: 128, 128>}, {pipeline_mode = #tpu.pipeline_mode<synchronous>, transform_indices = @transform_3, window_bounds = array<i64: 128, 128>}, {pipeline_mode = #tpu.pipeline_mode<synchronous>, transform_indices = @transform_4, window_bounds = array<i64: 128, 128>}, {transform_indices = @transform_5, window_bounds = array<i64: 128, 128>}]} {
    %c0 = arith.constant 0 : index
    %c0_0 = arith.constant 0 : index
    %0 = vector.load %arg1[%c0, %c0_0] : memref<128x128xf32, #tpu.memory_space<vmem>>, vector<128x128xf32>
    %c0_1 = arith.constant 0 : index
    %c0_2 = arith.constant 0 : index
    %1 = vector.load %arg3[%c0_1, %c0_2] : memref<128x128xf32, #tpu.memory_space<vmem>>, vector<128x128xf32>
    %c0_3 = arith.constant 0 : index
    %c0_4 = arith.constant 0 : index
    %2 = vector.load %arg2[%c0_3, %c0_4] : memref<3x128xf32, #tpu.memory_space<vmem>>, vector<1x128xf32>
    %cst = arith.constant dense<0.000000e+00> : vector<128x128xf32>
    %3 = tpu.matmul %0, %1, %cst {dimension_numbers = #tpu.dot_dimension_numbers<[1], [0], [0], [1], [0, 0, 1, 1], [], []>, precision = #tpu.contract_precision<fp32>} : vector<128x128xf32>, vector<128x128xf32>, vector<128x128xf32> -> vector<128x128xf32>
    %4 = vector.broadcast %2 : vector<1x128xf32> to vector<128x128xf32>
    %5 = arith.addf %3, %4 : vector<128x128xf32>
    %cst_5 = arith.constant 0.00999999977 : f32
    %6 = vector.broadcast %cst_5 : f32 to vector<128x128xf32>
    %7 = arith.mulf %6, %5 : vector<128x128xf32>
    %8 = arith.maximumf %5, %7 : vector<128x128xf32>
    %c0_6 = arith.constant 0 : index
    %c0_7 = arith.constant 0 : index
    %9 = vector.load %arg4[%c0_6, %c0_7] : memref<128x128xf32, #tpu.memory_space<vmem>>, vector<128x128xf32>
    %c1 = arith.constant 1 : index
    %c0_8 = arith.constant 0 : index
    %10 = vector.load %arg2[%c1, %c0_8] : memref<3x128xf32, #tpu.memory_space<vmem>>, vector<1x128xf32>
    %cst_9 = arith.constant dense<0.000000e+00> : vector<128x128xf32>
    %11 = tpu.matmul %8, %9, %cst_9 {dimension_numbers = #tpu.dot_dimension_numbers<[1], [0], [0], [1], [0, 0, 1, 1], [], []>, precision = #tpu.contract_precision<fp32>} : vector<128x128xf32>, vector<128x128xf32>, vector<128x128xf32> -> vector<128x128xf32>
    %12 = vector.broadcast %10 : vector<1x128xf32> to vector<128x128xf32>
    %13 = arith.addf %11, %12 : vector<128x128xf32>
    %cst_10 = arith.constant 0.00999999977 : f32
    %14 = vector.broadcast %cst_10 : f32 to vector<128x128xf32>
    %15 = arith.mulf %14, %13 : vector<128x128xf32>
    %16 = arith.maximumf %13, %15 : vector<128x128xf32>
    %17 = arith.addf %8, %16 : vector<128x128xf32>
    %18 = math.tanh %17 : vector<128x128xf32>
    %c0_11 = arith.constant 0 : index
    %c0_12 = arith.constant 0 : index
    %19 = vector.load %arg5[%c0_11, %c0_12] : memref<128x128xf32, #tpu.memory_space<vmem>>, vector<128x128xf32>
    %c2 = arith.constant 2 : index
    %c0_13 = arith.constant 0 : index
    %20 = vector.load %arg2[%c2, %c0_13] : memref<3x128xf32, #tpu.memory_space<vmem>>, vector<1x128xf32>
    %cst_14 = arith.constant dense<0.000000e+00> : vector<128x128xf32>
    %21 = tpu.matmul %18, %19, %cst_14 {dimension_numbers = #tpu.dot_dimension_numbers<[1], [0], [0], [1], [0, 0, 1, 1], [], []>, precision = #tpu.contract_precision<fp32>} : vector<128x128xf32>, vector<128x128xf32>, vector<128x128xf32> -> vector<128x128xf32>
    %22 = vector.broadcast %20 : vector<1x128xf32> to vector<128x128xf32>
    %23 = arith.addf %21, %22 : vector<128x128xf32>
    %c0_15 = arith.constant 0 : index
    %c0_16 = arith.constant 0 : index
    %24 = vector.load %arg6[%c0_15, %c0_16] : memref<128x128xf32, #tpu.memory_space<vmem>>, vector<128x128xf32>
    tpu.vector_store %arg6[%c0_15, %c0_16], %23 {strides = array<i32>} : memref<128x128xf32, #tpu.memory_space<vmem>>, vector<128x128xf32>,
    return
  }
  func.func @transform_0(%arg0: i32) -> (i32, i32) {
    %c0_i32 = arith.constant 0 : i32
    %c0_i32_0 = arith.constant 0 : i32
    return %arg0, %c0_i32 : i32, i32
  }
  func.func @transform_1(%arg0: i32) -> (i32, i32) {
    %c0_i32 = arith.constant 0 : i32
    %c0_i32_0 = arith.constant 0 : i32
    %c0_i32_1 = arith.constant 0 : i32
    return %c0_i32, %c0_i32_0 : i32, i32
  }
  func.func @transform_2(%arg0: i32) -> (i32, i32) {
    %c0_i32 = arith.constant 0 : i32
    %c0_i32_0 = arith.constant 0 : i32
    %c0_i32_1 = arith.constant 0 : i32
    return %c0_i32, %c0_i32_0 : i32, i32
  }
  func.func @transform_3(%arg0: i32) -> (i32, i32) {
    %c0_i32 = arith.constant 0 : i32
    %c0_i32_0 = arith.constant 0 : i32
    %c0_i32_1 = arith.constant 0 : i32
    return %c0_i32, %c0_i32_0 : i32, i32
  }
  func.func @transform_4(%arg0: i32) -> (i32, i32) {
    %c0_i32 = arith.constant 0 : i32
    %c0_i32_0 = arith.constant 0 : i32
    %c0_i32_1 = arith.constant 0 : i32
    return %c0_i32, %c0_i32_0 : i32, i32
  }
  func.func @transform_5(%arg0: i32) -> (i32, i32) {
    %c0_i32 = arith.constant 0 : i32
    %c0_i32_0 = arith.constant 0 : i32
    return %arg0, %c0_i32 : i32, i32
  }
}

</mosaic_0001>

<bundles_post_ra>
// kernel: tpu_custom_call.1
= control target key start
LH: loop header
LB: loop body
LE: loop exit
PB: predicated region body
PF: predicated region fallthrough
CT: control target
= control target key end

     0   :  { %10 = vsyncpa [#allocation3], 0  ;;  %s8237_s0 = inlined_call_operand.hbm [shape: f32[128,128], index: 0, kind: input, shape index: {}]   ;;  %s8238_s1 = inlined_call_operand.hbm [shape: f32[3,128], index: 1, kind: input, shape index: {}]   ;;  %s8239_s2 = inlined_call_operand.hbm [shape: f32[128,128], index: 2, kind: input, shape index: {}]   ;;  %s8240_s3 = inlined_call_operand.hbm [shape: f32[128,128], index: 3, kind: input, shape index: {}]   ;;  %s8241_s4 = inlined_call_operand.hbm [shape: f32[128,128], index: 4, kind: input, shape index: {}]   ;;  %s8242_s5 = inlined_call_operand.hbm [shape: f32[128,128], index: 5, kind: output, shape index: {}]  }
   0x1   :  { %11 = vsyncpa [#allocation6], 0 }
   0x2   :  { %12 = vsyncpa [#allocation9], 0 }
   0x3   :  { %13 = vsyncpa [#allocation4], 0  ;;  %s5910_s18 = smov [#allocation5]  }
   0x4   :  { %s32_s19 = sshll.u32 %s5910_s18, 4  ;;  %s33_s19 = int_to_ptr.vmem [resolvable:$true] %s32_s19 }
   0x5   :  { %s5790_s20 = scalar_lea.vmem %s33_s19, 64  ;;  %p5795_p1 = scmp.lt.s32.totalorder %s33_s19, %s33_s19 }
   0x6   :  { %p5791_p0 = scmp.ne.s32.totalorder %s33_s19, %s5790_s20  ;;  %p5796_p2 = scmp.lt.s32.totalorder %s5790_s20, %s5790_s20 }
   0x8   :  { %p5797_p3 = por %p5796_p2, %p5795_p1 }
   0xa   :  { %p5798_p4 = pnand %p5797_p3, %p5791_p0 }
   0xc   :  { %5801 = shalt.err (!%p5798_p4)
}
   0xd   :  { %35 = dma.hbm_to_vmem [thread:$0]  %s8238_s1, 64, %s33_s19, [#allocation6]  }
   0xe   :  { %s5911_s23 = smov [#allocation8]   ;;  %s5912_s25 = smov [#allocation2]  }
   0xf   :  { %s53_s24 = sshll.u32 %s5911_s23, 4  ;;  %s19_s26 = sshll.u32 %s5912_s25, 4  ;;  %s54_s24 = int_to_ptr.vmem [resolvable:$true] %s53_s24  ;;  %s20_s26 = int_to_ptr.vmem [resolvable:$true] %s19_s26 }
  0x10   :  { %s5810_s27 = scalar_lea.vmem %s54_s24, 2048  ;;  %p5815_p6 = scmp.lt.s32.totalorder %s54_s24, %s54_s24 }
  0x11   :  { %p5811_p5 = scmp.ne.s32.totalorder %s54_s24, %s5810_s27  ;;  %p5816_p7 = scmp.lt.s32.totalorder %s5810_s27, %s5810_s27 }
  0x13   :  { %p5817_p8 = por %p5816_p7, %p5815_p6 }
  0x15   :  { %p5818_p9 = pnand %p5817_p8, %p5811_p5 }
  0x17   :  { %5821 = shalt.err (!%p5818_p9)
}
  0x18   :  { %s5913_s28 = smov 128   ;;  %s5914_s29 = smov 8  }
  0x19   :  { %59 = dma.hbm_to_vmem [thread:$0]  %s8240_s3, 2048, %s54_s24, [#allocation9], %s5913_s28, %s5913_s28, %s5914_s29  }
  0x1a   :  { %s5830_s1 = scalar_lea.vmem %s20_s26, 2048  ;;  %p5835_p11 = scmp.lt.s32.totalorder %s20_s26, %s20_s26 }
  0x1b   :  { %p5831_p10 = scmp.ne.s32.totalorder %s20_s26, %s5830_s1  ;;  %p5836_p12 = scmp.lt.s32.totalorder %s5830_s1, %s5830_s1 }
  0x1d   :  { %p5837_p13 = por %p5836_p12, %p5835_p11 }
  0x1f   :  { %p5838_p0 = pnand %p5837_p13, %p5831_p10 }
  0x21   :  { %5841 = shalt.err (!%p5838_p0)
}
  0x22   :  { %25 = dma.hbm_to_vmem [thread:$0]  %s8237_s0, 2048, %s20_s26, [#allocation3], %s5913_s28, %s5913_s28, %s5914_s29  }
  0x23   :  { %s5915_s9 = smov [#allocation7]   ;;  %s5916_s11 = smov [#allocation10]  }
  0x24   :  { %s41_s10 = sshll.u32 %s5915_s9, 4  ;;  %s65_s3 = sshll.u32 %s5916_s11, 4  ;;  %s42_s10 = int_to_ptr.vmem [resolvable:$true] %s41_s10  ;;  %s66_s3 = int_to_ptr.vmem [resolvable:$true] %s65_s3 }
  0x25   :  { %s5850_s12 = scalar_lea.vmem %s42_s10, 2048  ;;  %p5855_p2 = scmp.lt.s32.totalorder %s42_s10, %s42_s10 }
  0x26   :  { %p5851_p1 = scmp.ne.s32.totalorder %s42_s10, %s5850_s12  ;;  %p5856_p3 = scmp.lt.s32.totalorder %s5850_s12, %s5850_s12 }
  0x28   :  { %p5857_p4 = por %p5856_p3, %p5855_p2 }
  0x2a   :  { %p5858_p5 = pnand %p5857_p4, %p5851_p1 }
  0x2c   :  { %5861 = shalt.err (!%p5858_p5)
}
  0x2d   :  { %47 = dma.hbm_to_vmem [thread:$0]  %s8239_s2, 2048, %s42_s10, [#allocation6], %s5913_s28, %s5913_s28, %s5914_s29  }
  0x2e   :  { %s5870_s0 = scalar_lea.vmem %s66_s3, 2048  ;;  %p5875_p7 = scmp.lt.s32.totalorder %s66_s3, %s66_s3 }
  0x2f   :  { %p5871_p6 = scmp.ne.s32.totalorder %s66_s3, %s5870_s0  ;;  %p5876_p8 = scmp.lt.s32.totalorder %s5870_s0, %s5870_s0 }
  0x31   :  { %p5877_p9 = por %p5876_p8, %p5875_p7 }
  0x33   :  { %p5878_p10 = pnand %p5877_p9, %p5871_p6 }
  0x35   :  { %5881 = shalt.err (!%p5878_p10)
}
  0x36   :  { %71 = dma.hbm_to_vmem [thread:$0]  %s8241_s4, 2048, %s66_s3, [#allocation9], %s5913_s28, %s5913_s28, %s5914_s29  }
  0x37   :  { %5902 = dma.done.wait [#allocation3], 2048  }
  0x38   :  { %5903 = vsyncadd [#allocation3], 4294965248 }
  0x39   :  { %5904 = dma.done.wait [#allocation6], 2112  }
  0x3a   :  { %5905 = vsyncadd [#allocation6], 4294965184 }
  0x3b   :  { %5906 = dma.done.wait [#allocation9], 4096  }
  0x3c   :  { %5907 = vsyncadd [#allocation9], 4294963200  ;;  %v118_v0 = vld [vmem:[#allocation7 + $0x78] sm:$0xff]  ;;  %v117_v1 = vld [vmem:[#allocation7 + $0x70] sm:$0xff]  ;;  %s5917_s2 = smov [#allocation11]  }
  0x3d   :  { %v116_v2 = vld [vmem:[#allocation7 + $0x68] sm:$0xff]  ;;  %v5975_v3 = vand.u32 4294901760, %v118_v0  ;;  %v5977_v4 = vand.u32 4294901760, %v117_v1  ;;  %v115_v6 = vld [vmem:[#allocation7 + $0x60] sm:$0xff]  ;;  %v114_v7 = vld [vmem:[#allocation7 + $0x58] sm:$0xff]  ;;  %s4141_s4 = sshll.u32 %s5917_s2, 4  ;;  %s4142_s4 = int_to_ptr.vmem [resolvable:$true] %s4141_s4 }
  0x3e   :  { %v5979_v5 = vand.u32 4294901760, %v116_v2  ;;  %v113_v8 = vld [vmem:[#allocation7 + $0x50] sm:$0xff]  ;;  %v5981_v9 = vand.u32 4294901760, %v115_v6  ;;  %v5983_v10 = vand.u32 4294901760, %v114_v7  ;;  %v112_v12 = vld [vmem:[#allocation7 + $0x48] sm:$0xff]  ;;  %v111_v13 = vld [vmem:[#allocation7 + $0x40] sm:$0xff]  ;;  %p5887_p12 = scmp.lt.s32.totalorder %s4142_s4, %s4142_s4 }
  0x3f   :  { %v5985_v11 = vand.u32 4294901760, %v113_v8  ;;  %4734 = vmatprep.subr.mxu0 %v5975_v3  ;;  %v5989_v14 = vsub.f32 %v118_v0, %v5975_v3  ;;  %v5992_v15 = vsub.f32 %v117_v1, %v5977_v4  ;;  %v5994_v16 = vand.u32 4294901760, %v112_v12  ;;  %v110_v18 = vld [vmem:[#allocation7 + $0x38] sm:$0xff]  ;;  %v109_v25 = vld [vmem:[#allocation7 + $0x30] sm:$0xff]  ;;  %v108_v35 = vld [vmem:[#allocation7 + $0x28] sm:$0xff]  ;;  %s5882_s17 = scalar_lea.vmem %s4142_s4, 2048 }
  0x40   :  { %v5997_v17 = vsub.f32 %v116_v2, %v5979_v5  ;;  %4735 = vmatpush3.msra.mxu0 %v5975_v3  ;;  %v6001_v19 = vsub.f32 %v115_v6, %v5981_v9  ;;  %v6004_v20 = vsub.f32 %v114_v7, %v5983_v10  ;;  %v6016_v24 = vand.u32 4294901760, %v111_v13  ;;  %v107_v40 = vld [vmem:[#allocation7 + $0x20] sm:$0xff]  ;;  %v106_v53 = vld [vmem:[#allocation7 + $0x18] sm:$0xff]  ;;  %v105_v59 = vld [vmem:[#allocation7 + $0x10] sm:$0xff]  ;;  %p5883_p11 = scmp.ne.s32.totalorder %s4142_s4, %s5882_s17  ;;  %p5888_p13 = scmp.lt.s32.totalorder %s5882_s17, %s5882_s17 }
  0x41   :  { %4736 = vmatprep.subr.mxu0 %v5977_v4  ;;  %v6008_v21 = vand.u32 4294901760, %v5989_v14  ;;  %v6011_v22 = vand.u32 4294901760, %v5992_v15  ;;  %v6022_v27 = vand.u32 4294901760, %v110_v18  ;;  %v6028_v29 = vsub.f32 %v113_v8, %v5985_v11  ;;  %v87_v47 = vld [vmem:[#allocation2] sm:$0xff]  ;;  %v88_v49 = vld [vmem:[#allocation2 + $0x8] sm:$0xff]  ;;  %v89_v63 = vld [vmem:[#allocation2 + $0x10] sm:$0xff] }
  0x42   :  { %v6014_v23 = vand.u32 4294901760, %v5997_v17  ;;  %4737 = vmatpush3.msra.mxu0 %v5977_v4  ;;  %v6020_v26 = vand.u32 4294901760, %v6001_v19  ;;  %v6025_v28 = vand.u32 4294901760, %v6004_v20  ;;  %v6038_v33 = vsub.f32 %v112_v12, %v5994_v16  ;;  %v104_v6 = vld [vmem:[#allocation7 + $0x8] sm:$0xff]  ;;  %p5889_p0 = por %p5888_p13, %p5887_p12 }
  0x43   :  { %8505 = vst [vmem:[#allocation16_spill] sm:$0xff] %v6011_v22  ;;  %4738 = vmatprep.subr.mxu0 %v5979_v5  ;;  %v369_v30 = vsub.f32 %v5989_v14, %v6008_v21  ;;  %v376_v31 = vsub.f32 %v5992_v15, %v6011_v22  ;;  %v6041_v34 = vand.u32 4294901760, %v109_v25  ;;  %v6047_v39 = vand.u32 4294901760, %v6028_v29  ;;  %v96_v22 = vld [vmem:[#allocation2 + $0x48] sm:$0xff] }
  0x44   :  { %8506 = vst [vmem:[#allocation17_spill] sm:$0xff] %v6014_v23  ;;  %8507 = vst [vmem:[#allocation18_spill] sm:$0xff] %v6020_v26  ;;  %v383_v32 = vsub.f32 %v5997_v17, %v6014_v23  ;;  %4739 = vmatpush3.msra.mxu0 %v5979_v5  ;;  %v390_v38 = vsub.f32 %v6001_v19, %v6020_v26  ;;  %v6051_v41 = vand.u32 4294901760, %v6038_v33  ;;  %v6059_v45 = vand.u32 4294901760, %v108_v35  ;;  %p5890_p1 = pnand %p5889_p0, %p5883_p11 }
  0x45   :  { %8508 = vst [vmem:[#allocation19_spill] sm:$0xff] %v6025_v28  ;;  %4740 = vmatprep.subr.mxu0 %v5981_v9  ;;  %v370_v36 = vand.u32 4294901760, %v369_v30  ;;  %v377_v37 = vand.u32 4294901760, %v376_v31  ;;  %8509 = vst [vmem:[#allocation20_spill] sm:$0xff] %v6047_v39  ;;  %v6054_v42 = vsub.f32 %v111_v13, %v6016_v24  ;;  %v397_v44 = vsub.f32 %v6004_v20, %v6025_v28  ;;  %v103_v31 = vld [vmem:[#allocation7] sm:$0xff] }
  0x46   :  { %4741 = vmatpush3.msra.mxu0 %v5981_v9  ;;  %8510 = vst [vmem:[#allocation21_spill] sm:$0xff] %v6051_v41  ;;  %v384_v43 = vand.u32 4294901760, %v383_v32  ;;  %v6062_v46 = vsub.f32 %v110_v18, %v6022_v27  ;;  %v6065_v48 = vand.u32 4294901760, %v107_v40  ;;  %v391_v50 = vand.u32 4294901760, %v390_v38  ;;  %v90_v18 = vld [vmem:[#allocation2 + $0x18] sm:$0xff] }
  0x47   :  { %4742 = vmatprep.subr.mxu0 %v5983_v10  ;;  %4790 = vmatprep.subr.mxu1 %v370_v36  ;;  %v404_v51 = vsub.f32 %v6028_v29, %v6047_v39  ;;  %v6071_v52 = vand.u32 4294901760, %v6054_v42  ;;  %v6074_v54 = vsub.f32 %v109_v25, %v6041_v34  ;;  %v411_v55 = vsub.f32 %v6038_v33, %v6051_v41  ;;  %v93_v41 = vld [vmem:[#allocation2 + $0x30] sm:$0xff] }
  0x48   :  { %4743 = vmatpush3.msra.mxu0 %v5983_v10  ;;  %4791 = vmatpush3.msra.mxu1 %v370_v36  ;;  %v6079_v56 = vand.u32 4294901760, %v87_v47  ;;  %v398_v57 = vand.u32 4294901760, %v397_v44  ;;  %v6083_v58 = vand.u32 4294901760, %v6062_v46  ;;  %v6086_v60 = vsub.f32 %v108_v35, %v6059_v45 }
  0x49   :  { %4744 = vmatprep.subr.mxu0 %v5985_v11  ;;  %4792 = vmatprep.subr.mxu1 %v377_v37  ;;  %8511 = vst [vmem:[#allocation22_spill] sm:$0xff] %v6071_v52  ;;  %v6088_v61 = vand.u32 4294901760, %v88_v49  ;;  %v6091_v62 = vand.u32 4294901760, %v106_v53  ;;  %v405_v0 = vand.u32 4294901760, %v404_v51  ;;  %v418_v1 = vsub.f32 %v6054_v42, %v6071_v52  ;;  %v94_v52 = vld [vmem:[#allocation2 + $0x38] sm:$0xff] }
  0x4a   :  { %4745 = vmatpush3.msra.mxu0 %v5985_v11  ;;  %4793 = vmatpush3.msra.mxu1 %v377_v37  ;;  %8512 = vst [vmem:[#allocation23_spill] sm:$0xff] %v6083_v58  ;;  %v6097_v2 = vand.u32 4294901760, %v6074_v54  ;;  %v6100_v7 = vsub.f32 %v107_v40, %v6065_v48  ;;  %v412_v8 = vand.u32 4294901760, %v411_v55  ;;  %v6103_v12 = vand.u32 4294901760, %v105_v59 }
  0x4b   :  { %4746 = vmatprep.subr.mxu0 %v5994_v16  ;;  %4794 = vmatprep.subr.mxu1 %v384_v43  ;;  %v6106_v13 = vsub.f32 %v87_v47, %v6079_v56  ;;  %v425_v25 = vsub.f32 %v6062_v46, %v6083_v58  ;;  %v6112_v30 = vand.u32 4294901760, %v6086_v60  ;;  %v6115_v32 = vsub.f32 %v88_v49, %v6088_v61  ;;  %v91_v47 = vld [vmem:[#allocation2 + $0x20] sm:$0xff] }
  0x4c   :  { %4747 = vmatpush3.msra.mxu0 %v5994_v16  ;;  %4795 = vmatpush3.msra.mxu1 %v384_v43  ;;  %8513 = vst [vmem:[#allocation24_spill] sm:$0xff] %v6097_v2  ;;  %v6117_v35 = vand.u32 4294901760, %v89_v63  ;;  %v6120_v36 = vand.u32 4294901760, %v104_v6  ;;  %v6123_v37 = vsub.f32 %v106_v53, %v6091_v62  ;;  %v419_v38 = vand.u32 4294901760, %v418_v1 }
  0x4d   :  { %4748 = vmatprep.subr.mxu0 %v6016_v24  ;;  %4796 = vmatprep.subr.mxu1 %v391_v50  ;;  %8514 = vst [vmem:[#allocation25_spill] sm:$0xff] %v6112_v30  ;;  %v432_v40 = vsub.f32 %v6074_v54, %v6097_v2  ;;  %v6129_v43 = vand.u32 4294901760, %v6100_v7  ;;  %v6131_v44 = vand.u32 4294901760, %v90_v18  ;;  %v6134_v49 = vand.u32 4294901760, %v103_v31 }
  0x4e   :  { %4749 = vmatpush3.msra.mxu0 %v6016_v24  ;;  %4797 = vmatpush3.msra.mxu1 %v391_v50  ;;  %8515 = vst [vmem:[#allocation26_spill] sm:$0xff] %v6120_v36  ;;  %v6138_v51 = vsub.f32 %v105_v59, %v6103_v12  ;;  %v426_v53 = vand.u32 4294901760, %v425_v25  ;;  %v439_v55 = vsub.f32 %v6086_v60, %v6112_v30  ;;  %v6149_v50 = vand.u32 4294901760, %v6123_v37 }
  0x4f   :  { %4750 = vmatprep.subr.mxu0 %v6022_v27  ;;  %4798 = vmatprep.subr.mxu1 %v398_v57  ;;  %8516 = vst [vmem:[#allocation27_spill] sm:$0xff] %v6129_v43  ;;  %8517 = vst [vmem:[#allocation28_spill] sm:$0xff] %v6134_v49  ;;  %v6145_v1 = vsub.f32 %v89_v63, %v6117_v35  ;;  %v6152_v59 = vsub.f32 %v104_v6, %v6120_v36  ;;  %v6154_v2 = vand.u32 4294901760, %v91_v47 }
  0x50   :  { %4751 = vmatpush3.msra.mxu0 %v6022_v27  ;;  %4799 = vmatpush3.msra.mxu1 %v398_v57  ;;  %8519 = vst [vmem:[#allocation30_spill] sm:$0xff] %v6149_v50  ;;  %v433_v25 = vand.u32 4294901760, %v432_v40  ;;  %v446_v63 = vsub.f32 %v6100_v7, %v6129_v43  ;;  %v6160_v57 = vsub.f32 %v90_v18, %v6131_v44  ;;  %v6167_v30 = vand.u32 4294901760, %v6138_v51 }
  0x51   :  { %4752 = vmatprep.subr.mxu0 %v6041_v34  ;;  %4800 = vmatprep.subr.mxu1 %v405_v0  ;;  %8518 = vst [vmem:[#allocation29_spill] sm:$0xff] %v6145_v1  ;;  %v440_v40 = vand.u32 4294901760, %v439_v55  ;;  %v8522_v43 = vand.u32 4294901760, %v6115_v32  ;;  %v6183_v39 = vand.u32 4294901760, %v6152_v59  ;;  %v6186_v55 = vsub.f32 %v91_v47, %v6154_v2 }
  0x52   :  { %4753 = vmatpush3.msra.mxu0 %v6041_v34  ;;  %4801 = vmatpush3.msra.mxu1 %v405_v0  ;;  %v92_v0 = vld [vmem:[#allocation2 + $0x28] sm:$0xff]  ;;  %8521 = vst [vmem:[#allocation31_spill] sm:$0xff] %v6167_v30  ;;  %v6196_v26 = vand.u32 4294901760, %v93_v41 }
  0x53   :  { %4754 = vmatprep.subr.mxu0 %v6059_v45  ;;  %4802 = vmatprep.subr.mxu1 %v412_v8  ;;  %v6169_v58 = vand.u32 4294901760, %v92_v0  ;;  %v218_v18 = vsub.f32 %v6115_v32, %v8522_v43  ;;  %8523 = vst [vmem:[#allocation32_spill] sm:$0xff] %v6183_v39  ;;  %v447_v43 = vand.u32 4294901760, %v446_v63  ;;  %v8524_v63 = vand.u32 4294901760, %v6145_v1 }
  0x54   :  { %4755 = vmatpush3.msra.mxu0 %v6059_v45  ;;  %4803 = vmatpush3.msra.mxu1 %v412_v8  ;;  %v8520_v8 = vand.u32 4294901760, %v6106_v13 }
  0x55   :  { %4756 = vmatprep.subr.mxu0 %v6065_v48  ;;  %4804 = vmatprep.subr.mxu1 %v419_v38  ;;  %v6194_v28 = vsub.f32 %v92_v0, %v6169_v58  ;;  %v219_v47 = vand.u32 4294901760, %v218_v18  ;;  %v467_v0 = vsub.f32 %v6152_v59, %v6183_v39  ;;  %v8525_v18 = vand.u32 4294901760, %v6160_v57 }
  0x56   :  { %4757 = vmatpush3.msra.mxu0 %v6065_v48  ;;  %4805 = vmatpush3.msra.mxu1 %v419_v38  ;;  %v208_v6 = vsub.f32 %v6106_v13, %v8520_v8  ;;  %v6177_v38 = vsub.f32 %v103_v31, %v6134_v49  ;;  %v453_v8 = vsub.f32 %v6123_v37, %v6149_v50 }
  0x57   :  { %4758 = vmatprep.subr.mxu0 %v6091_v62  ;;  %4806 = vmatprep.subr.mxu1 %v426_v53  ;;  %v460_v50 = vsub.f32 %v6138_v51, %v6167_v30  ;;  %v228_v31 = vsub.f32 %v6145_v1, %v8524_v63  ;;  %v6209_v30 = vand.u32 4294901760, %v94_v52  ;;  %v238_v63 = vsub.f32 %v6160_v57, %v8525_v18  ;;  %v95_v1 = vld [vmem:[#allocation2 + $0x40] sm:$0xff] }
  0x58   :  { %4759 = vmatpush3.msra.mxu0 %v6091_v62  ;;  %4807 = vmatpush3.msra.mxu1 %v426_v53  ;;  %v209_v53 = vand.u32 4294901760, %v208_v6  ;;  %v6203_v23 = vand.u32 4294901760, %v6177_v38  ;;  %v6218_v39 = vsub.f32 %v93_v41, %v6196_v26  ;;  %v468_v18 = vand.u32 4294901760, %v467_v0 }
  0x59   :  { %4760 = vmatprep.subr.mxu0 %v6103_v12  ;;  %4808 = vmatprep.subr.mxu1 %v433_v25  ;;  %v229_v6 = vand.u32 4294901760, %v228_v31  ;;  %v6229_v41 = vand.u32 4294901760, %v95_v1  ;;  %v6237_v0 = vand.u32 4294901760, %v96_v22 }
  0x5a   :  { %4761 = vmatpush3.msra.mxu0 %v6103_v12  ;;  %4809 = vmatpush3.msra.mxu1 %v433_v25  ;;  %v454_v25 = vand.u32 4294901760, %v453_v8  ;;  %v8277_v8 = vand.u32 4294901760, %v6194_v28 }
  0x5b   :  { %4762 = vmatprep.subr.mxu0 %v6120_v36  ;;  %4810 = vmatprep.subr.mxu1 %v440_v40 }
  0x5c   :  { %4763 = vmatpush3.msra.mxu0 %v6120_v36  ;;  %4811 = vmatpush3.msra.mxu1 %v440_v40  ;;  %v461_v40 = vand.u32 4294901760, %v460_v50  ;;  %v474_v36 = vsub.f32 %v6177_v38, %v6203_v23  ;;  %v258_v31 = vsub.f32 %v6194_v28, %v8277_v8  ;;  %v98_v8 = vld [vmem:[#allocation2 + $0x58] sm:$0xff] }
  0x5d   :  { %4764 = vmatprep.subr.mxu0 %v6134_v49  ;;  %4812 = vmatprep.subr.mxu1 %v447_v43 }
  0x5e   :  { %4765 = vmatpush3.msra.mxu0 %v6134_v49  ;;  %4766 = vmatprep.mubr.f32.mxu0 %v209_v53  ;;  %v8526_v49 = vand.u32 4294901760, %v6186_v55  ;;  %v6227_v53 = vsub.f32 %v94_v52, %v6209_v30  ;;  %v475_v52 = vand.u32 4294901760, %v474_v36 }
  0x5f   :  { %4813 = vmatpush3.msra.mxu1 %v447_v43  ;;  %4767 = vmatmul.mubr.f32.vlgmr.msra.gmra.mxu0 %v219_v47  ;;  %v239_v43 = vand.u32 4294901760, %v238_v63  ;;  %v8281_v47 = vand.u32 4294901760, %v6218_v39  ;;  %v6242_v63 = vsub.f32 %v95_v1, %v6229_v41 }
  0x60   :  { %4814 = vmatprep.subr.mxu1 %v454_v25  ;;  %4846 = vmatprep.subr.mxu0 %v5989_v14  ;;  %v248_v50 = vsub.f32 %v6186_v55, %v8526_v49  ;;  %v97_v49 = vld [vmem:[#allocation2 + $0x50] sm:$0xff] }
  0x61   :  { %4815 = vmatpush3.msra.mxu1 %v454_v25  ;;  %4847 = vmatpush3.msra.mxu0 %v5989_v14  ;;  %v8279_v25 = vand.u32 4294901760, %v6227_v53  ;;  %v268_v36 = vsub.f32 %v6218_v39, %v8281_v47 }
  0x62   :  { %4816 = vmatprep.subr.mxu1 %v461_v40  ;;  %4848 = vmatprep.subr.mxu0 %v5992_v15  ;;  %v249_v14 = vand.u32 4294901760, %v248_v50 }
  0x63   :  { %4769 = vmatprep.mubr.f32.mxu0 %v229_v6  ;;  %4817 = vmatpush3.msra.mxu1 %v461_v40  ;;  %v259_v6 = vand.u32 4294901760, %v258_v31  ;;  %v6252_v40 = vand.u32 4294901760, %v97_v49  ;;  %v278_v1 = vsub.f32 %v6227_v53, %v8279_v25  ;;  %v269_v50 = vand.u32 4294901760, %v268_v36 }
  0x64   :  { %4849 = vmatpush3.msra.mxu0 %v5992_v15  ;;  %4818 = vmatprep.subr.mxu1 %v468_v18  ;;  %v6250_v15 = vsub.f32 %v96_v22, %v6237_v0  ;;  %v99_v22 = vld [vmem:[#allocation2 + $0x60] sm:$0xff] }
  0x65   :  { %4770 = vmatmul.mubr.f32.gmra.mxu0 %v239_v43  ;;  %4850 = vmatprep.subr.mxu0 %v5997_v17  ;;  %v6266_v31 = vsub.f32 %v97_v49, %v6252_v40  ;;  %v6278_v36 = vand.u32 4294901760, %v99_v22 }
  0x66   :  { %4819 = vmatpush3.msra.mxu1 %v468_v18  ;;  %4851 = vmatpush3.msra.mxu0 %v5997_v17  ;;  %v8278_v17 = vand.u32 4294901760, %v6242_v63  ;;  %v6259_v18 = vand.u32 4294901760, %v98_v8  ;;  %v8280_v43 = vand.u32 4294901760, %v6250_v15 }
  0x67   :  { %4820 = vmatprep.subr.mxu1 %v475_v52  ;;  %4852 = vmatprep.subr.mxu0 %v6001_v19  ;;  %v8282_v49 = vand.u32 4294901760, %v6266_v31  ;;  %v6294_v25 = vsub.f32 %v99_v22, %v6278_v36 }
  0x68   :  { %4772 = vmatprep.mubr.f32.mxu0 %v249_v14  ;;  %4821 = vmatpush3.msra.mxu1 %v475_v52  ;;  %v100_v52 = vld [vmem:[#allocation2 + $0x68] sm:$0xff]  ;;  %v288_v14 = vsub.f32 %v6242_v63, %v8278_v17 }
  0x69   :  { %4822 = vmatprep.mubr.f32.mxu1 %v6079_v56  ;;  %4853 = vmatpush3.msra.mxu0 %v6001_v19  ;;  %v279_v19 = vand.u32 4294901760, %v278_v1  ;;  %v6287_v1 = vand.u32 4294901760, %v100_v52  ;;  %v327_v22 = vand.u32 4294901760, %v6294_v25 }
  0x6a   :  { %4773 = vmatmul.mubr.f32.gmra.mxu0 %v259_v6  ;;  %4823 = vmatmul.mubr.f32.vlgmr.msra.gmra.mxu1 %v6088_v61  ;;  %v6276_v6 = vsub.f32 %v98_v8, %v6259_v18  ;;  %v101_v8 = vld [vmem:[#allocation2 + $0x70] sm:$0xff]  ;;  %v289_v17 = vand.u32 4294901760, %v288_v14 }
  0x6b   :  { %4854 = vmatprep.subr.mxu0 %v6004_v20  ;;  %4902 = vmatprep.subr.mxu1 %v5975_v3  ;;  %v6304_v14 = vsub.f32 %v100_v52, %v6287_v1  ;;  %v6306_v47 = vand.u32 4294901760, %v101_v8 }
  0x6c   :  { %4855 = vmatpush3.msra.mxu0 %v6004_v20  ;;  %4903 = vmatpush3.msra.mxu1 %v5975_v3  ;;  %v298_v20 = vsub.f32 %v6250_v15, %v8280_v43  ;;  %v102_v43 = vld [vmem:[#allocation2 + $0x78] sm:$0xff] }
  0x6d   :  { %4856 = vmatprep.subr.mxu0 %v6028_v29  ;;  %4904 = vmatprep.subr.mxu1 %v5977_v4 }
  0x6e   :  { %4775 = vmatprep.mubr.f32.mxu0 %v269_v50  ;;  %4825 = vmatprep.mubr.f32.mxu1 %v6117_v35  ;;  %v317_v50 = vand.u32 4294901760, %v6276_v6 }
  0x6f   :  { %4857 = vmatpush3.msra.mxu0 %v6028_v29  ;;  %4905 = vmatpush3.msra.mxu1 %v5977_v4  ;;  %v299_v29 = vand.u32 4294901760, %v298_v20  ;;  %v6315_v20 = vand.u32 4294901760, %v102_v43 }
  0x70   :  { %4776 = vmatmul.mubr.f32.gmra.mxu0 %v279_v19  ;;  %4826 = vmatmul.mubr.f32.gmra.mxu1 %v6131_v44  ;;  %v308_v19 = vsub.f32 %v6266_v31, %v8282_v49  ;;  %v6322_v49 = vsub.f32 %v101_v8, %v6306_v47 }
  0x71   :  { %4858 = vmatprep.subr.mxu0 %v6038_v33  ;;  %4906 = vmatprep.subr.mxu1 %v5979_v5 }
  0x72   :  { %4859 = vmatpush3.msra.mxu0 %v6038_v33  ;;  %4907 = vmatpush3.msra.mxu1 %v5979_v5  ;;  %v318_v33 = vsub.f32 %v6276_v6, %v317_v50  ;;  %v309_v52 = vand.u32 4294901760, %v308_v19  ;;  %v6332_v19 = vsub.f32 %v102_v43, %v6315_v20  ;;  %v347_v8 = vand.u32 4294901760, %v6322_v49 }
  0x73   :  { %4860 = vmatprep.subr.mxu0 %v6054_v42  ;;  %4908 = vmatprep.subr.mxu1 %v5981_v9 }
  0x74   :  { %4778 = vmatprep.mubr.f32.mxu0 %v289_v17  ;;  %4828 = vmatprep.mubr.f32.mxu1 %v6154_v2  ;;  %v337_v17 = vand.u32 4294901760, %v6304_v14 }
  0x75   :  { %4861 = vmatpush3.msra.mxu0 %v6054_v42  ;;  %4909 = vmatpush3.msra.mxu1 %v5981_v9  ;;  %v319_v42 = vand.u32 4294901760, %v318_v33  ;;  %v357_v33 = vand.u32 4294901760, %v6332_v19 }
  0x76   :  { %4779 = vmatmul.mubr.f32.gmra.mxu0 %v299_v29  ;;  %4829 = vmatmul.mubr.f32.gmra.mxu1 %v6169_v58  ;;  %v328_v29 = vsub.f32 %v6294_v25, %v327_v22 }
  0x77   :  { %4862 = vmatprep.subr.mxu0 %v6062_v46  ;;  %4910 = vmatprep.subr.mxu1 %v5983_v10 }
  0x78   :  { %4863 = vmatpush3.msra.mxu0 %v6062_v46  ;;  %4911 = vmatpush3.msra.mxu1 %v5983_v10  ;;  %v338_v46 = vsub.f32 %v6304_v14, %v337_v17  ;;  %v329_v43 = vand.u32 4294901760, %v328_v29 }
  0x79   :  { %4864 = vmatprep.subr.mxu0 %v6074_v54  ;;  %4912 = vmatprep.subr.mxu1 %v5985_v11 }
  0x7a   :  { %4781 = vmatprep.mubr.f32.mxu0 %v309_v52  ;;  %4831 = vmatprep.mubr.f32.mxu1 %v6196_v26  ;;  %v339_v52 = vand.u32 4294901760, %v338_v46  ;;  %v8533_v46 = vand.u32 4294901760, %v6106_v13 }
  0x7b   :  { %4865 = vmatpush3.msra.mxu0 %v6074_v54  ;;  %4913 = vmatpush3.msra.mxu1 %v5985_v11  ;;  %v348_v54 = vsub.f32 %v6322_v49, %v347_v8 }
  0x7c   :  { %4782 = vmatmul.mubr.f32.gmra.mxu0 %v319_v42  ;;  %4832 = vmatmul.mubr.f32.gmra.mxu1 %v6209_v30  ;;  %v358_v42 = vsub.f32 %v6332_v19, %v357_v33 }
  0x7d   :  { %4866 = vmatprep.subr.mxu0 %v6086_v60  ;;  %4914 = vmatprep.subr.mxu1 %v5994_v16 }
  0x7e   :  { %4867 = vmatpush3.msra.mxu0 %v6086_v60  ;;  %4915 = vmatpush3.msra.mxu1 %v5994_v16  ;;  %v349_v60 = vand.u32 4294901760, %v348_v54  ;;  %v359_v29 = vand.u32 4294901760, %v358_v42  ;;  %v8536_v54 = vld [vmem:[#allocation20_spill] sm:$0xff]  ;;  %v8539_v42 = vld [vmem:[#allocation21_spill] sm:$0xff] }
  0x7f   :  { %4868 = vmatprep.subr.mxu0 %v6100_v7  ;;  %4916 = vmatprep.subr.mxu1 %v6016_v24 }
  0x80   :  { %4784 = vmatprep.mubr.f32.mxu0 %v329_v43  ;;  %4834 = vmatprep.mubr.f32.mxu1 %v6229_v41  ;;  %v8534_v43 = vand.u32 4294901760, %v6115_v32 }
  0x81   :  { %4869 = vmatpush3.msra.mxu0 %v6100_v7  ;;  %4917 = vmatpush3.msra.mxu1 %v6016_v24  ;;  %v8527_v7 = vld [vmem:[#allocation16_spill] sm:$0xff] }
  0x82   :  { %4785 = vmatmul.mubr.f32.gmra.mxu0 %v339_v52  ;;  %4835 = vmatmul.mubr.f32.gmra.mxu1 %v6237_v0  ;;  %v8535_v52 = vld [vmem:[#allocation19_spill] sm:$0xff] }
  0x83   :  { %4870 = vmatprep.subr.mxu0 %v6123_v37  ;;  %4918 = vmatprep.subr.mxu1 %v6022_v27 }
  0x84   :  { %4871 = vmatpush3.msra.mxu0 %v6123_v37  ;;  %4919 = vmatpush3.msra.mxu1 %v6022_v27  ;;  %v8528_v37 = vld [vmem:[#allocation29_spill] sm:$0xff] }
  0x85   :  { %4872 = vmatprep.subr.mxu0 %v6138_v51  ;;  %4920 = vmatprep.subr.mxu1 %v6041_v34 }
  0x86   :  { %4787 = vmatprep.mubr.f32.mxu0 %v349_v60  ;;  %4837 = vmatprep.mubr.f32.mxu1 %v6252_v40  ;;  %v8543_v60 = vld [vmem:[#allocation23_spill] sm:$0xff] }
  0x87   :  { %4873 = vmatpush3.msra.mxu0 %v6138_v51  ;;  %4921 = vmatpush3.msra.mxu1 %v6041_v34  ;;  %v8529_v51 = vld [vmem:[#allocation26_spill] sm:$0xff] }
  0x88   :  { %4788 = vmatmul.mubr.f32.gmra.mxu0 %v359_v29  ;;  %4838 = vmatmul.mubr.f32.gmra.mxu1 %v6259_v18 }
  0x89   :  { %4874 = vmatprep.subr.mxu0 %v6152_v59  ;;  %4922 = vmatprep.subr.mxu1 %v6059_v45 }
  0x8a   :  { %4875 = vmatpush3.msra.mxu0 %v6152_v59  ;;  %4923 = vmatpush3.msra.mxu1 %v6059_v45  ;;  %v8530_v59 = vld [vmem:[#allocation17_spill] sm:$0xff] }
  0x8b   :  { %4876 = vmatprep.subr.mxu0 %v6177_v38  ;;  %4924 = vmatprep.subr.mxu1 %v6065_v48 }
  0x8c   :  { %4840 = vmatprep.mubr.f32.mxu1 %v6278_v36  ;;  %4877 = vmatpush3.msra.mxu0 %v6177_v38  ;;  %v8532_v38 = vld [vmem:[#allocation18_spill] sm:$0xff] }
  0x8d   :  { %4878 = vmatprep.mubr.f32.mxu0 %v6106_v13  ;;  %4925 = vmatpush3.msra.mxu1 %v6065_v48  ;;  %v8537_v13 = vand.u32 4294901760, %v8528_v37 }
  0x8e   :  { %4841 = vmatmul.mubr.f32.gmra.mxu1 %v6287_v1  ;;  %4879 = vmatmul.mubr.f32.vlgmr.msra.gmra.mxu0 %v6115_v32  ;;  %v8538_v32 = vand.u32 4294901760, %v6160_v57 }
  0x8f   :  { %4926 = vmatprep.subr.mxu1 %v6091_v62  ;;  %4958 = vmatprep.subr.mxu0 %v6008_v21 }
  0x90   :  { %4927 = vmatpush3.msra.mxu1 %v6091_v62  ;;  %4959 = vmatpush3.msra.mxu0 %v6008_v21  ;;  %v8531_v21 = vld [vmem:[#allocation28_spill] sm:$0xff] }
  0x91   :  { %4928 = vmatprep.subr.mxu1 %v6103_v12  ;;  %4960 = vmatprep.subr.mxu0 %v8527_v7 }
  0x92   :  { %4843 = vmatprep.mubr.f32.mxu1 %v6306_v47  ;;  %4881 = vmatprep.mubr.f32.mxu0 %v8528_v37 }
  0x93   :  { %4929 = vmatpush3.msra.mxu1 %v6103_v12  ;;  %4961 = vmatpush3.msra.mxu0 %v8527_v7 }
  0x94   :  { %4844 = vmatmul.mubr.f32.gmra.mxu1 %v6315_v20  ;;  %4882 = vmatmul.mubr.f32.gmra.mxu0 %v6160_v57  ;;  %v8542_v57 = vand.u32 4294901760, %v6194_v28 }
  0x95   :  { %4930 = vmatprep.subr.mxu1 %v8529_v51  ;;  %4962 = vmatprep.subr.mxu0 %v8530_v59 }
  0x96   :  { %4931 = vmatpush3.msra.mxu1 %v8529_v51  ;;  %4963 = vmatpush3.msra.mxu0 %v8530_v59 }
  0x97   :  { %4932 = vmatprep.subr.mxu1 %v8531_v21  ;;  %4964 = vmatprep.subr.mxu0 %v8532_v38 }
  0x98   :  { %4884 = vmatprep.mubr.f32.mxu0 %v6186_v55  ;;  %4933 = vmatpush3.msra.mxu1 %v8531_v21 }
  0x99   :  { %4934 = vmatprep.mubr.f32.mxu1 %v8533_v46  ;;  %4965 = vmatpush3.msra.mxu0 %v8532_v38 }
  0x9a   :  { %4885 = vmatmul.mubr.f32.gmra.mxu0 %v6194_v28  ;;  %4935 = vmatmul.mubr.f32.vlgmr.msra.gmra.mxu1 %v8534_v43  ;;  %v8546_v28 = vand.u32 4294901760, %v6227_v53 }
  0x9b   :  { %4966 = vmatprep.subr.mxu0 %v8535_v52  ;;  %5014 = vmatprep.subr.mxu1 %v5975_v3 }
  0x9c   :  { %4967 = vmatpush3.msra.mxu0 %v8535_v52  ;;  %5015 = vmatpush3.msra.mxu1 %v5975_v3  ;;  %v8540_v3 = vld [vmem:[#allocation22_spill] sm:$0xff] }
  0x9d   :  { %4968 = vmatprep.subr.mxu0 %v8536_v54  ;;  %5016 = vmatprep.subr.mxu1 %v5977_v4  ;;  %v1448_v52 = vld [vmem:[#allocation8 + $0x30] sm:$0xff] }
  0x9e   :  { %4887 = vmatprep.mubr.f32.mxu0 %v6218_v39  ;;  %4937 = vmatprep.mubr.f32.mxu1 %v8537_v13 }
  0x9f   :  { %4969 = vmatpush3.msra.mxu0 %v8536_v54  ;;  %5017 = vmatpush3.msra.mxu1 %v5977_v4  ;;  %v8541_v4 = vand.u32 4294901760, %v6186_v55  ;;  %v8547_v55 = vld [vmem:[#allocation25_spill] sm:$0xff] }
  0xa0   :  { %4888 = vmatmul.mubr.f32.gmra.mxu0 %v6227_v53  ;;  %4938 = vmatmul.mubr.f32.gmra.mxu1 %v8538_v32  ;;  %v8551_v53 = vld [vmem:[#allocation30_spill] sm:$0xff] }
  0xa1   :  { %4970 = vmatprep.subr.mxu0 %v8539_v42  ;;  %5018 = vmatprep.subr.mxu1 %v5979_v5 }
  0xa2   :  { %4971 = vmatpush3.msra.mxu0 %v8539_v42  ;;  %5019 = vmatpush3.msra.mxu1 %v5979_v5  ;;  %v8544_v5 = vld [vmem:[#allocation24_spill] sm:$0xff] }
  0xa3   :  { %4972 = vmatprep.subr.mxu0 %v8540_v3  ;;  %5020 = vmatprep.subr.mxu1 %v5981_v9 }
  0xa4   :  { %4890 = vmatprep.mubr.f32.mxu0 %v6242_v63  ;;  %4940 = vmatprep.mubr.f32.mxu1 %v8541_v4  ;;  %v1447_v4 = vld [vmem:[#allocation8 + $0x28] sm:$0xff] }
  0xa5   :  { %4973 = vmatpush3.msra.mxu0 %v8540_v3  ;;  %5021 = vmatpush3.msra.mxu1 %v5981_v9  ;;  %v8545_v9 = vand.u32 4294901760, %v6218_v39  ;;  %v8550_v39 = vand.u32 4294901760, %v6250_v15  ;;  %v6634_v3 = vand.u32 4294901760, %v1448_v52 }
  0xa6   :  { %4891 = vmatmul.mubr.f32.gmra.mxu0 %v6250_v15  ;;  %4941 = vmatmul.mubr.f32.gmra.mxu1 %v8542_v57 }
  0xa7   :  { %4974 = vmatprep.subr.mxu0 %v8543_v60  ;;  %5022 = vmatprep.subr.mxu1 %v5983_v10  ;;  %8581 = vst [vmem:[#allocation42_spill] sm:$0xff] %v6634_v3 }
  0xa8   :  { %4975 = vmatpush3.msra.mxu0 %v8543_v60  ;;  %5023 = vmatpush3.msra.mxu1 %v5983_v10  ;;  %v8548_v10 = vld [vmem:[#allocation27_spill] sm:$0xff] }
  0xa9   :  { %4976 = vmatprep.subr.mxu0 %v8544_v5  ;;  %5024 = vmatprep.subr.mxu1 %v5985_v11 }
  0xaa   :  { %4893 = vmatprep.mubr.f32.mxu0 %v6266_v31  ;;  %4943 = vmatprep.mubr.f32.mxu1 %v8545_v9  ;;  %v6642_v9 = vand.u32 4294901760, %v1447_v4 }
  0xab   :  { %4977 = vmatpush3.msra.mxu0 %v8544_v5  ;;  %5025 = vmatpush3.msra.mxu1 %v5985_v11  ;;  %v8549_v11 = vand.u32 4294901760, %v6242_v63  ;;  %v8554_v63 = vld [vmem:[#allocation32_spill] sm:$0xff] }
  0xac   :  { %4894 = vmatmul.mubr.f32.gmra.mxu0 %v6276_v6  ;;  %4944 = vmatmul.mubr.f32.gmra.mxu1 %v8546_v28  ;;  %8583 = vst [vmem:[#allocation44_spill] sm:$0xff] %v6642_v9  ;;  %v6646_v28 = vsub.f32 %v1448_v52, %v6634_v3 }
  0xad   :  { %4978 = vmatprep.subr.mxu0 %v8547_v55  ;;  %5026 = vmatprep.subr.mxu1 %v5994_v16 }
  0xae   :  { %4979 = vmatpush3.msra.mxu0 %v8547_v55  ;;  %5027 = vmatpush3.msra.mxu1 %v5994_v16  ;;  %v8552_v16 = vld [vmem:[#allocation31_spill] sm:$0xff]  ;;  %8584 = vst [vmem:[#allocation45_spill] sm:$0xff] %v6646_v28  ;;  %v1446_v55 = vld [vmem:[#allocation8 + $0x20] sm:$0xff] }
  0xaf   :  { %4980 = vmatprep.subr.mxu0 %v8548_v10  ;;  %5028 = vmatprep.subr.mxu1 %v6016_v24 }
  0xb0   :  { %4896 = vmatprep.mubr.f32.mxu0 %v6294_v25  ;;  %4946 = vmatprep.mubr.f32.mxu1 %v8549_v11 }
  0xb1   :  { %4981 = vmatpush3.msra.mxu0 %v8548_v10  ;;  %5029 = vmatpush3.msra.mxu1 %v6016_v24  ;;  %v8553_v24 = vand.u32 4294901760, %v6266_v31 }
  0xb2   :  { %4897 = vmatmul.mubr.f32.gmra.mxu0 %v6304_v14  ;;  %4947 = vmatmul.mubr.f32.gmra.mxu1 %v8550_v39  ;;  %v6652_v39 = vsub.f32 %v1447_v4, %v6642_v9 }
  0xb3   :  { %4982 = vmatprep.subr.mxu0 %v8551_v53  ;;  %5030 = vmatprep.subr.mxu1 %v6022_v27 }
  0xb4   :  { %4983 = vmatpush3.msra.mxu0 %v8551_v53  ;;  %5031 = vmatpush3.msra.mxu1 %v6022_v27  ;;  %v1456_v27 = vld [vmem:[#allocation8 + $0x70] sm:$0xff]  ;;  %8585 = vst [vmem:[#allocation46_spill] sm:$0xff] %v6652_v39  ;;  %v6654_v53 = vand.u32 4294901760, %v1446_v55 }
  0xb5   :  { %4984 = vmatprep.subr.mxu0 %v8552_v16  ;;  %5032 = vmatprep.subr.mxu1 %v6041_v34 }
  0xb6   :  { %4899 = vmatprep.mubr.f32.mxu0 %v6322_v49  ;;  %4949 = vmatprep.mubr.f32.mxu1 %v8553_v24  ;;  %8586 = vst [vmem:[#allocation47_spill] sm:$0xff] %v6654_v53  ;;  %v1445_v24 = vld [vmem:[#allocation8 + $0x18] sm:$0xff] }
  0xb7   :  { %4985 = vmatpush3.msra.mxu0 %v8552_v16  ;;  %5033 = vmatpush3.msra.mxu1 %v6041_v34  ;;  %v6658_v16 = vand.u32 4294901760, %v6646_v28 }
  0xb8   :  { %4900 = vmatmul.mubr.f32.gmra.mxu0 %v6332_v19  ;;  %4950 = vmatmul.mubr.f32.gmra.mxu1 %v317_v50  ;;  %v1450_v19 = vld [vmem:[#allocation8 + $0x40] sm:$0xff] }
  0xb9   :  { %4986 = vmatprep.subr.mxu0 %v8554_v63  ;;  %5034 = vmatprep.subr.mxu1 %v6059_v45  ;;  %v6607_v7 = vand.u32 4294901760, %v1450_v19  ;;  %8587 = vst [vmem:[#allocation48_spill] sm:$0xff] %v6658_v16 }
  0xba   :  { %4987 = vmatpush3.msra.mxu0 %v8554_v63  ;;  %5035 = vmatpush3.msra.mxu1 %v6059_v45  ;;  %v6540_v45 = vand.u32 4294901760, %v1456_v27 }
  0xbb   :  { %4988 = vmatprep.subr.mxu0 %v6203_v23  ;;  %5036 = vmatprep.subr.mxu1 %v6065_v48  ;;  %8575 = vst [vmem:[#allocation36_spill] sm:$0xff] %v6607_v7  ;;  %v6619_v38 = vsub.f32 %v1450_v19, %v6607_v7  ;;  %v1443_v19 = vld [vmem:[#allocation8 + $0x8] sm:$0xff] }
  0xbc   :  { %4952 = vmatprep.mubr.f32.mxu1 %v327_v22  ;;  %4989 = vmatpush3.msra.mxu0 %v6203_v23  ;;  %v1457_v23 = vld [vmem:[#allocation8 + $0x78] sm:$0xff]  ;;  %8557 = vst [vmem:[#allocation26_spill] sm:$0xff] %v6540_v45 }
  0xbd   :  { %4990 = vmatprep.mubr.f32.mxu0 %v6079_v56  ;;  %5037 = vmatpush3.msra.mxu1 %v6065_v48  ;;  %v1455_v48 = vld [vmem:[#allocation8 + $0x68] sm:$0xff]  ;;  %8577 = vst [vmem:[#allocation38_spill] sm:$0xff] %v6619_v38  ;;  %v6628_v32 = vand.u32 4294901760, %v6619_v38 }
  0xbe   :  { %4953 = vmatmul.mubr.f32.gmra.mxu1 %v337_v17  ;;  %4991 = vmatmul.mubr.f32.vlgmr.msra.gmra.mxu0 %v6088_v61 }
  0xbf   :  { %5038 = vmatprep.subr.mxu1 %v6091_v62  ;;  %4955 = vmatprep.mubr.f32.mxu1 %v347_v8  ;;  %8579 = vst [vmem:[#allocation40_spill] sm:$0xff] %v6628_v32  ;;  %v1757_v60 = vsub.f32 %v6619_v38, %v6628_v32 }
  0xc0   :  { %5039 = vmatpush3.msra.mxu1 %v6091_v62  ;;  %4993 = vmatprep.mubr.f32.mxu0 %v6117_v35  ;;  %v1454_v62 = vld [vmem:[#allocation8 + $0x60] sm:$0xff] }
  0xc1   :  { %5040 = vmatprep.subr.mxu1 %v6103_v12  ;;  %v1758_v10 = vand.u32 4294901760, %v1757_v60 }
  0xc2   :  { %5041 = vmatpush3.msra.mxu1 %v6103_v12  ;;  %4994 = vmatmul.mubr.f32.gmra.mxu0 %v6131_v44 }
  0xc3   :  { %4956 = vmatmul.mubr.f32.gmra.mxu1 %v357_v33  ;;  %5042 = vmatprep.subr.mxu1 %v8529_v51 }
  0xc4   :  { %5043 = vmatpush3.msra.mxu1 %v8529_v51  ;;  %4996 = vmatprep.mubr.f32.mxu0 %v6154_v2  ;;  %v1449_v51 = vld [vmem:[#allocation8 + $0x38] sm:$0xff] }
  0xc5   :  { %5044 = vmatprep.subr.mxu1 %v8531_v21  ;;  %5046 = vmatprep.mubr.f32.mxu1 %v6079_v56  ;;  %v6621_v46 = vand.u32 4294901760, %v1449_v51 }
  0xc6   :  { %5045 = vmatpush3.msra.mxu1 %v8531_v21  ;;  %4997 = vmatmul.mubr.f32.gmra.mxu0 %v6169_v58 }
  0xc7   :  { %5047 = vmatmul.mubr.f32.vlgmr.msra.gmra.mxu1 %v6088_v61  ;;  %4999 = vmatprep.mubr.f32.mxu0 %v6196_v26  ;;  %v6550_v61 = vand.u32 4294901760, %v1455_v48  ;;  %8578 = vst [vmem:[#allocation39_spill] sm:$0xff] %v6621_v46  ;;  %v6631_v42 = vsub.f32 %v1449_v51, %v6621_v46 }
  0xc8   :  { %5049 = vmatprep.mubr.f32.mxu1 %v6117_v35  ;;  %v6562_v35 = vand.u32 4294901760, %v1454_v62 }
  0xc9   :  { %8560 = vst [vmem:[#allocation18_spill] sm:$0xff] %v6550_v61  ;;  %8580 = vst [vmem:[#allocation41_spill] sm:$0xff] %v6631_v42  ;;  %v6640_v5 = vand.u32 4294901760, %v6631_v42 }
  0xca   :  { %5000 = vmatmul.mubr.f32.gmra.mxu0 %v6209_v30  ;;  %8563 = vst [vmem:[#allocation21_spill] sm:$0xff] %v6562_v35  ;;  %v6572_v25 = vsub.f32 %v1454_v62, %v6562_v35  ;;  %v1771_v62 = vsub.f32 %v6646_v28, %v6658_v16 }
  0xcb   :  { %5050 = vmatmul.mubr.f32.gmra.mxu1 %v6131_v44  ;;  %5002 = vmatprep.mubr.f32.mxu0 %v6229_v41  ;;  %v1453_v44 = vld [vmem:[#allocation8 + $0x58] sm:$0xff]  ;;  %8582 = vst [vmem:[#allocation43_spill] sm:$0xff] %v6640_v5  ;;  %v1764_v11 = vsub.f32 %v6631_v42, %v6640_v5 }
  0xcc   :  { %5052 = vmatprep.mubr.f32.mxu1 %v6154_v2  ;;  %8565 = vst [vmem:[#allocation23_spill] sm:$0xff] %v6572_v25  ;;  %v6575_v15 = vand.u32 4294901760, %v1453_v44  ;;  %v6581_v6 = vand.u32 4294901760, %v6572_v25 }
  0xcd   :  { %v1765_v63 = vand.u32 4294901760, %v1764_v11 }
  0xce   :  { %5003 = vmatmul.mubr.f32.gmra.mxu0 %v6237_v0  ;;  %8566 = vst [vmem:[#allocation24_spill] sm:$0xff] %v6575_v15  ;;  %8567 = vst [vmem:[#allocation25_spill] sm:$0xff] %v6581_v6  ;;  %v6586_v49 = vsub.f32 %v1453_v44, %v6575_v15  ;;  %v1729_v14 = vsub.f32 %v6572_v25, %v6581_v6 }
  0xcf   :  { %5053 = vmatmul.mubr.f32.gmra.mxu1 %v6169_v58  ;;  %5005 = vmatprep.mubr.f32.mxu0 %v6252_v40  ;;  %v6548_v58 = vsub.f32 %v1456_v27, %v6540_v45  ;;  %v6665_v27 = vsub.f32 %v1446_v55, %v6654_v53 }
  0xd0   :  { %5055 = vmatprep.mubr.f32.mxu1 %v6196_v26  ;;  %v6535_v26 = vand.u32 4294901760, %v1457_v23  ;;  %8569 = vst [vmem:[#allocation30_spill] sm:$0xff] %v6586_v49  ;;  %v6598_v17 = vand.u32 4294901760, %v6586_v49  ;;  %v1730_v8 = vand.u32 4294901760, %v1729_v14 }
  0xd1   :  { %8559 = vst [vmem:[#allocation28_spill] sm:$0xff] %v6548_v58  ;;  %v6557_v12 = vand.u32 4294901760, %v6548_v58  ;;  %8589 = vst [vmem:[#allocation50_spill] sm:$0xff] %v6665_v27 }
  0xd2   :  { %5006 = vmatmul.mubr.f32.gmra.mxu0 %v6259_v18  ;;  %8555 = vst [vmem:[#allocation16_spill] sm:$0xff] %v6535_v26  ;;  %v6538_v34 = vsub.f32 %v1457_v23, %v6535_v26  ;;  %5070 = vmatprep.subr.mxu0 %v6535_v26  ;;  %8572 = vst [vmem:[#allocation33_spill] sm:$0xff] %v6598_v17  ;;  %v1736_v37 = vsub.f32 %v6586_v49, %v6598_v17  ;;  %v6662_v23 = vand.u32 4294901760, %v6652_v39 }
  0xd3   :  { %5056 = vmatmul.mubr.f32.gmra.mxu1 %v6209_v30  ;;  %5008 = vmatprep.mubr.f32.mxu0 %v6278_v36  ;;  %8561 = vst [vmem:[#allocation19_spill] sm:$0xff] %v6557_v12  ;;  %v6560_v30 = vsub.f32 %v1455_v48, %v6550_v61  ;;  %v6667_v48 = vand.u32 4294901760, %v1445_v24 }
  0xd4   :  { %5058 = vmatprep.mubr.f32.mxu1 %v6229_v41  ;;  %8556 = vst [vmem:[#allocation29_spill] sm:$0xff] %v6538_v34  ;;  %5071 = vmatpush3.msra.mxu0 %v6535_v26  ;;  %v6545_v56 = vand.u32 4294901760, %v6538_v34  ;;  %v1737_v43 = vand.u32 4294901760, %v1736_v37  ;;  %8588 = vst [vmem:[#allocation49_spill] sm:$0xff] %v6662_v23  ;;  %v1778_v44 = vsub.f32 %v6652_v39, %v6662_v23 }
  0xd5   :  { %5072 = vmatprep.subr.mxu0 %v6540_v45  ;;  %8562 = vst [vmem:[#allocation20_spill] sm:$0xff] %v6560_v30  ;;  %8590 = vst [vmem:[#allocation51_spill] sm:$0xff] %v6667_v48 }
  0xd6   :  { %5009 = vmatmul.mubr.f32.gmra.mxu0 %v6287_v1  ;;  %8558 = vst [vmem:[#allocation17_spill] sm:$0xff] %v6545_v56  ;;  %v1708_v2 = vsub.f32 %v6538_v34, %v6545_v56 }
  0xd7   :  { %5059 = vmatmul.mubr.f32.gmra.mxu1 %v6237_v0  ;;  %5011 = vmatprep.mubr.f32.mxu0 %v6306_v47  ;;  %v6569_v0 = vand.u32 4294901760, %v6560_v30 }
  0xd8   :  { %5061 = vmatprep.mubr.f32.mxu1 %v6252_v40  ;;  %5073 = vmatpush3.msra.mxu0 %v6540_v45  ;;  %v1709_v41 = vand.u32 4294901760, %v1708_v2  ;;  %v1452_v40 = vld [vmem:[#allocation8 + $0x50] sm:$0xff] }
  0xd9   :  { %5074 = vmatprep.subr.mxu0 %v6550_v61  ;;  %8564 = vst [vmem:[#allocation22_spill] sm:$0xff] %v6569_v0  ;;  %v1722_v31 = vsub.f32 %v6560_v30, %v6569_v0  ;;  %v1444_v2 = vld [vmem:[#allocation8 + $0x10] sm:$0xff] }
  0xda   :  { %5012 = vmatmul.mubr.f32.gmra.mxu0 %v6315_v20  ;;  %5126 = vmatprep.subr.mxu1 %v1709_v41 }
  0xdb   :  { %5062 = vmatmul.mubr.f32.gmra.mxu1 %v6259_v18  ;;  %5075 = vmatpush3.msra.mxu0 %v6550_v61  ;;  %v1723_v50 = vand.u32 4294901760, %v1722_v31  ;;  %v1779_v31 = vand.u32 4294901760, %v1778_v44 }
  0xdc   :  { %5064 = vmatprep.mubr.f32.mxu1 %v6278_v36  ;;  %5076 = vmatprep.subr.mxu0 %v6562_v35  ;;  %v6583_v36 = vand.u32 4294901760, %v1452_v40 }
  0xdd   :  { %5077 = vmatpush3.msra.mxu0 %v6562_v35  ;;  %5127 = vmatpush3.msra.mxu1 %v1709_v41  ;;  %v6676_v41 = vand.u32 4294901760, %v6665_v27 }
  0xde   :  { %8568 = vst [vmem:[#allocation27_spill] sm:$0xff] %v6583_v36  ;;  %5078 = vmatprep.subr.mxu0 %v6575_v15  ;;  %v6592_v22 = vsub.f32 %v1452_v40, %v6583_v36  ;;  %v6681_v40 = vand.u32 4294901760, %v1444_v2 }
  0xdf   :  { %5065 = vmatmul.mubr.f32.gmra.mxu1 %v6287_v1  ;;  %v1451_v1 = vld [vmem:[#allocation8 + $0x48] sm:$0xff]  ;;  %5079 = vmatpush3.msra.mxu0 %v6575_v15  ;;  %8591 = vst [vmem:[#allocation52_spill] sm:$0xff] %v6676_v41 }
  0xe0   :  { %5067 = vmatprep.mubr.f32.mxu1 %v6306_v47  ;;  %v1715_v47 = vsub.f32 %v6548_v58, %v6557_v12  ;;  %8570 = vst [vmem:[#allocation31_spill] sm:$0xff] %v6592_v22  ;;  %5080 = vmatprep.subr.mxu0 %v6583_v36  ;;  %v6602_v33 = vand.u32 4294901760, %v6592_v22  ;;  %8593 = vst [vmem:[#allocation54_spill] sm:$0xff] %v6681_v40  ;;  %v6691_v14 = vsub.f32 %v1444_v2, %v6681_v40 }
  0xe1   :  { %5081 = vmatpush3.msra.mxu0 %v6583_v36 }
  0xe2   :  { %v1716_v18 = vand.u32 4294901760, %v1715_v47  ;;  %8573 = vst [vmem:[#allocation34_spill] sm:$0xff] %v6602_v33  ;;  %v1743_v59 = vsub.f32 %v6592_v22, %v6602_v33  ;;  %v6679_v47 = vsub.f32 %v1445_v24, %v6667_v48  ;;  %8595 = vst [vmem:[#allocation56_spill] sm:$0xff] %v6691_v14 }
  0xe3   :  { %5068 = vmatmul.mubr.f32.gmra.mxu1 %v6315_v20  ;;  %v6594_v20 = vand.u32 4294901760, %v1451_v1 }
  0xe4   :  { %5128 = vmatprep.subr.mxu1 %v1716_v18  ;;  %v1744_v54 = vand.u32 4294901760, %v1743_v59  ;;  %8592 = vst [vmem:[#allocation53_spill] sm:$0xff] %v6679_v47  ;;  %v6700_v59 = vand.u32 4294901760, %v6691_v14 }
  0xe5   :  { %8571 = vst [vmem:[#allocation32_spill] sm:$0xff] %v6594_v20  ;;  %5129 = vmatpush3.msra.mxu1 %v1716_v18  ;;  %v6605_v29 = vsub.f32 %v1451_v1, %v6594_v20  ;;  %5082 = vmatprep.subr.mxu0 %v6594_v20  ;;  %v1772_v18 = vand.u32 4294901760, %v1771_v62  ;;  %v1785_v1 = vsub.f32 %v6665_v27, %v6676_v41 }
  0xe6   :  { %5130 = vmatprep.subr.mxu1 %v1723_v50  ;;  %5083 = vmatpush3.msra.mxu0 %v6594_v20  ;;  %8597 = vst [vmem:[#allocation58_spill] sm:$0xff] %v6700_v59  ;;  %v1799_v4 = vsub.f32 %v6691_v14, %v6700_v59  ;;  %v6761_v59 = vld [vmem:[#allocation5] ss:$0 sm:$0xff] }
  0xe7   :  { %8574 = vst [vmem:[#allocation35_spill] sm:$0xff] %v6605_v29  ;;  %5131 = vmatpush3.msra.mxu1 %v1723_v50  ;;  %v6616_v21 = vand.u32 4294901760, %v6605_v29  ;;  %5084 = vmatprep.subr.mxu0 %v6607_v7  ;;  %v6688_v50 = vand.u32 4294901760, %v6679_v47  ;;  %v1786_v37 = vand.u32 4294901760, %v1785_v1 }
  0xe8   :  { %5132 = vmatprep.subr.mxu1 %v1730_v8  ;;  %5085 = vmatpush3.msra.mxu0 %v6607_v7  ;;  %v1800_v55 = vand.u32 4294901760, %v1799_v4 }
  0xe9   :  { %8576 = vst [vmem:[#allocation37_spill] sm:$0xff] %v6616_v21  ;;  %5133 = vmatpush3.msra.mxu1 %v1730_v8  ;;  %v1750_v13 = vsub.f32 %v6605_v29, %v6616_v21  ;;  %5086 = vmatprep.subr.mxu0 %v6621_v46  ;;  %8594 = vst [vmem:[#allocation55_spill] sm:$0xff] %v6688_v50  ;;  %v6694_v8 = vand.u32 4294901760, %v1443_v19  ;;  %v1792_v51 = vsub.f32 %v6679_v47, %v6688_v50 }
  0xea   :  { %5134 = vmatprep.subr.mxu1 %v1737_v43  ;;  %5087 = vmatpush3.msra.mxu0 %v6621_v46 }
  0xeb   :  { %5135 = vmatpush3.msra.mxu1 %v1737_v43  ;;  %v1751_v57 = vand.u32 4294901760, %v1750_v13  ;;  %5088 = vmatprep.subr.mxu0 %v6634_v3  ;;  %8596 = vst [vmem:[#allocation57_spill] sm:$0xff] %v6694_v8  ;;  %v1442_v43 = vld [vmem:[#allocation8] sm:$0xff]  ;;  %v6704_v52 = vsub.f32 %v1443_v19, %v6694_v8  ;;  %v1793_v13 = vand.u32 4294901760, %v1792_v51 }
  0xec   :  { %5136 = vmatprep.subr.mxu1 %v1744_v54  ;;  %5089 = vmatpush3.msra.mxu0 %v6634_v3 }
  0xed   :  { %5137 = vmatpush3.msra.mxu1 %v1744_v54  ;;  %5090 = vmatprep.subr.mxu0 %v6642_v9  ;;  %8598 = vst [vmem:[#allocation59_spill] sm:$0xff] %v6704_v52  ;;  %v6706_v54 = vand.u32 4294901760, %v1442_v43 }
  0xee   :  { %5138 = vmatprep.subr.mxu1 %v1751_v57  ;;  %5091 = vmatpush3.msra.mxu0 %v6642_v9 }
  0xef   :  { %5139 = vmatpush3.msra.mxu1 %v1751_v57  ;;  %5092 = vmatprep.subr.mxu0 %v6654_v53  ;;  %8599 = vst [vmem:[#allocation60_spill] sm:$0xff] %v6706_v54  ;;  %v6713_v57 = vand.u32 4294901760, %v6704_v52  ;;  %v6716_v60 = vsub.f32 %v1442_v43, %v6706_v54 }
  0xf0   :  { %5140 = vmatprep.subr.mxu1 %v1758_v10  ;;  %5093 = vmatpush3.msra.mxu0 %v6654_v53 }
  0xf1   :  { %5141 = vmatpush3.msra.mxu1 %v1758_v10  ;;  %5094 = vmatprep.subr.mxu0 %v6667_v48  ;;  %8600 = vst [vmem:[#allocation61_spill] sm:$0xff] %v6713_v57  ;;  %8601 = vst [vmem:[#allocation62_spill] sm:$0xff] %v6716_v60  ;;  %v1806_v10 = vsub.f32 %v6704_v52, %v6713_v57  ;;  %v6723_v11 = vand.u32 4294901760, %v6716_v60 }
  0xf2   :  { %5142 = vmatprep.subr.mxu1 %v1765_v63  ;;  %5095 = vmatpush3.msra.mxu0 %v6667_v48 }
  0xf3   :  { %5143 = vmatpush3.msra.mxu1 %v1765_v63  ;;  %5096 = vmatprep.subr.mxu0 %v6681_v40  ;;  %8602 = vst [vmem:[#allocation63_spill] sm:$0xff] %v6723_v11  ;;  %v1807_v24 = vand.u32 4294901760, %v1806_v10  ;;  %v1813_v63 = vsub.f32 %v6716_v60, %v6723_v11 }
  0xf4   :  { %5144 = vmatprep.subr.mxu1 %v1772_v18  ;;  %5097 = vmatpush3.msra.mxu0 %v6681_v40 }
  0xf5   :  { %5145 = vmatpush3.msra.mxu1 %v1772_v18  ;;  %5098 = vmatprep.subr.mxu0 %v6694_v8  ;;  %v1814_v62 = vand.u32 4294901760, %v1813_v63 }
  0xf6   :  { %5146 = vmatprep.subr.mxu1 %v1779_v31  ;;  %5099 = vmatpush3.msra.mxu0 %v6694_v8 }
  0xf7   :  { %5147 = vmatpush3.msra.mxu1 %v1779_v31  ;;  %5100 = vmatprep.subr.mxu0 %v6706_v54 }
  0xf8   :  { %5148 = vmatprep.subr.mxu1 %v1786_v37  ;;  %5101 = vmatpush3.msra.mxu0 %v6706_v54 }
  0xf9   :  { %5149 = vmatpush3.msra.mxu1 %v1786_v37  ;;  %5182 = vmatprep.subr.mxu0 %v6538_v34 }
  0xfa   :  { %5150 = vmatprep.subr.mxu1 %v1793_v13 }
  0xfb   :  { %5151 = vmatpush3.msra.mxu1 %v1793_v13 }
  0xfc   :  { %5152 = vmatprep.subr.mxu1 %v1800_v55 }
  0xfd   :  { %5153 = vmatpush3.msra.mxu1 %v1800_v55 }
  0xfe   :  { %5154 = vmatprep.subr.mxu1 %v1807_v24 }
  0xff   :  { %5155 = vmatpush3.msra.mxu1 %v1807_v24 }
 0x100   :  { %5156 = vmatprep.subr.mxu1 %v1814_v62 }
 0x101   :  { %5157 = vmatpush3.msra.mxu1 %v1814_v62 }
 0x102   :  { %5238 = vmatprep.subr.mxu1 %v6535_v26 }
 0x11f   :  { %v6729_v2 = vpop.f32.mrf.mxu0 }
 0x120   :  { %v222_v58 = vadd.f32 %v6729_v2, %v6761_v59 }
 0x121   :  { %v6731_v44 = vpop.f32.mrf.mxu0 }
 0x122   :  { %v212_v35 = vadd.f32 %v6761_v59, %v6731_v44 }
 0x125   :  { %v6733_v18 = vpop.f32.mrf.mxu0 }
 0x126   :  { %v242_v34 = vadd.f32 %v6733_v18, %v6761_v59 }
 0x127   :  { %v6735_v31 = vpop.f32.mrf.mxu0 }
 0x128   :  { %v232_v26 = vadd.f32 %v6761_v59, %v6735_v31 }
 0x12a   :  { %v6737_v1 = vpop.f32.mrf.mxu0  ;;  %v6739_v19 = vpop.f32.mrf.mxu1 }
 0x12b   :  { %v262_v15 = vadd.f32 %v6737_v1, %v6761_v59  ;;  %v519_v2 = vadd.f32 %v6739_v19, %v222_v58 }
 0x12c   :  { %v6741_v37 = vpop.f32.mrf.mxu0  ;;  %v6743_v51 = vpop.f32.mrf.mxu1 }
 0x12d   :  { %v252_v18 = vadd.f32 %v6761_v59, %v6741_v37 }
 0x130   :  { %v6745_v43 = vpop.f32.mrf.mxu0  ;;  %v6747_v13 = vpop.f32.mrf.mxu1 }
 0x131   :  { %v531_v1 = vadd.f32 %v6747_v13, %v242_v34 }
 0x132   :  { %v6749_v4 = vpop.f32.mrf.mxu0  ;;  %v6751_v55 = vpop.f32.mrf.mxu1 }
 0x133   :  { %v525_v31 = vadd.f32 %v6751_v55, %v232_v26 }
 0x136   :  { %v4780_v10 = vpop.f32.mrf.mxu0  ;;  %v6753_v24 = vpop.f32.mrf.mxu1 }
 0x137   :  { %v302_v23 = vadd.f32 %v4780_v10, %v6761_v59 }
 0x138   :  { %v6755_v63 = vpop.f32.mrf.mxu0  ;;  %v6757_v62 = vpop.f32.mrf.mxu1 }
 0x139   :  { %v292_v58 = vadd.f32 %v6761_v59, %v6755_v63  ;;  %v537_v19 = vadd.f32 %v6757_v62, %v252_v18 }
 0x13c   :  { %v4783_v11 = vpop.f32.mrf.mxu0  ;;  %v6759_v57 = vpop.f32.mrf.mxu1 }
 0x13d   :  { %v322_v17 = vadd.f32 %v4783_v11, %v6761_v59 }
 0x13e   :  { %v6763_v50 = vpop.f32.mrf.mxu0  ;;  %v6765_v41 = vpop.f32.mrf.mxu1 }
 0x142   :  { %v4786_v16 = vpop.f32.mrf.mxu0  ;;  %v4836_v5 = vpop.f32.mrf.mxu1 }
 0x143   :  { %v6768_v32 = vadd.f32 %v4836_v5, %v302_v23  ;;  %v342_v10 = vadd.f32 %v4786_v16, %v6761_v59 }
 0x144   :  { %v6770_v21 = vpop.f32.mrf.mxu0  ;;  %v6772_v33 = vpop.f32.mrf.mxu1 }
 0x145   :  { %v332_v34 = vadd.f32 %v6761_v59, %v6770_v21  ;;  %v561_v26 = vadd.f32 %v6772_v33, %v292_v58 }
 0x148   :  { %v4789_v6 = vpop.f32.mrf.mxu0  ;;  %v4839_v0 = vpop.f32.mrf.mxu1 }
 0x149   :  { %v6775_v12 = vadd.f32 %v4839_v0, %v322_v17  ;;  %v362_v54 = vadd.f32 %v4789_v6, %v6761_v59 }
 0x14a   :  { %v6777_v56 = vpop.f32.mrf.mxu0  ;;  %v6779_v60 = vpop.f32.mrf.mxu1 }
 0x14e   :  { %v4842_v52 = vpop.f32.mrf.mxu1  ;;  %v4880_v14 = vpop.f32.mrf.mxu0 }
 0x14f   :  { %v6782_v5 = vadd.f32 %v4842_v52, %v342_v10  ;;  %v714_v37 = vadd.f32 %v4880_v14, %v519_v2 }
 0x150   :  { %v584_v23 = vpop.f32.mrf.mxu1  ;;  %v706_v47 = vpop.f32.mrf.mxu0 }
 0x154   :  { %v4845_v27 = vpop.f32.mrf.mxu1  ;;  %v4883_v11 = vpop.f32.mrf.mxu0 }
 0x155   :  { %v6785_v8 = vadd.f32 %v4845_v27, %v362_v54  ;;  %v728_v18 = vadd.f32 %v4883_v11, %v531_v1 }
 0x156   :  { %v596_v0 = vpop.f32.mrf.mxu1  ;;  %v720_v17 = vpop.f32.mrf.mxu0 }
 0x157   :  { %8603 = vst [vmem:[#allocation64_spill] sm:$0xff] %v6785_v8  ;;  %v721_v14 = vadd.f32 %v720_v17, %v525_v31 }
 0x15a   :  { %v4886_v39 = vpop.f32.mrf.mxu0  ;;  %v4936_v40 = vpop.f32.mrf.mxu1 }
 0x15c   :  { %v734_v28 = vpop.f32.mrf.mxu0  ;;  %v900_v48 = vpop.f32.mrf.mxu1 }
 0x160   :  { %v4889_v42 = vpop.f32.mrf.mxu0  ;;  %v4939_v16 = vpop.f32.mrf.mxu1 }
 0x161   :  { %v925_v58 = vadd.f32 %v4939_v16, %v728_v18 }
 0x162   :  { %v748_v53 = vpop.f32.mrf.mxu0  ;;  %v916_v38 = vpop.f32.mrf.mxu1 }
 0x166   :  { %v4892_v52 = vpop.f32.mrf.mxu0  ;;  %v6787_v10 = vpop.f32.mrf.mxu1 }
 0x168   :  { %v6789_v9 = vpop.f32.mrf.mxu0  ;;  %v6791_v6 = vpop.f32.mrf.mxu1 }
 0x16c   :  { %v6793_v29 = vpop.f32.mrf.mxu0  ;;  %v6795_v27 = vpop.f32.mrf.mxu1 }
 0x16e   :  { %v6797_v54 = vpop.f32.mrf.mxu0  ;;  %v6799_v3 = vpop.f32.mrf.mxu1 }
 0x172   :  { %v6801_v22 = vpop.f32.mrf.mxu0  ;;  %v6803_v46 = vpop.f32.mrf.mxu1 }
 0x174   :  { %v6805_v49 = vpop.f32.mrf.mxu0  ;;  %v6807_v7 = vpop.f32.mrf.mxu1 }
 0x178   :  { %v6809_v25 = vpop.f32.mrf.mxu0  ;;  %v6811_v20 = vpop.f32.mrf.mxu1 }
 0x179   :  { %8604 = vst [vmem:[#allocation65_spill] sm:$0xff] %v6809_v25  ;;  %8605 = vst [vmem:[#allocation66_spill] sm:$0xff] %v6811_v20  ;;  %v543_v25 = vadd.f32 %v6753_v24, %v262_v15  ;;  %v352_v15 = vadd.f32 %v6761_v59, %v6777_v56  ;;  %v585_v24 = vadd.f32 %v584_v23, %v332_v34 }
 0x17a   :  { %v6813_v30 = vpop.f32.mrf.mxu0  ;;  %v6815_v36 = vpop.f32.mrf.mxu1  ;;  %v917_v56 = vadd.f32 %v916_v38, %v721_v14 }
 0x17b   :  { %8606 = vst [vmem:[#allocation67_spill] sm:$0xff] %v6813_v30  ;;  %8607 = vst [vmem:[#allocation68_spill] sm:$0xff] %v6815_v36  ;;  %v282_v36 = vadd.f32 %v6745_v43, %v6761_v59  ;;  %v513_v30 = vadd.f32 %v6743_v51, %v212_v35  ;;  %v312_v35 = vadd.f32 %v6761_v59, %v6763_v50 }
 0x17c   :  { %v909_v50 = vadd.f32 %v4936_v40, %v714_v37  ;;  %v597_v21 = vadd.f32 %v596_v0, %v352_v15  ;;  %v742_v2 = vadd.f32 %v4886_v39, %v543_v25  ;;  %v791_v16 = vadd.f32 %v6805_v49, %v585_v24 }
 0x17d   :  { %v555_v43 = vadd.f32 %v6759_v57, %v282_v36  ;;  %v573_v55 = vadd.f32 %v6779_v60, %v312_v35  ;;  %v707_v63 = vadd.f32 %v706_v47, %v513_v30  ;;  %v735_v36 = vadd.f32 %v734_v28, %v537_v19 }
 0x17e   :  { %v6825_v61 = vpop.f32.mrf.mxu1  ;;  %v4992_v45 = vpop.f32.mrf.mxu0  ;;  %v941_v30 = vadd.f32 %v6787_v10, %v742_v2  ;;  %v763_v47 = vadd.f32 %v6789_v9, %v561_v26  ;;  %v798_v9 = vadd.f32 %v6801_v22, %v6782_v5 }
 0x17f   :  { %8608 = vst [vmem:[#allocation69_spill] sm:$0xff] %v6825_v61  ;;  %v272_v61 = vadd.f32 %v6761_v59, %v6749_v4  ;;  %v901_v57 = vadd.f32 %v900_v48, %v707_v63  ;;  %v770_v59 = vadd.f32 %v4892_v52, %v6768_v32  ;;  %v933_v25 = vadd.f32 %v6791_v6, %v735_v36 }
 0x180   :  { %v6836_v20 = vpop.f32.mrf.mxu1  ;;  %v1139_v44 = vpop.f32.mrf.mxu0  ;;  %v777_v28 = vadd.f32 %v6797_v54, %v573_v55  ;;  %v8611_v54 = vld [vmem:[#allocation65_spill] sm:$0xff] }
 0x181   :  { %8609 = vst [vmem:[#allocation70_spill] sm:$0xff] %v6836_v20  ;;  %v549_v13 = vadd.f32 %v6765_v41, %v272_v61  ;;  %v756_v61 = vadd.f32 %v4889_v42, %v555_v43  ;;  %v1146_v41 = vadd.f32 %v4992_v45, %v909_v50  ;;  %v1140_v40 = vadd.f32 %v1139_v44, %v901_v57  ;;  %v8612_v44 = vld [vmem:[#allocation66_spill] sm:$0xff] }
 0x182   :  { %v4995_v51 = vpop.f32.mrf.mxu0  ;;  %v784_v42 = vadd.f32 %v6793_v29, %v6775_v12  ;;  %v973_v17 = vadd.f32 %v6803_v46, %v770_v59  ;;  %v965_v12 = vadd.f32 %v6807_v7, %v763_v47  ;;  %v8613_v19 = vld [vmem:[#allocation67_spill] sm:$0xff]  ;;  %v8614_v5 = vld [vmem:[#allocation68_spill] sm:$0xff] }
 0x183   :  { %v4957_v4 = vpop.f32.mrf.mxu1  ;;  %v749_v8 = vadd.f32 %v748_v53, %v549_v13  ;;  %v957_v45 = vadd.f32 %v6795_v27, %v756_v61  ;;  %v1158_v39 = vadd.f32 %v4995_v51, %v925_v58  ;;  %v805_v22 = vadd.f32 %v8613_v19, %v597_v21 }
 0x184   :  { %v1151_v62 = vpop.f32.mrf.mxu0  ;;  %v989_v31 = vadd.f32 %v8612_v44, %v784_v42  ;;  %v981_v46 = vadd.f32 %v8614_v5, %v777_v28 }
 0x185   :  { %v1012_v20 = vpop.f32.mrf.mxu1  ;;  %v949_v32 = vadd.f32 %v6799_v3, %v749_v8  ;;  %v1152_v52 = vadd.f32 %v1151_v62, %v917_v56  ;;  %v8610_v8 = vld [vmem:[#allocation64_spill] sm:$0xff] }
 0x186   :  { %v4998_v33 = vpop.f32.mrf.mxu0  ;;  %v812_v1 = vadd.f32 %v8611_v54, %v8610_v8  ;;  %v8615_v43 = vld [vmem:[#allocation69_spill] sm:$0xff]  ;;  %v6896_v2 = vadd.f32 %v1012_v20, %v805_v22  ;;  %v8621_v8 = vld [vmem:[#allocation18_spill] sm:$0xff] }
 0x187   :  { %v5048_v60 = vpop.f32.mrf.mxu1  ;;  %v1005_v13 = vadd.f32 %v8615_v43, %v798_v9  ;;  %v1170_v24 = vadd.f32 %v4998_v33, %v941_v30 }
 0x188   :  { %v1323_v23 = vadd.f32 %v5048_v60, %v1146_v41  ;;  %v1163_v11 = vpop.f32.mrf.mxu0  ;;  %v8616_v26 = vld [vmem:[#allocation70_spill] sm:$0xff]  ;;  %v6885_v55 = vadd.f32 %v4957_v4, %v812_v1 }
 0x189   :  { %v1316_v38 = vpop.f32.mrf.mxu1  ;;  %v6883_v15 = vadd.f32 %v8616_v26, %v791_v16  ;;  %v1164_v36 = vadd.f32 %v1163_v11, %v933_v25 }
 0x18a   :  { %v1411_v53 = vmul.f32 0.01, %v1323_v23  ;;  %v1317_v48 = vadd.f32 %v1316_v38, %v1140_v40  ;;  %v5001_v0 = vpop.f32.mrf.mxu0 }
 0x18b   :  { %v5051_v29 = vpop.f32.mrf.mxu1  ;;  %v1182_v57 = vadd.f32 %v5001_v0, %v957_v45  ;;  %v8617_v45 = vld [vmem:[#allocation16_spill] sm:$0xff] }
 0x18c   :  { %v6869_v10 = vmax.f32 %v1323_v23, %v1411_v53  ;;  %v1410_v6 = vmul.f32 0.01, %v1317_v48  ;;  %v1335_v27 = vadd.f32 %v5051_v29, %v1158_v39  ;;  %v1175_v3 = vpop.f32.mrf.mxu0 }
 0x18d   :  { %v1328_v35 = vpop.f32.mrf.mxu1  ;;  %v1176_v20 = vadd.f32 %v1175_v3, %v949_v32 }
 0x18e   :  { %v6877_v49 = vand.u32 4294901760, %v6869_v10  ;;  %v6879_v7 = vmax.f32 %v1317_v48, %v1410_v6  ;;  %v1413_v34 = vmul.f32 0.01, %v1335_v27  ;;  %v1329_v37 = vadd.f32 %v1328_v35, %v1152_v52  ;;  %v5004_v51 = vpop.f32.mrf.mxu0  ;;  %v8619_v48 = vld [vmem:[#allocation26_spill] sm:$0xff] }
 0x18f   :  { %v5054_v63 = vpop.f32.mrf.mxu1  ;;  %v1194_v60 = vadd.f32 %v5004_v51, %v973_v17 }
 0x190   :  { %v6889_v50 = vsub.f32 %v6869_v10, %v6877_v49  ;;  %v6892_v62 = vand.u32 4294901760, %v6879_v7  ;;  %v6894_v18 = vmax.f32 %v1335_v27, %v1413_v34  ;;  %v1412_v21 = vmul.f32 0.01, %v1329_v37  ;;  %v1187_v14 = vpop.f32.mrf.mxu0  ;;  %v8623_v34 = vld [vmem:[#allocation21_spill] sm:$0xff] }
 0x191   :  { %v1347_v61 = vadd.f32 %v5054_v63, %v1170_v24  ;;  %v1340_v4 = vpop.f32.mrf.mxu1  ;;  %v1188_v11 = vadd.f32 %v1187_v14, %v965_v12 }
 0x192   :  { %v8385_v41 = vand.u32 4294901760, %v6889_v50  ;;  %v6901_v33 = vsub.f32 %v6879_v7, %v6892_v62  ;;  %v6904_v58 = vand.u32 4294901760, %v6894_v18  ;;  %v6906_v56 = vmax.f32 %v1329_v37, %v1412_v21  ;;  %5158 = vmatprep.mubr.f32.mxu1 %v6892_v62  ;;  %v5007_v59 = vpop.f32.mrf.mxu0 }
 0x193   :  { %v1415_v30 = vmul.f32 0.01, %v1347_v61  ;;  %v1341_v47 = vadd.f32 %v1340_v4, %v1164_v36  ;;  %v5057_v40 = vpop.f32.mrf.mxu1  ;;  %5159 = vmatmul.mubr.f32.vlgmr.msra.gmra.mxu1 %v6877_v49  ;;  %v1206_v25 = vadd.f32 %v5007_v59, %v989_v31 }
 0x194   :  { %v6911_v23 = vand.u32 4294901760, %v6906_v56  ;;  %v1359_v42 = vadd.f32 %v5057_v40, %v1182_v57  ;;  %5239 = vmatpush3.msra.mxu1 %v8617_v45  ;;  %v1199_v28 = vpop.f32.mrf.mxu0  ;;  %v1557_v38 = vsub.f32 %v6889_v50, %v8385_v41  ;;  %v8387_v0 = vand.u32 4294901760, %v6901_v33  ;;  %v8626_v40 = vld [vmem:[#allocation24_spill] sm:$0xff] }
 0x195   :  { %v6917_v32 = vmax.f32 %v1347_v61, %v1415_v30  ;;  %v1414_v39 = vmul.f32 0.01, %v1341_v47  ;;  %v1352_v53 = vpop.f32.mrf.mxu1  ;;  %5240 = vmatprep.subr.mxu1 %v8619_v48  ;;  %v6923_v9 = vsub.f32 %v6894_v18, %v6904_v58  ;;  %v1200_v27 = vadd.f32 %v1199_v28, %v981_v46 }
 0x196   :  { %v6927_v17 = vsub.f32 %v6906_v56, %v6911_v23  ;;  %v1417_v16 = vmul.f32 0.01, %v1359_v42  ;;  %v1353_v12 = vadd.f32 %v1352_v53, %v1176_v20  ;;  %5161 = vmatprep.mubr.f32.mxu1 %v6911_v23  ;;  %5241 = vmatpush3.msra.mxu1 %v8619_v48  ;;  %v5010_v29 = vpop.f32.mrf.mxu0  ;;  %v1547_v54 = vsub.f32 %v6901_v33, %v8387_v0  ;;  %v8647_v0 = vld [vmem:[#allocation38_spill] sm:$0xff] }
 0x197   :  { %8618 = vst [vmem:[#allocation64_spill] sm:$0xff] %v6917_v32  ;;  %v6932_v52 = vand.u32 4294901760, %v6917_v32  ;;  %v6934_v6 = vmax.f32 %v1341_v47, %v1414_v39  ;;  %v5060_v3 = vpop.f32.mrf.mxu1  ;;  %5162 = vmatmul.mubr.f32.gmra.mxu1 %v6904_v58  ;;  %5242 = vmatprep.subr.mxu1 %v8621_v8  ;;  %v1218_v5 = vadd.f32 %v5010_v29, %v1005_v13  ;;  %v1558_v51 = vand.u32 4294901760, %v1557_v38 }
 0x198   :  { %v6941_v1 = vmax.f32 %v1359_v42, %v1417_v16  ;;  %v1416_v44 = vmul.f32 0.01, %v1353_v12  ;;  %v1371_v31 = vadd.f32 %v5060_v3, %v1194_v60  ;;  %5243 = vmatpush3.msra.mxu1 %v8621_v8  ;;  %v8384_v19 = vand.u32 4294901760, %v6927_v17  ;;  %v1211_v46 = vpop.f32.mrf.mxu0 }
 0x199   :  { %8620 = vst [vmem:[#allocation65_spill] sm:$0xff] %v6934_v6  ;;  %v6946_v22 = vand.u32 4294901760, %v6934_v6  ;;  %v1364_v35 = vpop.f32.mrf.mxu1  ;;  %5244 = vmatprep.subr.mxu1 %v8623_v34  ;;  %v1548_v37 = vand.u32 4294901760, %v1547_v54  ;;  %v6957_v21 = vsub.f32 %v6917_v32, %v6932_v52  ;;  %v8381_v57 = vand.u32 4294901760, %v6923_v9 }
 0x19a   :  { %8622 = vst [vmem:[#allocation66_spill] sm:$0xff] %v6941_v1  ;;  %v6950_v43 = vand.u32 4294901760, %v6941_v1  ;;  %v6952_v26 = vmax.f32 %v1353_v12, %v1416_v44  ;;  %v1419_v24 = vmul.f32 0.01, %v1371_v31  ;;  %v1365_v63 = vadd.f32 %v1364_v35, %v1188_v11  ;;  %5245 = vmatpush3.msra.mxu1 %v8623_v34  ;;  %v5013_v30 = vpop.f32.mrf.mxu0  ;;  %v8627_v11 = vld [vmem:[#allocation29_spill] sm:$0xff]  ;;  %v8630_v12 = vld [vmem:[#allocation27_spill] sm:$0xff] }
 0x19b   :  { %v6961_v13 = vsub.f32 %v6934_v6, %v6946_v22  ;;  %5102 = vmatprep.mubr.f32.mxu0 %v1548_v37  ;;  %5164 = vmatprep.mubr.f32.mxu1 %v6946_v22  ;;  %v5063_v14 = vpop.f32.mrf.mxu1  ;;  %v1567_v36 = vsub.f32 %v6927_v17, %v8384_v19  ;;  %v1212_v59 = vadd.f32 %v1211_v46, %v6883_v15  ;;  %v8379_v44 = vand.u32 4294901760, %v6957_v21 }
 0x19c   :  { %8624 = vst [vmem:[#allocation67_spill] sm:$0xff] %v6952_v26  ;;  %v6969_v61 = vand.u32 4294901760, %v6952_v26  ;;  %v6971_v4 = vmax.f32 %v1371_v31, %v1419_v24  ;;  %v1418_v20 = vmul.f32 0.01, %v1365_v63  ;;  %5103 = vmatmul.mubr.f32.vlgmr.msra.gmra.mxu0 %v1558_v51  ;;  %5165 = vmatmul.mubr.f32.gmra.mxu1 %v6932_v52  ;;  %v6977_v60 = vsub.f32 %v6941_v1, %v6950_v43  ;;  %v1223_v51 = vpop.f32.mrf.mxu0 }
 0x19d   :  { %v1383_v47 = vadd.f32 %v5063_v14, %v1206_v25  ;;  %5246 = vmatprep.subr.mxu1 %v8626_v40  ;;  %5183 = vmatpush3.msra.mxu0 %v8627_v11  ;;  %v1376_v42 = vpop.f32.mrf.mxu1  ;;  %v1568_v28 = vand.u32 4294901760, %v1567_v36  ;;  %v1577_v15 = vsub.f32 %v6923_v9, %v8381_v57  ;;  %v8629_v25 = vld [vmem:[#allocation28_spill] sm:$0xff]  ;;  %v8380_v54 = vand.u32 4294901760, %v6961_v13 }
 0x19e   :  { %8625 = vst [vmem:[#allocation68_spill] sm:$0xff] %v6971_v4  ;;  %v6986_v38 = vsub.f32 %v6952_v26, %v6969_v61  ;;  %v6988_v39 = vmax.f32 %v1365_v63, %v1418_v20  ;;  %5247 = vmatpush3.msra.mxu1 %v8626_v40  ;;  %v1377_v53 = vadd.f32 %v1376_v42, %v1200_v27  ;;  %v6996_v31 = vand.u32 4294901760, %v6971_v4  ;;  %v8659_v26 = vld [vmem:[#allocation60_spill] sm:$0xff] }
 0x19f   :  { %5184 = vmatprep.subr.mxu0 %v8629_v25  ;;  %v1421_v16 = vmul.f32 0.01, %v1383_v47  ;;  %5248 = vmatprep.subr.mxu1 %v8630_v12  ;;  %v5066_v29 = vpop.f32.mrf.mxu1  ;;  %v1578_v3 = vand.u32 4294901760, %v1577_v15  ;;  %v1587_v63 = vsub.f32 %v6961_v13, %v8380_v54  ;;  %v1597_v14 = vsub.f32 %v6957_v21, %v8379_v44 }
 0x1a0   :  { %8628 = vst [vmem:[#allocation69_spill] sm:$0xff] %v6988_v39  ;;  %5105 = vmatprep.mubr.f32.mxu0 %v1568_v28  ;;  %v6999_v46 = vand.u32 4294901760, %v6988_v39  ;;  %v1420_v35 = vmul.f32 0.01, %v1377_v53  ;;  %5167 = vmatprep.mubr.f32.mxu1 %v6969_v61  ;;  %v1395_v27 = vadd.f32 %v5066_v29, %v1218_v5  ;;  %v8378_v36 = vand.u32 4294901760, %v6986_v38  ;;  %v8634_v28 = vld [vmem:[#allocation32_spill] sm:$0xff] }
 0x1a1   :  { %5185 = vmatpush3.msra.mxu0 %v8629_v25  ;;  %v7003_v37 = vmax.f32 %v1383_v47, %v1421_v16  ;;  %5249 = vmatpush3.msra.mxu1 %v8630_v12  ;;  %v1388_v24 = vpop.f32.mrf.mxu1  ;;  %v8633_v47 = vld [vmem:[#allocation20_spill] sm:$0xff]  ;;  %v1230_v42 = vadd.f32 %v5013_v30, %v6885_v55  ;;  %v1588_v15 = vand.u32 4294901760, %v1587_v63  ;;  %v1224_v29 = vadd.f32 %v1223_v51, %v6896_v2  ;;  %v8635_v30 = vld [vmem:[#allocation23_spill] sm:$0xff] }
 0x1a2   :  { %5106 = vmatmul.mubr.f32.gmra.mxu0 %v1578_v3  ;;  %v7015_v5 = vsub.f32 %v6988_v39, %v6999_v46  ;;  %v7017_v20 = vmax.f32 %v1377_v53, %v1420_v35  ;;  %5168 = vmatmul.mubr.f32.gmra.mxu1 %v6950_v43  ;;  %v1389_v11 = vadd.f32 %v1388_v24, %v1212_v59  ;;  %v1423_v3 = vmul.f32 0.01, %v1395_v27  ;;  %v8636_v35 = vld [vmem:[#allocation36_spill] sm:$0xff] }
 0x1a3   :  { %8631 = vst [vmem:[#allocation70_spill] sm:$0xff] %v7003_v37  ;;  %5186 = vmatprep.subr.mxu0 %v8633_v47  ;;  %5250 = vmatprep.subr.mxu1 %v8634_v28  ;;  %v5069_v25 = vpop.f32.mrf.mxu1  ;;  %v1607_v16 = vsub.f32 %v6986_v38, %v8378_v36  ;;  %v7029_v53 = vsub.f32 %v6971_v4, %v6996_v31  ;;  %v1598_v24 = vand.u32 4294901760, %v1597_v14  ;;  %v7041_v2 = vand.u32 4294901760, %v7003_v37 }
 0x1a4   :  { %8632 = vst [vmem:[#allocation16_spill] sm:$0xff] %v7017_v20  ;;  %5187 = vmatpush3.msra.mxu0 %v8633_v47  ;;  %v7033_v59 = vand.u32 4294901760, %v7017_v20  ;;  %5251 = vmatpush3.msra.mxu1 %v8634_v28  ;;  %v1422_v55 = vmul.f32 0.01, %v1389_v11  ;;  %v8383_v47 = vand.u32 4294901760, %v6977_v60  ;;  %v8382_v36 = vand.u32 4294901760, %v7015_v5 }
 0x1a5   :  { %5188 = vmatprep.subr.mxu0 %v8635_v30  ;;  %5252 = vmatprep.subr.mxu1 %v8636_v35  ;;  %v1400_v63 = vpop.f32.mrf.mxu1  ;;  %v1407_v44 = vadd.f32 %v5069_v25, %v1230_v42  ;;  %v8640_v42 = vld [vmem:[#allocation39_spill] sm:$0xff]  ;;  %v8661_v1 = vand.u32 4294901760, %v6889_v50 }
 0x1a6   :  { %5108 = vmatprep.mubr.f32.mxu0 %v1588_v15  ;;  %v7043_v51 = vmax.f32 %v1389_v11, %v1422_v55  ;;  %5170 = vmatprep.mubr.f32.mxu1 %v6999_v46  ;;  %v7049_v54 = vsub.f32 %v7017_v20, %v7033_v59  ;;  %v1401_v14 = vadd.f32 %v1400_v63, %v1224_v29  ;;  %v1608_v15 = vand.u32 4294901760, %v1607_v16  ;;  %v8638_v11 = vld [vmem:[#allocation30_spill] sm:$0xff] }
 0x1a7   :  { %5189 = vmatpush3.msra.mxu0 %v8635_v30  ;;  %5253 = vmatpush3.msra.mxu1 %v8636_v35  ;;  %v1617_v57 = vsub.f32 %v6977_v60, %v8383_v47  ;;  %v7057_v55 = vmax.f32 %v1395_v27, %v1423_v3  ;;  %v1627_v29 = vsub.f32 %v7015_v5, %v8382_v36  ;;  %v8386_v16 = vand.u32 4294901760, %v7029_v53  ;;  %v8642_v63 = vld [vmem:[#allocation42_spill] sm:$0xff] }
 0x1a8   :  { %8637 = vst [vmem:[#allocation26_spill] sm:$0xff] %v7043_v51  ;;  %5109 = vmatmul.mubr.f32.gmra.mxu0 %v1598_v24  ;;  %5171 = vmatmul.mubr.f32.gmra.mxu1 %v6996_v31  ;;  %v1424_v25 = vmul.f32 0.01, %v1401_v14  ;;  %v7066_v30 = vand.u32 4294901760, %v7043_v51  ;;  %v8641_v24 = vld [vmem:[#allocation31_spill] sm:$0xff]  ;;  %v7072_v27 = vsub.f32 %v7003_v37, %v7041_v2  ;;  %v8388_v36 = vand.u32 4294901760, %v7049_v54 }
 0x1a9   :  { %5190 = vmatprep.subr.mxu0 %v8638_v11  ;;  %8639 = vst [vmem:[#allocation18_spill] sm:$0xff] %v7057_v55  ;;  %5254 = vmatprep.subr.mxu1 %v8640_v42  ;;  %v1425_v3 = vmul.f32 0.01, %v1407_v44  ;;  %v7081_v19 = vand.u32 4294901760, %v7057_v55  ;;  %v1628_v41 = vand.u32 4294901760, %v1627_v29  ;;  %v8654_v37 = vld [vmem:[#allocation54_spill] sm:$0xff] }
 0x1aa   :  { %5191 = vmatpush3.msra.mxu0 %v8638_v11  ;;  %5255 = vmatpush3.msra.mxu1 %v8640_v42  ;;  %v1618_v11 = vand.u32 4294901760, %v1617_v57  ;;  %v7076_v47 = vmax.f32 %v1401_v14, %v1424_v25  ;;  %v7089_v57 = vsub.f32 %v7043_v51, %v7066_v30  ;;  %v8644_v14 = vld [vmem:[#allocation35_spill] sm:$0xff]  ;;  %v1647_v29 = vsub.f32 %v7049_v54, %v8388_v36 }
 0x1ab   :  { %5192 = vmatprep.subr.mxu0 %v8641_v24  ;;  %5256 = vmatprep.subr.mxu1 %v8642_v63  ;;  %v7093_v25 = vmax.f32 %v1407_v44, %v1425_v3  ;;  %v7108_v44 = vsub.f32 %v7057_v55, %v7081_v19  ;;  %v8648_v3 = vld [vmem:[#allocation47_spill] sm:$0xff]  ;;  %v8649_v55 = vand.u32 4294901760, %v7072_v27 }
 0x1ac   :  { %5111 = vmatprep.mubr.f32.mxu0 %v1608_v15  ;;  %8643 = vst [vmem:[#allocation21_spill] sm:$0xff] %v7076_v47  ;;  %5173 = vmatprep.mubr.f32.mxu1 %v7033_v59  ;;  %v1637_v15 = vsub.f32 %v7029_v53, %v8386_v16  ;;  %v7102_v16 = vand.u32 4294901760, %v7076_v47  ;;  %v1648_v51 = vand.u32 4294901760, %v1647_v29  ;;  %v8652_v29 = vld [vmem:[#allocation45_spill] sm:$0xff] }
 0x1ad   :  { %5193 = vmatpush3.msra.mxu0 %v8641_v24  ;;  %5257 = vmatpush3.msra.mxu1 %v8642_v63  ;;  %8645 = vst [vmem:[#allocation24_spill] sm:$0xff] %v7093_v25  ;;  %v8646_v24 = vld [vmem:[#allocation44_spill] sm:$0xff]  ;;  %v1657_v20 = vsub.f32 %v7072_v27, %v8649_v55  ;;  %v8397_v36 = vand.u32 4294901760, %v7108_v44  ;;  %v8653_v55 = vand.u32 4294901760, %v7089_v57 }
 0x1ae   :  { %5112 = vmatmul.mubr.f32.gmra.mxu0 %v1618_v11  ;;  %5174 = vmatmul.mubr.f32.gmra.mxu1 %v7041_v2  ;;  %v7115_v11 = vand.u32 4294901760, %v7093_v25 }
 0x1af   :  { %5194 = vmatprep.subr.mxu0 %v8644_v14  ;;  %5258 = vmatprep.subr.mxu1 %v8646_v24  ;;  %v1658_v39 = vand.u32 4294901760, %v1657_v20 }
 0x1b0   :  { %5195 = vmatpush3.msra.mxu0 %v8644_v14  ;;  %5259 = vmatpush3.msra.mxu1 %v8646_v24  ;;  %v1638_v14 = vand.u32 4294901760, %v1637_v15  ;;  %v8651_v15 = vld [vmem:[#allocation51_spill] sm:$0xff] }
 0x1b1   :  { %5196 = vmatprep.subr.mxu0 %v8647_v0  ;;  %5260 = vmatprep.subr.mxu1 %v8648_v3 }
 0x1b2   :  { %5114 = vmatprep.mubr.f32.mxu0 %v1628_v41  ;;  %5176 = vmatprep.mubr.f32.mxu1 %v7066_v30  ;;  %v7123_v41 = vsub.f32 %v7076_v47, %v7102_v16  ;;  %v7137_v47 = vsub.f32 %v7093_v25, %v7115_v11  ;;  %v8655_v25 = vld [vmem:[#allocation46_spill] sm:$0xff] }
 0x1b3   :  { %5197 = vmatpush3.msra.mxu0 %v8647_v0  ;;  %5261 = vmatpush3.msra.mxu1 %v8648_v3  ;;  %v8650_v0 = vld [vmem:[#allocation41_spill] sm:$0xff] }
 0x1b4   :  { %5115 = vmatmul.mubr.f32.gmra.mxu0 %v1638_v14  ;;  %5177 = vmatmul.mubr.f32.gmra.mxu1 %v7081_v19  ;;  %v1667_v14 = vsub.f32 %v7089_v57, %v8653_v55  ;;  %v1677_v55 = vsub.f32 %v7108_v44, %v8397_v36  ;;  %v1696_v20 = vand.u32 4294901760, %v7137_v47  ;;  %v8658_v36 = vld [vmem:[#allocation50_spill] sm:$0xff] }
 0x1b5   :  { %5198 = vmatprep.subr.mxu0 %v8650_v0  ;;  %5262 = vmatprep.subr.mxu1 %v8651_v15 }
 0x1b6   :  { %5199 = vmatpush3.msra.mxu0 %v8650_v0  ;;  %5263 = vmatpush3.msra.mxu1 %v8651_v15  ;;  %v8400_v0 = vand.u32 4294901760, %v7123_v41  ;;  %v1668_v4 = vand.u32 4294901760, %v1667_v14  ;;  %v1678_v14 = vand.u32 4294901760, %v1677_v55 }
 0x1b7   :  { %5200 = vmatprep.subr.mxu0 %v8652_v29  ;;  %5264 = vmatprep.subr.mxu1 %v8654_v37 }
 0x1b8   :  { %5117 = vmatprep.mubr.f32.mxu0 %v1648_v51  ;;  %5179 = vmatprep.mubr.f32.mxu1 %v7102_v16  ;;  %v8656_v51 = vld [vmem:[#allocation57_spill] sm:$0xff] }
 0x1b9   :  { %5201 = vmatpush3.msra.mxu0 %v8652_v29  ;;  %5265 = vmatpush3.msra.mxu1 %v8654_v37  ;;  %v8657_v29 = vand.u32 4294901760, %v6901_v33 }
 0x1ba   :  { %5118 = vmatmul.mubr.f32.gmra.mxu0 %v1658_v39  ;;  %5180 = vmatmul.mubr.f32.gmra.mxu1 %v7115_v11  ;;  %v1687_v39 = vsub.f32 %v7123_v41, %v8400_v0 }
 0x1bb   :  { %5202 = vmatprep.subr.mxu0 %v8655_v25  ;;  %5266 = vmatprep.subr.mxu1 %v8656_v51 }
 0x1bc   :  { %5203 = vmatpush3.msra.mxu0 %v8655_v25  ;;  %5267 = vmatpush3.msra.mxu1 %v8656_v51  ;;  %v1697_v25 = vsub.f32 %v7137_v47, %v1696_v20  ;;  %v1688_v0 = vand.u32 4294901760, %v1687_v39  ;;  %v8665_v39 = vand.u32 4294901760, %v6923_v9 }
 0x1bd   :  { %5270 = vmatprep.mubr.f32.mxu1 %v8657_v29  ;;  %5204 = vmatprep.subr.mxu0 %v8658_v36  ;;  %v8660_v29 = vld [vmem:[#allocation53_spill] sm:$0xff] }
 0x1be   :  { %5268 = vmatprep.subr.mxu1 %v8659_v26  ;;  %5120 = vmatprep.mubr.f32.mxu0 %v1668_v4  ;;  %v8662_v4 = vand.u32 4294901760, %v6927_v17  ;;  %v1698_v55 = vand.u32 4294901760, %v1697_v25  ;;  %v2823_v25 = vld [vmem:[#allocation10 + $0x50] sm:$0xff] }
 0x1bf   :  { %5205 = vmatpush3.msra.mxu0 %v8658_v36  ;;  %5269 = vmatpush3.msra.mxu1 %v8659_v26  ;;  %v8663_v36 = vld [vmem:[#allocation56_spill] sm:$0xff] }
 0x1c0   :  { %5121 = vmatmul.mubr.f32.gmra.mxu0 %v1678_v14  ;;  %5206 = vmatprep.subr.mxu0 %v8660_v29  ;;  %v8669_v14 = vld [vmem:[#allocation17_spill] sm:$0xff] }
 0x1c1   :  { %5271 = vmatmul.mubr.f32.vlgmr.msra.gmra.mxu1 %v8661_v1  ;;  %5350 = vmatprep.subr.mxu1 %v8617_v45  ;;  %v8664_v1 = vld [vmem:[#allocation59_spill] sm:$0xff] }
 0x1c2   :  { %5207 = vmatpush3.msra.mxu0 %v8660_v29  ;;  %5273 = vmatprep.mubr.f32.mxu1 %v8662_v4  ;;  %v7366_v4 = vand.u32 4294901760, %v2823_v25 }
 0x1c3   :  { %5351 = vmatpush3.msra.mxu1 %v8617_v45  ;;  %5208 = vmatprep.subr.mxu0 %v8663_v36  ;;  %v8666_v45 = vand.u32 4294901760, %v6961_v13 }
 0x1c4   :  { %5352 = vmatprep.subr.mxu1 %v8619_v48  ;;  %5123 = vmatprep.mubr.f32.mxu0 %v1688_v0  ;;  %v8667_v0 = vld [vmem:[#allocation62_spill] sm:$0xff]  ;;  %8708 = vst [vmem:[#allocation47_spill] sm:$0xff] %v7366_v4 }
 0x1c5   :  { %5209 = vmatpush3.msra.mxu0 %v8663_v36  ;;  %5353 = vmatpush3.msra.mxu1 %v8619_v48  ;;  %v8668_v48 = vand.u32 4294901760, %v6957_v21 }
 0x1c6   :  { %5124 = vmatmul.mubr.f32.gmra.mxu0 %v1698_v55  ;;  %5210 = vmatprep.subr.mxu0 %v8664_v1 }
 0x1c7   :  { %5274 = vmatmul.mubr.f32.gmra.mxu1 %v8665_v39  ;;  %5354 = vmatprep.subr.mxu1 %v8621_v8 }
 0x1c8   :  { %5211 = vmatpush3.msra.mxu0 %v8664_v1  ;;  %5214 = vmatprep.mubr.f32.mxu0 %v6901_v33  ;;  %v8670_v33 = vand.u32 4294901760, %v6986_v38  ;;  %v2822_v1 = vld [vmem:[#allocation10 + $0x48] sm:$0xff] }
 0x1c9   :  { %5276 = vmatprep.mubr.f32.mxu1 %v8666_v45  ;;  %5355 = vmatpush3.msra.mxu1 %v8621_v8  ;;  %v8671_v8 = vld [vmem:[#allocation19_spill] sm:$0xff]  ;;  %v7376_v45 = vsub.f32 %v2823_v25, %v7366_v4  ;;  %v2815_v25 = vld [vmem:[#allocation10 + $0x10] sm:$0xff] }
 0x1ca   :  { %5212 = vmatprep.subr.mxu0 %v8667_v0  ;;  %5356 = vmatprep.subr.mxu1 %v8623_v34 }
 0x1cb   :  { %5213 = vmatpush3.msra.mxu0 %v8667_v0  ;;  %5357 = vmatpush3.msra.mxu1 %v8623_v34  ;;  %v8674_v34 = vand.u32 4294901760, %v7015_v5  ;;  %8710 = vst [vmem:[#allocation51_spill] sm:$0xff] %v7376_v45  ;;  %v7378_v0 = vand.u32 4294901760, %v2822_v1 }
 0x1cc   :  { %5215 = vmatmul.mubr.f32.vlgmr.msra.gmra.mxu0 %v6889_v50  ;;  %5277 = vmatmul.mubr.f32.gmra.mxu1 %v8668_v48  ;;  %v8672_v50 = vand.u32 4294901760, %v6977_v60 }
 0x1cd   :  { %5294 = vmatprep.subr.mxu0 %v8669_v14  ;;  %5358 = vmatprep.subr.mxu1 %v8626_v40  ;;  %8711 = vst [vmem:[#allocation45_spill] sm:$0xff] %v7378_v0 }
 0x1ce   :  { %5217 = vmatprep.mubr.f32.mxu0 %v6927_v17  ;;  %5279 = vmatprep.mubr.f32.mxu1 %v8670_v33  ;;  %v8673_v17 = vld [vmem:[#allocation22_spill] sm:$0xff] }
 0x1cf   :  { %5295 = vmatpush3.msra.mxu0 %v8669_v14  ;;  %5359 = vmatpush3.msra.mxu1 %v8626_v40  ;;  %v8675_v40 = vld [vmem:[#allocation25_spill] sm:$0xff]  ;;  %v2821_v14 = vld [vmem:[#allocation10 + $0x40] sm:$0xff] }
 0x1d0   :  { %5296 = vmatprep.subr.mxu0 %v8671_v8  ;;  %5360 = vmatprep.subr.mxu1 %v8630_v12 }
 0x1d1   :  { %5297 = vmatpush3.msra.mxu0 %v8671_v8  ;;  %5361 = vmatpush3.msra.mxu1 %v8630_v12  ;;  %v8678_v12 = vand.u32 4294901760, %v7049_v54  ;;  %v7385_v8 = vand.u32 4294901760, %v7376_v45 }
 0x1d2   :  { %5218 = vmatmul.mubr.f32.gmra.mxu0 %v6923_v9  ;;  %5280 = vmatmul.mubr.f32.gmra.mxu1 %v8672_v50  ;;  %v8676_v9 = vand.u32 4294901760, %v7029_v53  ;;  %v7388_v50 = vsub.f32 %v2822_v1, %v7378_v0 }
 0x1d3   :  { %5298 = vmatprep.subr.mxu0 %v8673_v17  ;;  %5362 = vmatprep.subr.mxu1 %v8634_v28  ;;  %8712 = vst [vmem:[#allocation54_spill] sm:$0xff] %v7385_v8 }
 0x1d4   :  { %5220 = vmatprep.mubr.f32.mxu0 %v6961_v13  ;;  %5282 = vmatprep.mubr.f32.mxu1 %v8674_v34  ;;  %v8677_v13 = vld [vmem:[#allocation33_spill] sm:$0xff]  ;;  %8713 = vst [vmem:[#allocation46_spill] sm:$0xff] %v7388_v50  ;;  %v2820_v34 = vld [vmem:[#allocation10 + $0x38] sm:$0xff] }
 0x1d5   :  { %5299 = vmatpush3.msra.mxu0 %v8673_v17  ;;  %5363 = vmatpush3.msra.mxu1 %v8634_v28  ;;  %v8679_v28 = vld [vmem:[#allocation34_spill] sm:$0xff]  ;;  %v7390_v17 = vand.u32 4294901760, %v2821_v14 }
 0x1d6   :  { %5300 = vmatprep.subr.mxu0 %v8675_v40  ;;  %5364 = vmatprep.subr.mxu1 %v8636_v35 }
 0x1d7   :  { %5301 = vmatpush3.msra.mxu0 %v8675_v40  ;;  %5365 = vmatpush3.msra.mxu1 %v8636_v35  ;;  %v8682_v35 = vand.u32 4294901760, %v7089_v57  ;;  %8714 = vst [vmem:[#allocation57_spill] sm:$0xff] %v7390_v17 }
 0x1d8   :  { %5221 = vmatmul.mubr.f32.gmra.mxu0 %v6957_v21  ;;  %5283 = vmatmul.mubr.f32.gmra.mxu1 %v8676_v9  ;;  %v8680_v21 = vand.u32 4294901760, %v7072_v27  ;;  %v3114_v9 = vsub.f32 %v7376_v45, %v7385_v8  ;;  %v7545_v8 = vld [vmem:[#allocation5 + $0x1] ss:$0 sm:$0xff] }
 0x1d9   :  { %5302 = vmatprep.subr.mxu0 %v8677_v13  ;;  %5366 = vmatprep.subr.mxu1 %v8640_v42 }
 0x1da   :  { %5223 = vmatprep.mubr.f32.mxu0 %v6986_v38  ;;  %5285 = vmatprep.mubr.f32.mxu1 %v8678_v12  ;;  %v8681_v38 = vld [vmem:[#allocation37_spill] sm:$0xff]  ;;  %v7400_v12 = vsub.f32 %v2821_v14, %v7390_v17  ;;  %v7462_v14 = vand.u32 4294901760, %v2815_v25 }
 0x1db   :  { %5303 = vmatpush3.msra.mxu0 %v8677_v13  ;;  %5367 = vmatpush3.msra.mxu1 %v8640_v42  ;;  %v8683_v42 = vld [vmem:[#allocation40_spill] sm:$0xff]  ;;  %v7397_v13 = vand.u32 4294901760, %v7388_v50 }
 0x1dc   :  { %5304 = vmatprep.subr.mxu0 %v8679_v28  ;;  %5368 = vmatprep.subr.mxu1 %v8642_v63  ;;  %8716 = vst [vmem:[#allocation60_spill] sm:$0xff] %v7400_v12 }
 0x1dd   :  { %5305 = vmatpush3.msra.mxu0 %v8679_v28  ;;  %5369 = vmatpush3.msra.mxu1 %v8642_v63  ;;  %v8686_v63 = vand.u32 4294901760, %v7123_v41  ;;  %8715 = vst [vmem:[#allocation50_spill] sm:$0xff] %v7397_v13  ;;  %v7403_v28 = vand.u32 4294901760, %v2820_v34 }
 0x1de   :  { %5224 = vmatmul.mubr.f32.gmra.mxu0 %v6977_v60  ;;  %5286 = vmatmul.mubr.f32.gmra.mxu1 %v8680_v21  ;;  %v8684_v60 = vand.u32 4294901760, %v7108_v44  ;;  %v2819_v21 = vld [vmem:[#allocation10 + $0x30] sm:$0xff] }
 0x1df   :  { %5306 = vmatprep.subr.mxu0 %v8681_v38  ;;  %5370 = vmatprep.subr.mxu1 %v8646_v24  ;;  %8717 = vst [vmem:[#allocation53_spill] sm:$0xff] %v7403_v28 }
 0x1e0   :  { %5226 = vmatprep.mubr.f32.mxu0 %v7015_v5  ;;  %5288 = vmatprep.mubr.f32.mxu1 %v8682_v35  ;;  %v8685_v5 = vld [vmem:[#allocation43_spill] sm:$0xff]  ;;  %v3121_v35 = vsub.f32 %v7388_v50, %v7397_v13 }
 0x1e1   :  { %5307 = vmatpush3.msra.mxu0 %v8681_v38  ;;  %5371 = vmatpush3.msra.mxu1 %v8646_v24  ;;  %v8687_v24 = vld [vmem:[#allocation48_spill] sm:$0xff]  ;;  %v3115_v38 = vand.u32 4294901760, %v3114_v9 }
 0x1e2   :  { %5308 = vmatprep.subr.mxu0 %v8683_v42  ;;  %5372 = vmatprep.subr.mxu1 %v8648_v3 }
 0x1e3   :  { %5309 = vmatpush3.msra.mxu0 %v8683_v42  ;;  %5373 = vmatpush3.msra.mxu1 %v8648_v3  ;;  %v7409_v42 = vand.u32 4294901760, %v7400_v12 }
 0x1e4   :  { %5227 = vmatmul.mubr.f32.gmra.mxu0 %v7029_v53  ;;  %5289 = vmatmul.mubr.f32.gmra.mxu1 %v8684_v60  ;;  %v8689_v53 = vld [vmem:[#allocation52_spill] sm:$0xff]  ;;  %v7411_v60 = vand.u32 4294901760, %v2819_v21 }
 0x1e5   :  { %5310 = vmatprep.subr.mxu0 %v8685_v5  ;;  %5374 = vmatprep.subr.mxu1 %v8651_v15  ;;  %8718 = vst [vmem:[#allocation56_spill] sm:$0xff] %v7409_v42  ;;  %8732 = vst [vmem:[#allocation52_spill] sm:$0xff] %v7462_v14 }
 0x1e6   :  { %5229 = vmatprep.mubr.f32.mxu0 %v7049_v54  ;;  %5291 = vmatprep.mubr.f32.mxu1 %v8686_v63  ;;  %v8688_v54 = vld [vmem:[#allocation49_spill] sm:$0xff]  ;;  %8719 = vst [vmem:[#allocation59_spill] sm:$0xff] %v7411_v60 }
 0x1e7   :  { %5311 = vmatpush3.msra.mxu0 %v8685_v5  ;;  %5375 = vmatpush3.msra.mxu1 %v8651_v15  ;;  %v7414_v5 = vsub.f32 %v2820_v34, %v7403_v28  ;;  %v2818_v63 = vld [vmem:[#allocation10 + $0x28] sm:$0xff] }
 0x1e8   :  { %5312 = vmatprep.subr.mxu0 %v8687_v24  ;;  %5376 = vmatprep.subr.mxu1 %v8654_v37 }
 0x1e9   :  { %5313 = vmatpush3.msra.mxu0 %v8687_v24  ;;  %5377 = vmatpush3.msra.mxu1 %v8654_v37  ;;  %v8690_v37 = vld [vmem:[#allocation55_spill] sm:$0xff]  ;;  %8720 = vst [vmem:[#allocation62_spill] sm:$0xff] %v7414_v5  ;;  %v3122_v24 = vand.u32 4294901760, %v3121_v35  ;;  %v2813_v35 = vld [vmem:[#allocation10] sm:$0xff] }
 0x1ea   :  { %5230 = vmatmul.mubr.f32.gmra.mxu0 %v7072_v27  ;;  %5292 = vmatmul.mubr.f32.gmra.mxu1 %v1696_v20  ;;  %v8691_v27 = vld [vmem:[#allocation58_spill] sm:$0xff] }
 0x1eb   :  { %5314 = vmatprep.subr.mxu0 %v8688_v54  ;;  %5378 = vmatprep.subr.mxu1 %v8656_v51 }
 0x1ec   :  { %5232 = vmatprep.mubr.f32.mxu0 %v7089_v57  ;;  %5315 = vmatpush3.msra.mxu0 %v8688_v54  ;;  %v8692_v57 = vld [vmem:[#allocation61_spill] sm:$0xff]  ;;  %v3128_v54 = vsub.f32 %v7400_v12, %v7409_v42 }
 0x1ed   :  { %5379 = vmatpush3.msra.mxu1 %v8656_v51  ;;  %5382 = vmatprep.mubr.f32.mxu1 %v6892_v62 }
 0x1ee   :  { %5316 = vmatprep.subr.mxu0 %v8689_v53  ;;  %5380 = vmatprep.subr.mxu1 %v8659_v26 }
 0x1ef   :  { %5317 = vmatpush3.msra.mxu0 %v8689_v53  ;;  %5381 = vmatpush3.msra.mxu1 %v8659_v26  ;;  %v8693_v26 = vld [vmem:[#allocation63_spill] sm:$0xff]  ;;  %v7420_v53 = vsub.f32 %v2819_v21, %v7411_v60 }
 0x1f0   :  { %5233 = vmatmul.mubr.f32.gmra.mxu0 %v7108_v44  ;;  %5318 = vmatprep.subr.mxu0 %v8690_v37 }
 0x1f1   :  { %5383 = vmatmul.mubr.f32.vlgmr.msra.gmra.mxu1 %v6877_v49  ;;  %5235 = vmatprep.mubr.f32.mxu0 %v7123_v41  ;;  %8721 = vst [vmem:[#allocation17_spill] sm:$0xff] %v7420_v53 }
 0x1f2   :  { %5319 = vmatpush3.msra.mxu0 %v8690_v37  ;;  %5385 = vmatprep.mubr.f32.mxu1 %v6911_v23  ;;  %v7422_v37 = vand.u32 4294901760, %v2818_v63 }
 0x1f3   :  { %5320 = vmatprep.subr.mxu0 %v8691_v27 }
 0x1f4   :  { %5321 = vmatpush3.msra.mxu0 %v8691_v27  ;;  %8722 = vst [vmem:[#allocation19_spill] sm:$0xff] %v7422_v37  ;;  %v7426_v27 = vand.u32 4294901760, %v7414_v5 }
 0x1f5   :  { %5236 = vmatmul.mubr.f32.gmra.mxu0 %v7137_v47  ;;  %5322 = vmatprep.subr.mxu0 %v8692_v57 }
 0x1f6   :  { %5386 = vmatmul.mubr.f32.gmra.mxu1 %v6904_v58  ;;  %5323 = vmatpush3.msra.mxu0 %v8692_v57  ;;  %8723 = vst [vmem:[#allocation22_spill] sm:$0xff] %v7426_v27  ;;  %v2817_v57 = vld [vmem:[#allocation10 + $0x20] sm:$0xff] }
 0x1f7   :  { %5326 = vmatprep.mubr.f32.mxu0 %v6892_v62  ;;  %5388 = vmatprep.mubr.f32.mxu1 %v6946_v22 }
 0x1f8   :  { %5324 = vmatprep.subr.mxu0 %v8693_v26 }
 0x1f9   :  { %5325 = vmatpush3.msra.mxu0 %v8693_v26  ;;  %v3129_v26 = vand.u32 4294901760, %v3128_v54 }
 0x1fa   :  { %5327 = vmatmul.mubr.f32.vlgmr.msra.gmra.mxu0 %v6877_v49  ;;  %5389 = vmatmul.mubr.f32.gmra.mxu1 %v6932_v52  ;;  %v2828_v49 = vld [vmem:[#allocation10 + $0x78] sm:$0xff] }
 0x1fb   :  { %5329 = vmatprep.mubr.f32.mxu0 %v6911_v23  ;;  %5391 = vmatprep.mubr.f32.mxu1 %v6969_v61  ;;  %v7315_v62 = vand.u32 4294901760, %v2828_v49 }
 0x1fd   :  { %8694 = vst [vmem:[#allocation29_spill] sm:$0xff] %v7315_v62  ;;  %v7318_v23 = vsub.f32 %v2828_v49, %v7315_v62  ;;  %5406 = vmatprep.subr.mxu0 %v7315_v62  ;;  %v7430_v49 = vand.u32 4294901760, %v7420_v53 }
 0x1fe   :  { %5330 = vmatmul.mubr.f32.gmra.mxu0 %v6904_v58  ;;  %5392 = vmatmul.mubr.f32.gmra.mxu1 %v6950_v43  ;;  %v2827_v58 = vld [vmem:[#allocation10 + $0x70] sm:$0xff] }
 0x1ff   :  { %5332 = vmatprep.mubr.f32.mxu0 %v6946_v22  ;;  %5394 = vmatprep.mubr.f32.mxu1 %v6999_v46  ;;  %8695 = vst [vmem:[#allocation28_spill] sm:$0xff] %v7318_v23  ;;  %v2826_v22 = vld [vmem:[#allocation10 + $0x68] sm:$0xff]  ;;  %8724 = vst [vmem:[#allocation25_spill] sm:$0xff] %v7430_v49 }
 0x200   :  { %5407 = vmatpush3.msra.mxu0 %v7315_v62 }
 0x202   :  { %5333 = vmatmul.mubr.f32.gmra.mxu0 %v6932_v52  ;;  %5395 = vmatmul.mubr.f32.gmra.mxu1 %v6996_v31  ;;  %v7320_v52 = vand.u32 4294901760, %v2827_v58 }
 0x203   :  { %5335 = vmatprep.mubr.f32.mxu0 %v6969_v61  ;;  %5397 = vmatprep.mubr.f32.mxu1 %v7033_v59  ;;  %v7330_v61 = vand.u32 4294901760, %v2826_v22 }
 0x204   :  { %8696 = vst [vmem:[#allocation27_spill] sm:$0xff] %v7320_v52  ;;  %5408 = vmatprep.subr.mxu0 %v7320_v52 }
 0x205   :  { %8699 = vst [vmem:[#allocation23_spill] sm:$0xff] %v7330_v61  ;;  %5409 = vmatpush3.msra.mxu0 %v7320_v52  ;;  %v7340_v47 = vsub.f32 %v2826_v22, %v7330_v61  ;;  %v7435_v22 = vand.u32 4294901760, %v2817_v57 }
 0x206   :  { %5336 = vmatmul.mubr.f32.gmra.mxu0 %v6950_v43  ;;  %5398 = vmatmul.mubr.f32.gmra.mxu1 %v7041_v2  ;;  %v7328_v43 = vsub.f32 %v2827_v58, %v7320_v52  ;;  %v7433_v58 = vsub.f32 %v2818_v63, %v7422_v37 }
 0x207   :  { %5338 = vmatprep.mubr.f32.mxu0 %v6999_v46  ;;  %5400 = vmatprep.mubr.f32.mxu1 %v7066_v30  ;;  %8701 = vst [vmem:[#allocation30_spill] sm:$0xff] %v7340_v47  ;;  %v7349_v44 = vand.u32 4294901760, %v7340_v47  ;;  %8726 = vst [vmem:[#allocation34_spill] sm:$0xff] %v7435_v22 }
 0x208   :  { %8698 = vst [vmem:[#allocation32_spill] sm:$0xff] %v7328_v43  ;;  %5410 = vmatprep.subr.mxu0 %v7330_v61  ;;  %8725 = vst [vmem:[#allocation33_spill] sm:$0xff] %v7433_v58 }
 0x209   :  { %5411 = vmatpush3.msra.mxu0 %v7330_v61  ;;  %8703 = vst [vmem:[#allocation31_spill] sm:$0xff] %v7349_v44  ;;  %v3093_v51 = vsub.f32 %v7340_v47, %v7349_v44 }
 0x20a   :  { %5339 = vmatmul.mubr.f32.gmra.mxu0 %v6996_v31  ;;  %5401 = vmatmul.mubr.f32.gmra.mxu1 %v7081_v19  ;;  %v2825_v31 = vld [vmem:[#allocation10 + $0x60] sm:$0xff] }
 0x20b   :  { %5341 = vmatprep.mubr.f32.mxu0 %v7033_v59  ;;  %5403 = vmatprep.mubr.f32.mxu1 %v7102_v16  ;;  %v7337_v59 = vand.u32 4294901760, %v7328_v43  ;;  %v3094_v36 = vand.u32 4294901760, %v3093_v51 }
 0x20d   :  { %8700 = vst [vmem:[#allocation36_spill] sm:$0xff] %v7337_v59 }
 0x20e   :  { %5342 = vmatmul.mubr.f32.gmra.mxu0 %v7041_v2  ;;  %5404 = vmatmul.mubr.f32.gmra.mxu1 %v7115_v11  ;;  %v7342_v2 = vand.u32 4294901760, %v2825_v31 }
 0x20f   :  { %5344 = vmatprep.mubr.f32.mxu0 %v7066_v30 }
 0x210   :  { %8702 = vst [vmem:[#allocation39_spill] sm:$0xff] %v7342_v2  ;;  %v7352_v3 = vsub.f32 %v2825_v31, %v7342_v2  ;;  %5412 = vmatprep.subr.mxu0 %v7342_v2  ;;  %v3135_v31 = vsub.f32 %v7414_v5, %v7426_v27 }
 0x211   :  { %5413 = vmatpush3.msra.mxu0 %v7342_v2 }
 0x212   :  { %5345 = vmatmul.mubr.f32.gmra.mxu0 %v7081_v19  ;;  %v7325_v19 = vand.u32 4294901760, %v7318_v23  ;;  %8704 = vst [vmem:[#allocation42_spill] sm:$0xff] %v7352_v3  ;;  %v7361_v20 = vand.u32 4294901760, %v7352_v3  ;;  %v3136_v51 = vand.u32 4294901760, %v3135_v31 }
 0x213   :  { %5347 = vmatprep.mubr.f32.mxu0 %v7102_v16  ;;  %v2824_v16 = vld [vmem:[#allocation10 + $0x58] sm:$0xff] }
 0x214   :  { %8697 = vst [vmem:[#allocation20_spill] sm:$0xff] %v7325_v19  ;;  %v3079_v46 = vsub.f32 %v7318_v23, %v7325_v19  ;;  %v7355_v41 = vand.u32 4294901760, %v2824_v16  ;;  %8706 = vst [vmem:[#allocation44_spill] sm:$0xff] %v7361_v20  ;;  %v3100_v55 = vsub.f32 %v7352_v3, %v7361_v20 }
 0x216   :  { %5348 = vmatmul.mubr.f32.gmra.mxu0 %v7115_v11  ;;  %v3080_v30 = vand.u32 4294901760, %v3079_v46  ;;  %v3086_v11 = vsub.f32 %v7328_v43, %v7337_v59  ;;  %8705 = vst [vmem:[#allocation35_spill] sm:$0xff] %v7355_v41  ;;  %v7364_v29 = vsub.f32 %v2824_v16, %v7355_v41  ;;  %5414 = vmatprep.subr.mxu0 %v7355_v41  ;;  %v3101_v48 = vand.u32 4294901760, %v3100_v55  ;;  %v2816_v46 = vld [vmem:[#allocation10 + $0x18] sm:$0xff] }
 0x217   :  { %5415 = vmatpush3.msra.mxu0 %v7355_v41  ;;  %v3142_v16 = vsub.f32 %v7420_v53, %v7430_v49 }
 0x218   :  { %5462 = vmatprep.subr.mxu1 %v3080_v30  ;;  %v3087_v15 = vand.u32 4294901760, %v3086_v11  ;;  %8707 = vst [vmem:[#allocation38_spill] sm:$0xff] %v7364_v29  ;;  %v7373_v39 = vand.u32 4294901760, %v7364_v29  ;;  %5416 = vmatprep.subr.mxu0 %v7366_v4  ;;  %v7447_v11 = vsub.f32 %v2817_v57, %v7435_v22  ;;  %v7482_v57 = vand.u32 4294901760, %v2813_v35 }
 0x219   :  { %5463 = vmatpush3.msra.mxu1 %v3080_v30  ;;  %5417 = vmatpush3.msra.mxu0 %v7366_v4  ;;  %v7444_v30 = vand.u32 4294901760, %v7433_v58 }
 0x21a   :  { %5464 = vmatprep.subr.mxu1 %v3087_v15  ;;  %8709 = vst [vmem:[#allocation41_spill] sm:$0xff] %v7373_v39  ;;  %v3107_v33 = vsub.f32 %v7364_v29, %v7373_v39  ;;  %5418 = vmatprep.subr.mxu0 %v7378_v0  ;;  %8728 = vst [vmem:[#allocation40_spill] sm:$0xff] %v7447_v11  ;;  %v7456_v1 = vand.u32 4294901760, %v7447_v11 }
 0x21b   :  { %5465 = vmatpush3.msra.mxu1 %v3087_v15  ;;  %5419 = vmatpush3.msra.mxu0 %v7378_v0  ;;  %8727 = vst [vmem:[#allocation37_spill] sm:$0xff] %v7444_v30  ;;  %v7449_v15 = vand.u32 4294901760, %v2816_v46  ;;  %v3149_v55 = vsub.f32 %v7433_v58, %v7444_v30  ;;  %8737 = vst [vmem:[#allocation71_spill] sm:$0xff] %v7482_v57 }
 0x21c   :  { %5466 = vmatprep.subr.mxu1 %v3094_v36  ;;  %v3108_v40 = vand.u32 4294901760, %v3107_v33  ;;  %5420 = vmatprep.subr.mxu0 %v7390_v17  ;;  %8730 = vst [vmem:[#allocation48_spill] sm:$0xff] %v7456_v1  ;;  %v2814_v33 = vld [vmem:[#allocation10 + $0x8] sm:$0xff] }
 0x21d   :  { %5467 = vmatpush3.msra.mxu1 %v3094_v36  ;;  %5421 = vmatpush3.msra.mxu0 %v7390_v17  ;;  %8729 = vst [vmem:[#allocation43_spill] sm:$0xff] %v7449_v15  ;;  %v3143_v36 = vand.u32 4294901760, %v3142_v16  ;;  %v3150_v34 = vand.u32 4294901760, %v3149_v55  ;;  %v7470_v21 = vand.u32 4294901760, %v2814_v33  ;;  %v7493_v16 = vsub.f32 %v2813_v35, %v7482_v57 }
 0x21e   :  { %5468 = vmatprep.subr.mxu1 %v3101_v48  ;;  %5422 = vmatprep.subr.mxu0 %v7403_v28 }
 0x21f   :  { %5469 = vmatpush3.msra.mxu1 %v3101_v48  ;;  %5423 = vmatpush3.msra.mxu0 %v7403_v28  ;;  %v7459_v48 = vsub.f32 %v2816_v46, %v7449_v15  ;;  %8734 = vst [vmem:[#allocation58_spill] sm:$0xff] %v7470_v21  ;;  %v7480_v54 = vsub.f32 %v2814_v33, %v7470_v21  ;;  %8740 = vst [vmem:[#allocation74_spill] sm:$0xff] %v7493_v16 }
 0x220   :  { %5470 = vmatprep.subr.mxu1 %v3108_v40  ;;  %5424 = vmatprep.subr.mxu0 %v7411_v60 }
 0x221   :  { %5471 = vmatpush3.msra.mxu1 %v3108_v40  ;;  %5425 = vmatpush3.msra.mxu0 %v7411_v60  ;;  %8731 = vst [vmem:[#allocation49_spill] sm:$0xff] %v7459_v48  ;;  %v3156_v40 = vsub.f32 %v7447_v11, %v7456_v1  ;;  %v7468_v9 = vand.u32 4294901760, %v7459_v48  ;;  %8736 = vst [vmem:[#allocation63_spill] sm:$0xff] %v7480_v54  ;;  %v7490_v46 = vand.u32 4294901760, %v7480_v54 }
 0x222   :  { %5472 = vmatprep.subr.mxu1 %v3115_v38  ;;  %5426 = vmatprep.subr.mxu0 %v7422_v37 }
 0x223   :  { %5473 = vmatpush3.msra.mxu1 %v3115_v38  ;;  %5427 = vmatpush3.msra.mxu0 %v7422_v37  ;;  %8733 = vst [vmem:[#allocation55_spill] sm:$0xff] %v7468_v9  ;;  %v7474_v38 = vsub.f32 %v2815_v25, %v7462_v14  ;;  %v3157_v63 = vand.u32 4294901760, %v3156_v40  ;;  %8739 = vst [vmem:[#allocation73_spill] sm:$0xff] %v7490_v46  ;;  %v3177_v25 = vsub.f32 %v7480_v54, %v7490_v46 }
 0x224   :  { %5474 = vmatprep.subr.mxu1 %v3122_v24  ;;  %5428 = vmatprep.subr.mxu0 %v7435_v22 }
 0x225   :  { %5475 = vmatpush3.msra.mxu1 %v3122_v24  ;;  %5429 = vmatpush3.msra.mxu0 %v7435_v22  ;;  %8735 = vst [vmem:[#allocation61_spill] sm:$0xff] %v7474_v38  ;;  %v3163_v24 = vsub.f32 %v7459_v48, %v7468_v9  ;;  %v3178_v33 = vand.u32 4294901760, %v3177_v25 }
 0x226   :  { %5476 = vmatprep.subr.mxu1 %v3129_v26  ;;  %5430 = vmatprep.subr.mxu0 %v7449_v15 }
 0x227   :  { %5477 = vmatpush3.msra.mxu1 %v3129_v26  ;;  %5431 = vmatpush3.msra.mxu0 %v7449_v15  ;;  %v7486_v26 = vand.u32 4294901760, %v7474_v38  ;;  %v3164_v31 = vand.u32 4294901760, %v3163_v24 }
 0x228   :  { %5478 = vmatprep.subr.mxu1 %v3136_v51  ;;  %5432 = vmatprep.subr.mxu0 %v7462_v14 }
 0x229   :  { %5479 = vmatpush3.msra.mxu1 %v3136_v51  ;;  %5433 = vmatpush3.msra.mxu0 %v7462_v14  ;;  %8738 = vst [vmem:[#allocation72_spill] sm:$0xff] %v7486_v26  ;;  %v3170_v51 = vsub.f32 %v7474_v38, %v7486_v26 }
 0x22a   :  { %5480 = vmatprep.subr.mxu1 %v3143_v36  ;;  %5434 = vmatprep.subr.mxu0 %v7470_v21 }
 0x22b   :  { %5481 = vmatpush3.msra.mxu1 %v3143_v36  ;;  %5435 = vmatpush3.msra.mxu0 %v7470_v21  ;;  %v7502_v36 = vand.u32 4294901760, %v7493_v16  ;;  %v3171_v55 = vand.u32 4294901760, %v3170_v51 }
 0x22c   :  { %5482 = vmatprep.subr.mxu1 %v3150_v34  ;;  %5436 = vmatprep.subr.mxu0 %v7482_v57 }
 0x22d   :  { %5483 = vmatpush3.msra.mxu1 %v3150_v34  ;;  %8741 = vst [vmem:[#allocation75_spill] sm:$0xff] %v7502_v36  ;;  %5437 = vmatpush3.msra.mxu0 %v7482_v57  ;;  %v3184_v34 = vsub.f32 %v7493_v16, %v7502_v36 }
 0x22e   :  { %5484 = vmatprep.subr.mxu1 %v3157_v63  ;;  %5518 = vmatprep.subr.mxu0 %v7318_v23 }
 0x22f   :  { %5485 = vmatpush3.msra.mxu1 %v3157_v63  ;;  %v3185_v35 = vand.u32 4294901760, %v3184_v34 }
 0x230   :  { %5486 = vmatprep.subr.mxu1 %v3164_v31 }
 0x231   :  { %5487 = vmatpush3.msra.mxu1 %v3164_v31 }
 0x232   :  { %5488 = vmatprep.subr.mxu1 %v3171_v55 }
 0x233   :  { %5489 = vmatpush3.msra.mxu1 %v3171_v55 }
 0x234   :  { %5490 = vmatprep.subr.mxu1 %v3178_v33 }
 0x235   :  { %5491 = vmatpush3.msra.mxu1 %v3178_v33 }
 0x236   :  { %5492 = vmatprep.subr.mxu1 %v3185_v35 }
 0x237   :  { %5493 = vmatpush3.msra.mxu1 %v3185_v35 }
 0x238   :  { %5574 = vmatprep.subr.mxu1 %v7315_v62 }
 0x253   :  { %v7508_v40 = vpop.f32.mrf.mxu1 }
 0x255   :  { %v7510_v63 = vpop.f32.mrf.mxu1 }
 0x257   :  { %v7512_v24 = vpop.f32.mrf.mxu1 }
 0x259   :  { %v7514_v51 = vpop.f32.mrf.mxu1 }
 0x25c   :  { %v7517_v31 = vpop.f32.mrf.mxu0  ;;  %v7519_v25 = vpop.f32.mrf.mxu1 }
 0x25d   :  { %v1561_v61 = vadd.f32 %v7517_v31, %v7545_v8 }
 0x25e   :  { %v7521_v36 = vpop.f32.mrf.mxu0  ;;  %v7523_v55 = vpop.f32.mrf.mxu1 }
 0x25f   :  { %v1551_v62 = vadd.f32 %v7545_v8, %v7521_v36 }
 0x261   :  { %v1852_v31 = vadd.f32 %v7510_v63, %v1551_v62 }
 0x262   :  { %v7525_v34 = vpop.f32.mrf.mxu0  ;;  %v7527_v46 = vpop.f32.mrf.mxu1 }
 0x264   :  { %v7529_v33 = vpop.f32.mrf.mxu0  ;;  %v7531_v26 = vpop.f32.mrf.mxu1 }
 0x268   :  { %v7533_v35 = vpop.f32.mrf.mxu0  ;;  %v5172_v9 = vpop.f32.mrf.mxu1 }
 0x26a   :  { %v7535_v1 = vpop.f32.mrf.mxu0  ;;  %v7537_v30 = vpop.f32.mrf.mxu1 }
 0x26e   :  { %v7539_v49 = vpop.f32.mrf.mxu0  ;;  %v5175_v27 = vpop.f32.mrf.mxu1 }
 0x26f   :  { %v1621_v62 = vadd.f32 %v7539_v49, %v7545_v8 }
 0x270   :  { %v7541_v42 = vpop.f32.mrf.mxu0  ;;  %v7543_v13 = vpop.f32.mrf.mxu1 }
 0x274   :  { %v5116_v39 = vpop.f32.mrf.mxu0  ;;  %v5178_v44 = vpop.f32.mrf.mxu1 }
 0x275   :  { %v1641_v20 = vadd.f32 %v5116_v39, %v7545_v8 }
 0x276   :  { %v7548_v59 = vpop.f32.mrf.mxu0  ;;  %v1923_v19 = vpop.f32.mrf.mxu1 }
 0x277   :  { %v7550_v16 = vadd.f32 %v5172_v9, %v1641_v20 }
 0x27a   :  { %v5119_v54 = vpop.f32.mrf.mxu0  ;;  %v5181_v48 = vpop.f32.mrf.mxu1 }
 0x27b   :  { %v1661_v38 = vadd.f32 %v5119_v54, %v7545_v8 }
 0x27c   :  { %v7553_v57 = vpop.f32.mrf.mxu0  ;;  %v1935_v11 = vpop.f32.mrf.mxu1 }
 0x27d   :  { %v7555_v21 = vadd.f32 %v5175_v27, %v1661_v38  ;;  %v1651_v49 = vadd.f32 %v7545_v8, %v7553_v57 }
 0x280   :  { %v5122_v58 = vpop.f32.mrf.mxu0 }
 0x281   :  { %v1681_v14 = vadd.f32 %v5122_v58, %v7545_v8  ;;  %v5272_v53 = vpop.f32.mrf.mxu1 }
 0x282   :  { %v1670_v39 = vpop.f32.mrf.mxu0 }
 0x283   :  { %v1671_v15 = vadd.f32 %v7545_v8, %v1670_v39  ;;  %v2239_v5 = vpop.f32.mrf.mxu1  ;;  %v7559_v22 = vadd.f32 %v5178_v44, %v1681_v14 }
 0x285   :  { %v7561_v20 = vadd.f32 %v1923_v19, %v1671_v15 }
 0x286   :  { %v5125_v9 = vpop.f32.mrf.mxu0 }
 0x287   :  { %8742 = vst [vmem:[#allocation76_spill] sm:$0xff] %v7561_v20  ;;  %v1701_v54 = vadd.f32 %v5125_v9, %v7545_v8  ;;  %v7564_v12 = vpop.f32.mrf.mxu1 }
 0x288   :  { %v1690_v37 = vpop.f32.mrf.mxu0 }
 0x289   :  { %v1691_v27 = vadd.f32 %v7545_v8, %v1690_v37  ;;  %v7567_v38 = vpop.f32.mrf.mxu1  ;;  %v7569_v58 = vadd.f32 %v5181_v48, %v1701_v54 }
 0x28b   :  { %8743 = vst [vmem:[#allocation77_spill] sm:$0xff] %v7569_v58  ;;  %v7571_v50 = vadd.f32 %v1935_v11, %v1691_v27 }
 0x28c   :  { %v5216_v39 = vpop.f32.mrf.mxu0  ;;  %v7573_v60 = vpop.f32.mrf.mxu1 }
 0x28d   :  { %8744 = vst [vmem:[#allocation78_spill] sm:$0xff] %v7571_v50 }
 0x28e   :  { %v2045_v44 = vpop.f32.mrf.mxu0  ;;  %v7575_v19 = vpop.f32.mrf.mxu1 }
 0x292   :  { %v5219_v15 = vpop.f32.mrf.mxu0  ;;  %v7577_v14 = vpop.f32.mrf.mxu1 }
 0x294   :  { %v2059_v9 = vpop.f32.mrf.mxu0  ;;  %v7579_v45 = vpop.f32.mrf.mxu1 }
 0x298   :  { %v5222_v28 = vpop.f32.mrf.mxu0  ;;  %v7581_v37 = vpop.f32.mrf.mxu1 }
 0x29a   :  { %v2073_v29 = vpop.f32.mrf.mxu0  ;;  %v7583_v48 = vpop.f32.mrf.mxu1 }
 0x29e   :  { %v5225_v11 = vpop.f32.mrf.mxu0  ;;  %v7585_v54 = vpop.f32.mrf.mxu1 }
 0x29f   :  { %8745 = vst [vmem:[#allocation79_spill] sm:$0xff] %v7585_v54  ;;  %v2046_v54 = vadd.f32 %v2045_v44, %v1852_v31  ;;  %v1611_v44 = vadd.f32 %v7545_v8, %v7541_v42 }
 0x2a0   :  { %v7587_v27 = vpop.f32.mrf.mxu0  ;;  %v7589_v17 = vpop.f32.mrf.mxu1 }
 0x2a1   :  { %8746 = vst [vmem:[#allocation80_spill] sm:$0xff] %v7589_v17 }
 0x2a4   :  { %v7591_v3 = vpop.f32.mrf.mxu0  ;;  %v7593_v0 = vpop.f32.mrf.mxu1 }
 0x2a5   :  { %8747 = vst [vmem:[#allocation81_spill] sm:$0xff] %v7593_v0 }
 0x2a6   :  { %v7595_v47 = vpop.f32.mrf.mxu0  ;;  %v7597_v4 = vpop.f32.mrf.mxu1 }
 0x2a7   :  { %8748 = vst [vmem:[#allocation82_spill] sm:$0xff] %v7597_v4  ;;  %v1581_v4 = vadd.f32 %v7525_v34, %v7545_v8  ;;  %v1601_v34 = vadd.f32 %v7533_v35, %v7545_v8  ;;  %v1631_v35 = vadd.f32 %v7545_v8, %v7548_v59 }
 0x2a9   :  { %v1870_v36 = vadd.f32 %v7512_v24, %v1581_v4  ;;  %v2240_v24 = vadd.f32 %v2239_v5, %v2046_v54  ;;  %v1894_v5 = vadd.f32 %v7527_v46, %v1621_v62  ;;  %v1912_v62 = vadd.f32 %v7543_v13, %v1651_v49 }
 0x2aa   :  { %v7599_v43 = vpop.f32.mrf.mxu0  ;;  %v7601_v23 = vpop.f32.mrf.mxu1 }
 0x2ab   :  { %8749 = vst [vmem:[#allocation83_spill] sm:$0xff] %v7601_v23  ;;  %v1858_v23 = vadd.f32 %v7508_v40, %v1561_v61  ;;  %v2067_v61 = vadd.f32 %v5219_v15, %v1870_v36 }
 0x2ac   :  { %v7603_v41 = vpop.f32.mrf.mxu0  ;;  %v7605_v2 = vpop.f32.mrf.mxu1 }
 0x2ad   :  { %8750 = vst [vmem:[#allocation84_spill] sm:$0xff] %v7605_v2  ;;  %v1571_v2 = vadd.f32 %v7545_v8, %v7529_v33  ;;  %v2053_v6 = vadd.f32 %v5216_v39, %v1858_v23  ;;  %v1591_v23 = vadd.f32 %v7545_v8, %v7535_v1  ;;  %v2264_v15 = vadd.f32 %v7564_v12, %v2067_v61 }
 0x2ae   :  { %v1900_v12 = vadd.f32 %v7537_v30, %v1631_v35 }
 0x2af   :  { %v1864_v40 = vadd.f32 %v7514_v51, %v1571_v2  ;;  %v1882_v2 = vadd.f32 %v7519_v25, %v1601_v34 }
 0x2b0   :  { %v7609_v52 = vpop.f32.mrf.mxu0 }
 0x2b1   :  { %8751 = vst [vmem:[#allocation85_spill] sm:$0xff] %v7609_v52  ;;  %v5384_v50 = vpop.f32.mrf.mxu1  ;;  %v2248_v52 = vadd.f32 %v5272_v53, %v2053_v6  ;;  %v2060_v39 = vadd.f32 %v2059_v9, %v1864_v40  ;;  %v2081_v9 = vadd.f32 %v5222_v28, %v1882_v2  ;;  %v1888_v40 = vadd.f32 %v7531_v26, %v1611_v44 }
 0x2b2   :  { %v7613_v58 = vpop.f32.mrf.mxu0 }
 0x2b3   :  { %8752 = vst [vmem:[#allocation86_spill] sm:$0xff] %v7613_v58  ;;  %v2655_v0 = vpop.f32.mrf.mxu1  ;;  %v2256_v25 = vadd.f32 %v7567_v38, %v2060_v39  ;;  %v2088_v46 = vadd.f32 %v7587_v27, %v1888_v40  ;;  %v8756_v40 = vld [vmem:[#allocation80_spill] sm:$0xff] }
 0x2b5   :  { %v7621_v20 = vpop.f32.mrf.mxu0 }
 0x2b6   :  { %v5387_v17 = vpop.f32.mrf.mxu1 }
 0x2b7   :  { %v7624_v32 = vpop.f32.mrf.mxu0 }
 0x2b8   :  { %v2667_v58 = vpop.f32.mrf.mxu1 }
 0x2ba   :  { %v5328_v63 = vpop.f32.mrf.mxu0  ;;  %v5390_v33 = vpop.f32.mrf.mxu1 }
 0x2bb   :  { %v2485_v4 = vadd.f32 %v5328_v63, %v2248_v52  ;;  %v1876_v52 = vadd.f32 %v7523_v55, %v1591_v23 }
 0x2bc   :  { %v2478_v6 = vpop.f32.mrf.mxu0  ;;  %v2679_v53 = vpop.f32.mrf.mxu1 }
 0x2bd   :  { %v2662_v51 = vadd.f32 %v5384_v50, %v2485_v4  ;;  %v2479_v1 = vadd.f32 %v2478_v6, %v2240_v24  ;;  %v2074_v34 = vadd.f32 %v2073_v29, %v1876_v52  ;;  %v2095_v50 = vadd.f32 %v5225_v11, %v1894_v5 }
 0x2be   :  { %v5331_v42 = vpop.f32.mrf.mxu0  ;;  %v5393_v54 = vpop.f32.mrf.mxu1  ;;  %v2280_v29 = vadd.f32 %v7573_v60, %v2081_v9  ;;  %v2102_v4 = vadd.f32 %v7595_v47, %v1900_v12 }
 0x2bf   :  { %v2750_v31 = vmul.f32 0.01, %v2662_v51  ;;  %v2656_v59 = vadd.f32 %v2655_v0, %v2479_v1  ;;  %v2497_v36 = vadd.f32 %v5331_v42, %v2264_v15  ;;  %v2109_v0 = vadd.f32 %v7591_v3, %v7550_v16 }
 0x2c0   :  { %v2490_v61 = vpop.f32.mrf.mxu0  ;;  %v2691_v8 = vpop.f32.mrf.mxu1  ;;  %v2272_v24 = vadd.f32 %v7575_v19, %v2074_v34  ;;  %v2296_v3 = vadd.f32 %v7577_v14, %v2095_v50  ;;  %v2123_v14 = vadd.f32 %v7599_v43, %v7555_v21 }
 0x2c1   :  { %v2766_v28 = vmax.f32 %v2662_v51, %v2750_v31  ;;  %v2749_v57 = vmul.f32 0.01, %v2656_v59  ;;  %v2674_v55 = vadd.f32 %v5387_v17, %v2497_v36  ;;  %v2491_v23 = vadd.f32 %v2490_v61, %v2256_v25 }
 0x2c2   :  { %v5334_v38 = vpop.f32.mrf.mxu0  ;;  %v5396_v11 = vpop.f32.mrf.mxu1  ;;  %v2312_v47 = vadd.f32 %v7581_v37, %v2109_v0  ;;  %v8753_v37 = vld [vmem:[#allocation85_spill] sm:$0xff] }
 0x2c3   :  { %v2782_v26 = vadd.f32 %v2766_v28, %v6869_v10  ;;  %v2765_v30 = vmax.f32 %v2656_v59, %v2749_v57  ;;  %v2752_v63 = vmul.f32 0.01, %v2674_v55  ;;  %v2668_v39 = vadd.f32 %v2667_v58, %v2491_v23  ;;  %v8757_v57 = vld [vmem:[#allocation76_spill] sm:$0xff] }
 0x2c4   :  { %v2509_v17 = vadd.f32 %v5334_v38, %v2280_v29  ;;  %v2502_v27 = vpop.f32.mrf.mxu0  ;;  %v2703_v44 = vpop.f32.mrf.mxu1  ;;  %v2288_v58 = vadd.f32 %v7579_v45, %v2088_v46  ;;  %v2304_v45 = vadd.f32 %v7583_v48, %v2102_v4  ;;  %v2137_v42 = vadd.f32 %v8753_v37, %v7559_v22  ;;  %v8759_v46 = vld [vmem:[#allocation65_spill] sm:$0xff] }
 0x2c5   :  { %5750 = vtanh.f32 %v2782_v26  ;;  %v2781_v13 = vadd.f32 %v2765_v30, %v6879_v7  ;;  %v2768_v60 = vmax.f32 %v2674_v55, %v2752_v63  ;;  %v2751_v16 = vmul.f32 0.01, %v2668_v39  ;;  %v8758_v55 = vld [vmem:[#allocation86_spill] sm:$0xff]  ;;  %v8760_v29 = vld [vmem:[#allocation81_spill] sm:$0xff] }
 0x2c6   :  { %v2686_v35 = vadd.f32 %v5390_v33, %v2509_v17  ;;  %v2503_v2 = vadd.f32 %v2502_v27, %v2272_v24  ;;  %v5337_v10 = vpop.f32.mrf.mxu0  ;;  %v5399_v6 = vpop.f32.mrf.mxu1  ;;  %v2116_v7 = vadd.f32 %v7603_v41, %v1912_v62  ;;  %v2130_v23 = vadd.f32 %v8758_v55, %v8757_v57  ;;  %v8761_v26 = vld [vmem:[#allocation66_spill] sm:$0xff]  ;;  %v8762_v17 = vld [vmem:[#allocation77_spill] sm:$0xff] }
 0x2c7   :  { %5752 = vtanh.f32 %v2781_v13  ;;  %v2784_v19 = vadd.f32 %v2768_v60, %v6894_v18  ;;  %v2767_v51 = vmax.f32 %v2668_v39, %v2751_v16  ;;  %v2521_v1 = vadd.f32 %v5337_v10, %v2296_v3  ;;  %v8764_v60 = vld [vmem:[#allocation67_spill] sm:$0xff]  ;;  %v8768_v37 = vld [vmem:[#allocation69_spill] sm:$0xff] }
 0x2c8   :  { %v2754_v15 = vmul.f32 0.01, %v2686_v35  ;;  %v2680_v49 = vadd.f32 %v2679_v53, %v2503_v2  ;;  %v2514_v33 = vpop.f32.mrf.mxu0  ;;  %v2715_v59 = vpop.f32.mrf.mxu1  ;;  %v8754_v53 = vld [vmem:[#allocation64_spill] sm:$0xff]  ;;  %v2320_v48 = vadd.f32 %v8756_v40, %v2116_v7  ;;  %v2344_v38 = vadd.f32 %v8760_v29, %v2137_v42 }
 0x2c9   :  { %v2783_v9 = vadd.f32 %v2767_v51, %v6906_v56  ;;  %v2698_v52 = vadd.f32 %v5393_v54, %v2521_v1  ;;  %v2515_v5 = vadd.f32 %v2514_v33, %v2288_v58  ;;  %5754 = vtanh.f32 %v2784_v19  ;;  %v8755_v54 = vld [vmem:[#allocation79_spill] sm:$0xff] }
 0x2ca   :  { %v2770_v18 = vmax.f32 %v2686_v35, %v2754_v15  ;;  %v2753_v31 = vmul.f32 0.01, %v2680_v49  ;;  %v5340_v36 = vpop.f32.mrf.mxu0  ;;  %v2328_v50 = vadd.f32 %v8755_v54, %v2123_v14  ;;  %v2151_v24 = vadd.f32 %v7621_v20, %v8762_v17  ;;  %v8766_v20 = vld [vmem:[#allocation68_spill] sm:$0xff] }
 0x2cb   :  { %5756 = vtanh.f32 %v2783_v9  ;;  %v2756_v43 = vmul.f32 0.01, %v2698_v52  ;;  %v2692_v41 = vadd.f32 %v2691_v8, %v2515_v5  ;;  %v2533_v21 = vadd.f32 %v5340_v36, %v2312_v47  ;;  %v5402_v8 = vpop.f32.mrf.mxu1 }
 0x2cc   :  { %v2786_v25 = vadd.f32 %v2770_v18, %v8754_v53  ;;  %v2769_v34 = vmax.f32 %v2680_v49, %v2753_v31  ;;  %v2526_v56 = vpop.f32.mrf.mxu0  ;;  %v8769_v31 = vld [vmem:[#allocation84_spill] sm:$0xff] }
 0x2cd   :  { %v2772_v12 = vmax.f32 %v2698_v52, %v2756_v43  ;;  %v2755_v61 = vmul.f32 0.01, %v2692_v41  ;;  %v2710_v22 = vadd.f32 %v5396_v11, %v2533_v21  ;;  %v2527_v28 = vadd.f32 %v2526_v56, %v2304_v45  ;;  %v8763_v11 = vld [vmem:[#allocation78_spill] sm:$0xff]  ;;  %v2727_v58 = vpop.f32.mrf.mxu1  ;;  %v8767_v52 = vld [vmem:[#allocation83_spill] sm:$0xff] }
 0x2ce   :  { %5758 = vtanh.f32 %v2786_v25  ;;  %v2785_v0 = vadd.f32 %v2769_v34, %v8759_v46  ;;  %v5343_v62 = vpop.f32.mrf.mxu0  ;;  %v2144_v27 = vadd.f32 %v7624_v32, %v8763_v11  ;;  %v2360_v5 = vadd.f32 %v8767_v52, %v2151_v24  ;;  %v8771_v46 = vld [vmem:[#allocation16_spill] sm:$0xff]  ;;  %v8773_v24 = vld [vmem:[#allocation27_spill] sm:$0xff] }
 0x2cf   :  { %v2788_v30 = vadd.f32 %v2772_v12, %v8761_v26  ;;  %v2771_v63 = vmax.f32 %v2692_v41, %v2755_v61  ;;  %v2758_v39 = vmul.f32 0.01, %v2710_v22  ;;  %v2704_v4 = vadd.f32 %v2703_v44, %v2527_v28  ;;  %v8765_v44 = vld [vmem:[#allocation82_spill] sm:$0xff]  ;;  %v5405_v41 = vpop.f32.mrf.mxu1 }
 0x2d0   :  { %5760 = vtanh.f32 %v2785_v0  ;;  %v2545_v3 = vadd.f32 %v5343_v62, %v2328_v50  ;;  %v2538_v13 = vpop.f32.mrf.mxu0  ;;  %v2336_v1 = vadd.f32 %v8765_v44, %v2130_v23  ;;  %v2352_v36 = vadd.f32 %v8769_v31, %v2144_v27  ;;  %v8772_v62 = vld [vmem:[#allocation29_spill] sm:$0xff]  ;;  %v8776_v44 = vld [vmem:[#allocation18_spill] sm:$0xff] }
 0x2d1   :  { %5762 = vtanh.f32 %v2788_v30  ;;  %v2787_v16 = vadd.f32 %v2771_v63, %v8764_v60  ;;  %v2774_v35 = vmax.f32 %v2710_v22, %v2758_v39  ;;  %v2757_v2 = vmul.f32 0.01, %v2704_v4  ;;  %v8770_v22 = vld [vmem:[#allocation70_spill] sm:$0xff] }
 0x2d2   :  { %v5751_v10 = vpop.eup %5750  ;;  %v2722_v47 = vadd.f32 %v5399_v6, %v2545_v3  ;;  %v2539_v19 = vadd.f32 %v2538_v13, %v2320_v48  ;;  %v5346_v51 = vpop.f32.mrf.mxu0  ;;  %v8774_v13 = vld [vmem:[#allocation26_spill] sm:$0xff] }
 0x2d3   :  { %5764 = vtanh.f32 %v2787_v16  ;;  %v2790_v14 = vadd.f32 %v2774_v35, %v8766_v20  ;;  %v2773_v7 = vmax.f32 %v2704_v4, %v2757_v2  ;;  %v2557_v32 = vadd.f32 %v5346_v51, %v2344_v38  ;;  %v8775_v35 = vld [vmem:[#allocation23_spill] sm:$0xff] }
 0x2d4   :  { %v5753_v15 = vpop.eup %5752  ;;  %v2760_v49 = vmul.f32 0.01, %v2722_v47  ;;  %v2716_v33 = vadd.f32 %v2715_v59, %v2539_v19  ;;  %v2550_v9 = vpop.f32.mrf.mxu0  ;;  %v7682_v45 = vand.u32 4294901760, %v5751_v10 }
 0x2d5   :  { %v2789_v42 = vadd.f32 %v2773_v7, %v8768_v37  ;;  %v2734_v6 = vadd.f32 %v5402_v8, %v2557_v32  ;;  %v2551_v18 = vadd.f32 %v2550_v9, %v2336_v1  ;;  %5766 = vtanh.f32 %v2790_v14  ;;  %v2739_v8 = vpop.f32.mrf.mxu1  ;;  %v8777_v7 = vld [vmem:[#allocation39_spill] sm:$0xff] }
 0x2d6   :  { %v2776_v43 = vmax.f32 %v2722_v47, %v2760_v49  ;;  %v2759_v21 = vmul.f32 0.01, %v2716_v33  ;;  %v5349_v53 = vpop.f32.mrf.mxu0  ;;  %v7686_v25 = vand.u32 4294901760, %v5753_v15  ;;  %v5755_v34 = vpop.eup %5754  ;;  %v7693_v61 = vsub.f32 %v5751_v10, %v7682_v45 }
 0x2d7   :  { %5768 = vtanh.f32 %v2789_v42  ;;  %v2762_v59 = vmul.f32 0.01, %v2734_v6  ;;  %v2728_v56 = vadd.f32 %v2727_v58, %v2551_v18  ;;  %v2569_v54 = vadd.f32 %v5349_v53, %v2360_v5  ;;  %v8778_v42 = vld [vmem:[#allocation21_spill] sm:$0xff] }
 0x2d8   :  { %v5757_v50 = vpop.eup %5756  ;;  %v2775_v40 = vmax.f32 %v2716_v33, %v2759_v21  ;;  %5494 = vmatprep.mubr.f32.mxu1 %v7686_v25  ;;  %v2562_v48 = vpop.f32.mrf.mxu0  ;;  %v7690_v12 = vsub.f32 %v5753_v15, %v7686_v25  ;;  %v2792_v28 = vadd.f32 %v2776_v43, %v8770_v22  ;;  %v7703_v38 = vand.u32 4294901760, %v5755_v34  ;;  %v8780_v21 = vld [vmem:[#allocation28_spill] sm:$0xff] }
 0x2d9   :  { %v2761_v57 = vmul.f32 0.01, %v2728_v56  ;;  %v7696_v55 = vadd.f32 %v5405_v41, %v2569_v54  ;;  %v2563_v23 = vadd.f32 %v2562_v48, %v2352_v36  ;;  %5495 = vmatmul.mubr.f32.vlgmr.msra.gmra.mxu1 %v7682_v45  ;;  %v7701_v29 = vand.u32 4294901760, %v5757_v50  ;;  %v8779_v41 = vld [vmem:[#allocation35_spill] sm:$0xff] }
 0x2da   :  { %v2791_v0 = vadd.f32 %v2775_v40, %v8771_v46  ;;  %5575 = vmatpush3.msra.mxu1 %v8772_v62  ;;  %v2917_v26 = vand.u32 4294901760, %v7690_v12  ;;  %v2778_v63 = vmax.f32 %v2734_v6, %v2762_v59  ;;  %v2927_v27 = vand.u32 4294901760, %v7693_v61 }
 0x2db   :  { %v5759_v30 = vpop.eup %5758  ;;  %v2777_v39 = vmax.f32 %v2728_v56, %v2761_v57  ;;  %v2764_v4 = vmul.f32 0.01, %v7696_v55  ;;  %v2740_v17 = vadd.f32 %v2739_v8, %v2563_v23  ;;  %5576 = vmatprep.subr.mxu1 %v8773_v24  ;;  %5497 = vmatprep.mubr.f32.mxu1 %v7701_v29  ;;  %v7726_v51 = vsub.f32 %v5757_v50, %v7701_v29  ;;  %v8781_v56 = vld [vmem:[#allocation24_spill] sm:$0xff] }
 0x2dc   :  { %5770 = vtanh.f32 %v2791_v0  ;;  %5577 = vmatpush3.msra.mxu1 %v8773_v24  ;;  %v2918_v11 = vsub.f32 %v7690_v12, %v2917_v26  ;;  %v7717_v2 = vand.u32 4294901760, %v5759_v30  ;;  %v2928_v19 = vsub.f32 %v7693_v61, %v2927_v27  ;;  %v8782_v50 = vld [vmem:[#allocation32_spill] sm:$0xff] }
 0x2dd   :  { %v5761_v3 = vpop.eup %5760  ;;  %5772 = vtanh.f32 %v2792_v28  ;;  %v2793_v60 = vadd.f32 %v2777_v39, %v8774_v13  ;;  %v2763_v16 = vmul.f32 0.01, %v2740_v17  ;;  %5498 = vmatmul.mubr.f32.gmra.mxu1 %v7703_v38  ;;  %5578 = vmatprep.subr.mxu1 %v8775_v35  ;;  %v2794_v1 = vadd.f32 %v2778_v63, %v8776_v44  ;;  %v8783_v28 = vld [vmem:[#allocation47_spill] sm:$0xff]  ;;  %v8784_v39 = vld [vmem:[#allocation30_spill] sm:$0xff] }
 0x2de   :  { %v5763_v10 = vpop.eup %5762  ;;  %5579 = vmatpush3.msra.mxu1 %v8775_v35  ;;  %v2919_v58 = vand.u32 4294901760, %v2918_v11  ;;  %v7720_v47 = vand.u32 4294901760, %v5761_v3  ;;  %v2780_v20 = vmax.f32 %v7696_v55, %v2764_v4  ;;  %v7732_v32 = vsub.f32 %v5755_v34, %v7703_v38 }
 0x2df   :  { %v2779_v14 = vmax.f32 %v2740_v17, %v2763_v16  ;;  %5580 = vmatprep.subr.mxu1 %v8777_v7  ;;  %5774 = vtanh.f32 %v2793_v60  ;;  %v2929_v49 = vand.u32 4294901760, %v2928_v19  ;;  %v2937_v33 = vand.u32 4294901760, %v7726_v51  ;;  %v8785_v17 = vld [vmem:[#allocation45_spill] sm:$0xff]  ;;  %v8786_v60 = vld [vmem:[#allocation42_spill] sm:$0xff] }
 0x2e0   :  { %v5765_v15 = vpop.eup %5764  ;;  %5438 = vmatprep.mubr.f32.mxu0 %v2919_v58  ;;  %5500 = vmatprep.mubr.f32.mxu1 %v7720_v47  ;;  %v7737_v9 = vsub.f32 %v5761_v3, %v7720_v47  ;;  %v2947_v5 = vand.u32 4294901760, %v7732_v32  ;;  %v7743_v37 = vand.u32 4294901760, %v5763_v10  ;;  %v7752_v36 = vsub.f32 %v5759_v30, %v7717_v2 }
 0x2e1   :  { %5581 = vmatpush3.msra.mxu1 %v8777_v7  ;;  %v7740_v52 = vand.u32 4294901760, %v5765_v15  ;;  %v2795_v6 = vadd.f32 %v2779_v14, %v8778_v42  ;;  %5439 = vmatmul.mubr.f32.vlgmr.msra.gmra.mxu0 %v2929_v49  ;;  %v2938_v18 = vsub.f32 %v7726_v51, %v2937_v33  ;;  %5776 = vtanh.f32 %v2794_v1  ;;  %v8788_v42 = vld [vmem:[#allocation38_spill] sm:$0xff] }
 0x2e2   :  { %5501 = vmatmul.mubr.f32.gmra.mxu1 %v7717_v2  ;;  %v2957_v31 = vand.u32 4294901760, %v7737_v9  ;;  %v5767_v43 = vpop.eup %5766  ;;  %5582 = vmatprep.subr.mxu1 %v8779_v41  ;;  %v2948_v53 = vsub.f32 %v7732_v32, %v2947_v5  ;;  %v2796_v54 = vadd.f32 %v2780_v20, %v8781_v56  ;;  %v2967_v22 = vand.u32 4294901760, %v7752_v36  ;;  %v8791_v56 = vld [vmem:[#allocation59_spill] sm:$0xff] }
 0x2e3   :  { %5519 = vmatpush3.msra.mxu0 %v8780_v21  ;;  %v7760_v34 = vsub.f32 %v5765_v15, %v7740_v52  ;;  %5583 = vmatpush3.msra.mxu1 %v8779_v41  ;;  %v2939_v40 = vand.u32 4294901760, %v2938_v18  ;;  %v7775_v46 = vsub.f32 %v5763_v10, %v7743_v37  ;;  %5778 = vtanh.f32 %v2795_v6  ;;  %v8787_v10 = vld [vmem:[#allocation57_spill] sm:$0xff] }
 0x2e4   :  { %v5769_v59 = vpop.eup %5768  ;;  %5520 = vmatprep.subr.mxu0 %v8782_v50  ;;  %v2958_v48 = vsub.f32 %v7737_v9, %v2957_v31  ;;  %5584 = vmatprep.subr.mxu1 %v8783_v28  ;;  %v2949_v57 = vand.u32 4294901760, %v2948_v53  ;;  %v2968_v8 = vsub.f32 %v7752_v36, %v2967_v22  ;;  %v7782_v30 = vand.u32 4294901760, %v5767_v43  ;;  %v8789_v6 = vld [vmem:[#allocation53_spill] sm:$0xff]  ;;  %v8790_v53 = vld [vmem:[#allocation51_spill] sm:$0xff] }
 0x2e5   :  { %5503 = vmatprep.mubr.f32.mxu1 %v7740_v52  ;;  %v7771_v55 = vand.u32 4294901760, %v5769_v59  ;;  %v2977_v23 = vand.u32 4294901760, %v7760_v34  ;;  %5441 = vmatprep.mubr.f32.mxu0 %v2939_v40  ;;  %5780 = vtanh.f32 %v2796_v54  ;;  %v2987_v3 = vand.u32 4294901760, %v7775_v46 }
 0x2e6   :  { %5521 = vmatpush3.msra.mxu0 %v8782_v50  ;;  %5585 = vmatpush3.msra.mxu1 %v8783_v28  ;;  %v2959_v0 = vand.u32 4294901760, %v2958_v48  ;;  %v2969_v58 = vand.u32 4294901760, %v2968_v8  ;;  %v7802_v44 = vsub.f32 %v5767_v43, %v7782_v30 }
 0x2e7   :  { %5442 = vmatmul.mubr.f32.gmra.mxu0 %v2949_v57  ;;  %v7785_v63 = vsub.f32 %v5769_v59, %v7771_v55  ;;  %5504 = vmatmul.mubr.f32.gmra.mxu1 %v7743_v37  ;;  %v2978_v11 = vsub.f32 %v7760_v34, %v2977_v23  ;;  %v2988_v14 = vsub.f32 %v7775_v46, %v2987_v3 }
 0x2e8   :  { %5522 = vmatprep.subr.mxu0 %v8784_v39  ;;  %5586 = vmatprep.subr.mxu1 %v8785_v17  ;;  %v8500_v43 = vand.u32 4294901760, %v7802_v44 }
 0x2e9   :  { %v5771_v4 = vpop.eup %5770  ;;  %5523 = vmatpush3.msra.mxu0 %v8784_v39  ;;  %5587 = vmatpush3.msra.mxu1 %v8785_v17  ;;  %v8503_v19 = vand.u32 4294901760, %v7785_v63  ;;  %v2979_v20 = vand.u32 4294901760, %v2978_v11  ;;  %v2989_v54 = vand.u32 4294901760, %v2988_v14  ;;  %v8792_v39 = vld [vmem:[#allocation46_spill] sm:$0xff]  ;;  %v8793_v11 = vld [vmem:[#allocation19_spill] sm:$0xff] }
 0x2ea   :  { %v5773_v13 = vpop.eup %5772  ;;  %5524 = vmatprep.subr.mxu0 %v8786_v60  ;;  %v7797_v16 = vand.u32 4294901760, %v5771_v4  ;;  %5588 = vmatprep.subr.mxu1 %v8787_v10 }
 0x2eb   :  { %5444 = vmatprep.mubr.f32.mxu0 %v2959_v0  ;;  %5506 = vmatprep.mubr.f32.mxu1 %v7771_v55  ;;  %v7810_v15 = vand.u32 4294901760, %v5773_v13  ;;  %v2998_v18 = vsub.f32 %v7785_v63, %v8503_v19  ;;  %v3008_v0 = vsub.f32 %v7802_v44, %v8500_v43  ;;  %v8803_v19 = vld [vmem:[#allocation71_spill] sm:$0xff] }
 0x2ec   :  { %5525 = vmatpush3.msra.mxu0 %v8786_v60  ;;  %v5775_v1 = vpop.eup %5774  ;;  %5589 = vmatpush3.msra.mxu1 %v8787_v10  ;;  %v7813_v49 = vsub.f32 %v5771_v4, %v7797_v16 }
 0x2ed   :  { %5445 = vmatmul.mubr.f32.gmra.mxu0 %v2969_v58  ;;  %5507 = vmatmul.mubr.f32.gmra.mxu1 %v7782_v30  ;;  %v7825_v59 = vand.u32 4294901760, %v5775_v1  ;;  %v7830_v40 = vsub.f32 %v5773_v13, %v7810_v15  ;;  %v2999_v57 = vand.u32 4294901760, %v2998_v18 }
 0x2ee   :  { %5526 = vmatprep.subr.mxu0 %v8788_v42  ;;  %5590 = vmatprep.subr.mxu1 %v8789_v6  ;;  %v5777_v21 = vpop.eup %5776  ;;  %v8498_v50 = vand.u32 4294901760, %v7813_v49 }
 0x2ef   :  { %5527 = vmatpush3.msra.mxu0 %v8788_v42  ;;  %5591 = vmatpush3.msra.mxu1 %v8789_v6  ;;  %v7838_v8 = vand.u32 4294901760, %v5777_v21  ;;  %v7843_v4 = vsub.f32 %v5775_v1, %v7825_v59  ;;  %v8499_v60 = vand.u32 4294901760, %v7830_v40  ;;  %v8795_v42 = vld [vmem:[#allocation34_spill] sm:$0xff]  ;;  %v3009_v1 = vand.u32 4294901760, %v3008_v0  ;;  %v8797_v0 = vld [vmem:[#allocation43_spill] sm:$0xff] }
 0x2f0   :  { %5528 = vmatprep.subr.mxu0 %v8790_v53  ;;  %5592 = vmatprep.subr.mxu1 %v8791_v56  ;;  %v5779_v48 = vpop.eup %5778  ;;  %v3018_v13 = vsub.f32 %v7813_v49, %v8498_v50 }
 0x2f1   :  { %5447 = vmatprep.mubr.f32.mxu0 %v2979_v20  ;;  %5509 = vmatprep.mubr.f32.mxu1 %v7797_v16  ;;  %v8794_v20 = vld [vmem:[#allocation60_spill] sm:$0xff]  ;;  %v7853_v14 = vand.u32 4294901760, %v5779_v48  ;;  %v7857_v18 = vsub.f32 %v5777_v21, %v7838_v8  ;;  %v8796_v21 = vld [vmem:[#allocation62_spill] sm:$0xff] }
 0x2f2   :  { %5529 = vmatpush3.msra.mxu0 %v8790_v53  ;;  %5593 = vmatpush3.msra.mxu1 %v8791_v56  ;;  %v5781_v58 = vpop.eup %5780  ;;  %v8501_v53 = vand.u32 4294901760, %v7843_v4 }
 0x2f3   :  { %5448 = vmatmul.mubr.f32.gmra.mxu0 %v2989_v54  ;;  %5510 = vmatmul.mubr.f32.gmra.mxu1 %v7810_v15  ;;  %v3019_v54 = vand.u32 4294901760, %v3018_v13  ;;  %v7866_v50 = vand.u32 4294901760, %v5781_v58  ;;  %v8798_v13 = vld [vmem:[#allocation17_spill] sm:$0xff] }
 0x2f4   :  { %5530 = vmatprep.subr.mxu0 %v8792_v39  ;;  %5594 = vmatprep.subr.mxu1 %v8793_v11 }
 0x2f5   :  { %5531 = vmatpush3.msra.mxu0 %v8792_v39  ;;  %5595 = vmatpush3.msra.mxu1 %v8793_v11  ;;  %v3028_v39 = vsub.f32 %v7830_v40, %v8499_v60  ;;  %v8799_v60 = vld [vmem:[#allocation52_spill] sm:$0xff] }
 0x2f6   :  { %5532 = vmatprep.subr.mxu0 %v8794_v20  ;;  %5596 = vmatprep.subr.mxu1 %v8795_v42 }
 0x2f7   :  { %5450 = vmatprep.mubr.f32.mxu0 %v2999_v57  ;;  %5512 = vmatprep.mubr.f32.mxu1 %v7825_v59  ;;  %v7871_v57 = vsub.f32 %v5779_v48, %v7853_v14  ;;  %v3029_v43 = vand.u32 4294901760, %v3028_v39  ;;  %v7883_v48 = vsub.f32 %v5781_v58, %v7866_v50  ;;  %v8801_v58 = vld [vmem:[#allocation58_spill] sm:$0xff] }
 0x2f8   :  { %5533 = vmatpush3.msra.mxu0 %v8794_v20  ;;  %5597 = vmatpush3.msra.mxu1 %v8795_v42  ;;  %v8502_v20 = vand.u32 4294901760, %v7857_v18 }
 0x2f9   :  { %5451 = vmatmul.mubr.f32.gmra.mxu0 %v3009_v1  ;;  %5513 = vmatmul.mubr.f32.gmra.mxu1 %v7838_v8  ;;  %v3038_v1 = vsub.f32 %v7843_v4, %v8501_v53 }
 0x2fa   :  { %5534 = vmatprep.subr.mxu0 %v8796_v21  ;;  %5598 = vmatprep.subr.mxu1 %v8797_v0  ;;  %v3048_v53 = vsub.f32 %v7857_v18, %v8502_v20  ;;  %v8802_v20 = vld [vmem:[#allocation40_spill] sm:$0xff] }
 0x2fb   :  { %5535 = vmatpush3.msra.mxu0 %v8796_v21  ;;  %5599 = vmatpush3.msra.mxu1 %v8797_v0  ;;  %v8504_v21 = vand.u32 4294901760, %v7871_v57  ;;  %v3039_v39 = vand.u32 4294901760, %v3038_v1 }
 0x2fc   :  { %5536 = vmatprep.subr.mxu0 %v8798_v13  ;;  %5600 = vmatprep.subr.mxu1 %v8799_v60  ;;  %v3049_v1 = vand.u32 4294901760, %v3048_v53  ;;  %v8805_v53 = vld [vmem:[#allocation61_spill] sm:$0xff] }
 0x2fd   :  { %5453 = vmatprep.mubr.f32.mxu0 %v3019_v54  ;;  %5515 = vmatprep.mubr.f32.mxu1 %v7853_v14  ;;  %v8800_v54 = vld [vmem:[#allocation33_spill] sm:$0xff] }
 0x2fe   :  { %5537 = vmatpush3.msra.mxu0 %v8798_v13  ;;  %5601 = vmatpush3.msra.mxu1 %v8799_v60  ;;  %v3067_v13 = vand.u32 4294901760, %v7883_v48 }
 0x2ff   :  { %5454 = vmatmul.mubr.f32.gmra.mxu0 %v3029_v43  ;;  %5516 = vmatmul.mubr.f32.gmra.mxu1 %v7866_v50  ;;  %v3058_v43 = vsub.f32 %v7871_v57, %v8504_v21 }
 0x300   :  { %5538 = vmatprep.subr.mxu0 %v8800_v54  ;;  %5602 = vmatprep.subr.mxu1 %v8801_v58 }
 0x301   :  { %5539 = vmatpush3.msra.mxu0 %v8800_v54  ;;  %5603 = vmatpush3.msra.mxu1 %v8801_v58  ;;  %v3068_v54 = vsub.f32 %v7883_v48, %v3067_v13  ;;  %v3059_v21 = vand.u32 4294901760, %v3058_v43 }
 0x302   :  { %5606 = vmatprep.mubr.f32.mxu1 %v2917_v26  ;;  %5540 = vmatprep.subr.mxu0 %v8802_v20  ;;  %v8804_v26 = vld [vmem:[#allocation49_spill] sm:$0xff] }
 0x303   :  { %5604 = vmatprep.subr.mxu1 %v8803_v19  ;;  %5456 = vmatprep.mubr.f32.mxu0 %v3039_v39 }
 0x304   :  { %5541 = vmatpush3.msra.mxu0 %v8802_v20  ;;  %5605 = vmatpush3.msra.mxu1 %v8803_v19  ;;  %v3069_v20 = vand.u32 4294901760, %v3068_v54 }
 0x305   :  { %5457 = vmatmul.mubr.f32.gmra.mxu0 %v3049_v1  ;;  %5542 = vmatprep.subr.mxu0 %v8804_v26 }
 0x306   :  { %5607 = vmatmul.mubr.f32.vlgmr.msra.gmra.mxu1 %v2927_v27  ;;  %5686 = vmatprep.subr.mxu1 %v8772_v62  ;;  %v8806_v27 = vld [vmem:[#allocation63_spill] sm:$0xff] }
 0x307   :  { %5543 = vmatpush3.msra.mxu0 %v8804_v26  ;;  %5609 = vmatprep.mubr.f32.mxu1 %v2937_v33  ;;  %v8815_v33 = vand.u32 4294901760, %v7813_v49 }
 0x308   :  { %5687 = vmatpush3.msra.mxu1 %v8772_v62  ;;  %5544 = vmatprep.subr.mxu0 %v8805_v53  ;;  %v8807_v62 = vld [vmem:[#allocation74_spill] sm:$0xff] }
 0x309   :  { %5688 = vmatprep.subr.mxu1 %v8773_v24  ;;  %5459 = vmatprep.mubr.f32.mxu0 %v3059_v21 }
 0x30a   :  { %5545 = vmatpush3.msra.mxu0 %v8805_v53  ;;  %5689 = vmatpush3.msra.mxu1 %v8773_v24  ;;  %v8808_v24 = vld [vmem:[#allocation20_spill] sm:$0xff] }
 0x30b   :  { %5460 = vmatmul.mubr.f32.gmra.mxu0 %v3069_v20  ;;  %5546 = vmatprep.subr.mxu0 %v8806_v27 }
 0x30c   :  { %5610 = vmatmul.mubr.f32.gmra.mxu1 %v2947_v5  ;;  %5690 = vmatprep.subr.mxu1 %v8775_v35  ;;  %v8817_v5 = vand.u32 4294901760, %v7830_v40 }
 0x30d   :  { %5547 = vmatpush3.msra.mxu0 %v8806_v27  ;;  %5550 = vmatprep.mubr.f32.mxu0 %v7690_v12  ;;  %v8809_v12 = vld [vmem:[#allocation36_spill] sm:$0xff] }
 0x30e   :  { %5612 = vmatprep.mubr.f32.mxu1 %v2957_v31  ;;  %5691 = vmatpush3.msra.mxu1 %v8775_v35  ;;  %v8811_v35 = vand.u32 4294901760, %v7785_v63  ;;  %v8818_v31 = vld [vmem:[#allocation50_spill] sm:$0xff] }
 0x30f   :  { %5548 = vmatprep.subr.mxu0 %v8807_v62  ;;  %5692 = vmatprep.subr.mxu1 %v8777_v7 }
 0x310   :  { %5549 = vmatpush3.msra.mxu0 %v8807_v62  ;;  %5693 = vmatpush3.msra.mxu1 %v8777_v7  ;;  %v8813_v7 = vand.u32 4294901760, %v7802_v44 }
 0x311   :  { %5551 = vmatmul.mubr.f32.vlgmr.msra.gmra.mxu0 %v7693_v61  ;;  %5613 = vmatmul.mubr.f32.gmra.mxu1 %v2967_v22  ;;  %v8810_v61 = vld [vmem:[#allocation31_spill] sm:$0xff]  ;;  %v8822_v22 = vld [vmem:[#allocation22_spill] sm:$0xff] }
 0x312   :  { %5630 = vmatprep.subr.mxu0 %v8808_v24  ;;  %5694 = vmatprep.subr.mxu1 %v8779_v41 }
 0x313   :  { %5553 = vmatprep.mubr.f32.mxu0 %v7726_v51  ;;  %5615 = vmatprep.mubr.f32.mxu1 %v2977_v23  ;;  %v8812_v51 = vld [vmem:[#allocation44_spill] sm:$0xff]  ;;  %v8824_v23 = vld [vmem:[#allocation25_spill] sm:$0xff] }
 0x314   :  { %5631 = vmatpush3.msra.mxu0 %v8808_v24  ;;  %5695 = vmatpush3.msra.mxu1 %v8779_v41  ;;  %v8820_v41 = vld [vmem:[#allocation56_spill] sm:$0xff] }
 0x315   :  { %5632 = vmatprep.subr.mxu0 %v8809_v12  ;;  %5696 = vmatprep.subr.mxu1 %v8783_v28 }
 0x316   :  { %5633 = vmatpush3.msra.mxu0 %v8809_v12  ;;  %5697 = vmatpush3.msra.mxu1 %v8783_v28  ;;  %v8823_v28 = vand.u32 4294901760, %v7871_v57 }
 0x317   :  { %5554 = vmatmul.mubr.f32.gmra.mxu0 %v7732_v32  ;;  %5616 = vmatmul.mubr.f32.gmra.mxu1 %v2987_v3  ;;  %v8814_v32 = vld [vmem:[#allocation41_spill] sm:$0xff]  ;;  %v8828_v3 = vld [vmem:[#allocation72_spill] sm:$0xff] }
 0x318   :  { %5634 = vmatprep.subr.mxu0 %v8810_v61  ;;  %5698 = vmatprep.subr.mxu1 %v8785_v17 }
 0x319   :  { %5556 = vmatprep.mubr.f32.mxu0 %v7737_v9  ;;  %5618 = vmatprep.mubr.f32.mxu1 %v8811_v35  ;;  %v8816_v9 = vld [vmem:[#allocation54_spill] sm:$0xff] }
 0x31a   :  { %5635 = vmatpush3.msra.mxu0 %v8810_v61  ;;  %5699 = vmatpush3.msra.mxu1 %v8785_v17  ;;  %v8827_v17 = vld [vmem:[#allocation55_spill] sm:$0xff] }
 0x31b   :  { %5636 = vmatprep.subr.mxu0 %v8812_v51  ;;  %5700 = vmatprep.subr.mxu1 %v8787_v10 }
 0x31c   :  { %5637 = vmatpush3.msra.mxu0 %v8812_v51  ;;  %5701 = vmatpush3.msra.mxu1 %v8787_v10  ;;  %v8829_v10 = vld [vmem:[#allocation73_spill] sm:$0xff] }
 0x31d   :  { %5557 = vmatmul.mubr.f32.gmra.mxu0 %v7752_v36  ;;  %5619 = vmatmul.mubr.f32.gmra.mxu1 %v8813_v7  ;;  %v8819_v36 = vand.u32 4294901760, %v7843_v4 }
 0x31e   :  { %5638 = vmatprep.subr.mxu0 %v8814_v32  ;;  %5702 = vmatprep.subr.mxu1 %v8789_v6 }
 0x31f   :  { %5559 = vmatprep.mubr.f32.mxu0 %v7760_v34  ;;  %5621 = vmatprep.mubr.f32.mxu1 %v8815_v33  ;;  %v8821_v34 = vand.u32 4294901760, %v7857_v18 }
 0x320   :  { %5639 = vmatpush3.msra.mxu0 %v8814_v32  ;;  %5703 = vmatpush3.msra.mxu1 %v8789_v6 }
 0x321   :  { %5640 = vmatprep.subr.mxu0 %v8816_v9  ;;  %5704 = vmatprep.subr.mxu1 %v8791_v56 }
 0x322   :  { %5641 = vmatpush3.msra.mxu0 %v8816_v9  ;;  %5705 = vmatpush3.msra.mxu1 %v8791_v56 }
 0x323   :  { %5560 = vmatmul.mubr.f32.gmra.mxu0 %v7775_v46  ;;  %5622 = vmatmul.mubr.f32.gmra.mxu1 %v8817_v5  ;;  %v8825_v46 = vld [vmem:[#allocation37_spill] sm:$0xff] }
 0x324   :  { %5642 = vmatprep.subr.mxu0 %v8818_v31  ;;  %5706 = vmatprep.subr.mxu1 %v8793_v11 }
 0x325   :  { %5562 = vmatprep.mubr.f32.mxu0 %v7785_v63  ;;  %5624 = vmatprep.mubr.f32.mxu1 %v8819_v36  ;;  %v8826_v63 = vld [vmem:[#allocation48_spill] sm:$0xff] }
 0x326   :  { %5643 = vmatpush3.msra.mxu0 %v8818_v31  ;;  %5707 = vmatpush3.msra.mxu1 %v8793_v11 }
 0x327   :  { %5644 = vmatprep.subr.mxu0 %v8820_v41  ;;  %5708 = vmatprep.subr.mxu1 %v8795_v42 }
 0x328   :  { %5645 = vmatpush3.msra.mxu0 %v8820_v41  ;;  %5709 = vmatpush3.msra.mxu1 %v8795_v42 }
 0x329   :  { %5563 = vmatmul.mubr.f32.gmra.mxu0 %v7802_v44  ;;  %5625 = vmatmul.mubr.f32.gmra.mxu1 %v8821_v34 }
 0x32a   :  { %5646 = vmatprep.subr.mxu0 %v8822_v22  ;;  %5710 = vmatprep.subr.mxu1 %v8797_v0 }
 0x32b   :  { %5565 = vmatprep.mubr.f32.mxu0 %v7813_v49  ;;  %5627 = vmatprep.mubr.f32.mxu1 %v8823_v28 }
 0x32c   :  { %5647 = vmatpush3.msra.mxu0 %v8822_v22  ;;  %5711 = vmatpush3.msra.mxu1 %v8797_v0 }
 0x32d   :  { %5648 = vmatprep.subr.mxu0 %v8824_v23  ;;  %5712 = vmatprep.subr.mxu1 %v8799_v60 }
 0x32e   :  { %5649 = vmatpush3.msra.mxu0 %v8824_v23  ;;  %5713 = vmatpush3.msra.mxu1 %v8799_v60 }
 0x32f   :  { %5566 = vmatmul.mubr.f32.gmra.mxu0 %v7830_v40  ;;  %5628 = vmatmul.mubr.f32.gmra.mxu1 %v3067_v13 }
 0x330   :  { %5650 = vmatprep.subr.mxu0 %v8825_v46  ;;  %5714 = vmatprep.subr.mxu1 %v8801_v58 }
 0x331   :  { %5568 = vmatprep.mubr.f32.mxu0 %v7843_v4  ;;  %5651 = vmatpush3.msra.mxu0 %v8825_v46  ;;  %v8150_v46 = vld [vmem:[#allocation5 + $0x2] ss:$0 sm:$0xff] }
 0x332   :  { %5715 = vmatpush3.msra.mxu1 %v8801_v58  ;;  %5718 = vmatprep.mubr.f32.mxu1 %v7686_v25 }
 0x333   :  { %5652 = vmatprep.subr.mxu0 %v8826_v63  ;;  %5716 = vmatprep.subr.mxu1 %v8803_v19 }
 0x334   :  { %5653 = vmatpush3.msra.mxu0 %v8826_v63  ;;  %5717 = vmatpush3.msra.mxu1 %v8803_v19  ;;  %v8830_v19 = vld [vmem:[#allocation75_spill] sm:$0xff] }
 0x335   :  { %5569 = vmatmul.mubr.f32.gmra.mxu0 %v7857_v18  ;;  %5654 = vmatprep.subr.mxu0 %v8827_v17 }
 0x336   :  { %5719 = vmatmul.mubr.f32.vlgmr.msra.gmra.mxu1 %v7682_v45  ;;  %5571 = vmatprep.mubr.f32.mxu0 %v7871_v57 }
 0x337   :  { %5655 = vmatpush3.msra.mxu0 %v8827_v17  ;;  %5721 = vmatprep.mubr.f32.mxu1 %v7701_v29 }
 0x338   :  { %5656 = vmatprep.subr.mxu0 %v8828_v3 }
 0x339   :  { %5657 = vmatpush3.msra.mxu0 %v8828_v3 }
 0x33a   :  { %5572 = vmatmul.mubr.f32.gmra.mxu0 %v7883_v48  ;;  %5658 = vmatprep.subr.mxu0 %v8829_v10 }
 0x33b   :  { %5722 = vmatmul.mubr.f32.gmra.mxu1 %v7703_v38  ;;  %5659 = vmatpush3.msra.mxu0 %v8829_v10 }
 0x33c   :  { %5662 = vmatprep.mubr.f32.mxu0 %v7686_v25  ;;  %5724 = vmatprep.mubr.f32.mxu1 %v7720_v47 }
 0x33d   :  { %5660 = vmatprep.subr.mxu0 %v8830_v19 }
 0x33e   :  { %5661 = vmatpush3.msra.mxu0 %v8830_v19 }
 0x33f   :  { %5663 = vmatmul.mubr.f32.vlgmr.msra.gmra.mxu0 %v7682_v45  ;;  %5725 = vmatmul.mubr.f32.gmra.mxu1 %v7717_v2 }
 0x340   :  { %5665 = vmatprep.mubr.f32.mxu0 %v7701_v29  ;;  %5727 = vmatprep.mubr.f32.mxu1 %v7740_v52 }
 0x343   :  { %5666 = vmatmul.mubr.f32.gmra.mxu0 %v7703_v38  ;;  %5728 = vmatmul.mubr.f32.gmra.mxu1 %v7743_v37 }
 0x344   :  { %5668 = vmatprep.mubr.f32.mxu0 %v7720_v47  ;;  %5730 = vmatprep.mubr.f32.mxu1 %v7771_v55 }
 0x347   :  { %5669 = vmatmul.mubr.f32.gmra.mxu0 %v7717_v2  ;;  %5731 = vmatmul.mubr.f32.gmra.mxu1 %v7782_v30 }
 0x348   :  { %5671 = vmatprep.mubr.f32.mxu0 %v7740_v52  ;;  %5733 = vmatprep.mubr.f32.mxu1 %v7797_v16 }
 0x34b   :  { %5672 = vmatmul.mubr.f32.gmra.mxu0 %v7743_v37  ;;  %5734 = vmatmul.mubr.f32.gmra.mxu1 %v7810_v15 }
 0x34c   :  { %5674 = vmatprep.mubr.f32.mxu0 %v7771_v55  ;;  %5736 = vmatprep.mubr.f32.mxu1 %v7825_v59 }
 0x34f   :  { %5675 = vmatmul.mubr.f32.gmra.mxu0 %v7782_v30  ;;  %5737 = vmatmul.mubr.f32.gmra.mxu1 %v7838_v8 }
 0x350   :  { %5677 = vmatprep.mubr.f32.mxu0 %v7797_v16  ;;  %5739 = vmatprep.mubr.f32.mxu1 %v7853_v14 }
 0x353   :  { %5678 = vmatmul.mubr.f32.gmra.mxu0 %v7810_v15  ;;  %5740 = vmatmul.mubr.f32.gmra.mxu1 %v7866_v50 }
 0x354   :  { %5680 = vmatprep.mubr.f32.mxu0 %v7825_v59 }
 0x357   :  { %5681 = vmatmul.mubr.f32.gmra.mxu0 %v7838_v8 }
 0x358   :  { %5683 = vmatprep.mubr.f32.mxu0 %v7853_v14 }
 0x35b   :  { %5684 = vmatmul.mubr.f32.gmra.mxu0 %v7866_v50 }
 0x399   :  { %v8060_v45 = vpop.f32.mrf.mxu1 }
 0x39b   :  { %v8062_v25 = vpop.f32.mrf.mxu1 }
 0x39d   :  { %v8064_v29 = vpop.f32.mrf.mxu1 }
 0x39f   :  { %v8066_v38 = vpop.f32.mrf.mxu1 }
 0x3a1   :  { %v5440_v2 = vpop.f32.mrf.mxu0 }
 0x3a2   :  { %v8068_v47 = vpop.f32.mrf.mxu1  ;;  %v2932_v3 = vadd.f32 %v5440_v2, %v8150_v46 }
 0x3a3   :  { %v2921_v52 = vpop.f32.mrf.mxu0 }
 0x3a4   :  { %v8070_v37 = vpop.f32.mrf.mxu1  ;;  %v2922_v19 = vadd.f32 %v8150_v46, %v2921_v52 }
 0x3a7   :  { %v5443_v55 = vpop.f32.mrf.mxu0  ;;  %v8072_v30 = vpop.f32.mrf.mxu1 }
 0x3a9   :  { %v2941_v16 = vpop.f32.mrf.mxu0  ;;  %v8074_v44 = vpop.f32.mrf.mxu1 }
 0x3ad   :  { %v5446_v15 = vpop.f32.mrf.mxu0  ;;  %v8076_v49 = vpop.f32.mrf.mxu1 }
 0x3af   :  { %v8078_v6 = vpop.f32.mrf.mxu0  ;;  %v8080_v59 = vpop.f32.mrf.mxu1 }
 0x3b3   :  { %v8082_v56 = vpop.f32.mrf.mxu0  ;;  %v8084_v50 = vpop.f32.mrf.mxu1 }
 0x3b5   :  { %v8086_v40 = vpop.f32.mrf.mxu0  ;;  %v8088_v8 = vpop.f32.mrf.mxu1 }
 0x3b9   :  { %v8090_v4 = vpop.f32.mrf.mxu0  ;;  %v8092_v11 = vpop.f32.mrf.mxu1 }
 0x3bb   :  { %v8094_v60 = vpop.f32.mrf.mxu0  ;;  %v8096_v14 = vpop.f32.mrf.mxu1 }
 0x3bc   :  { %8831 = vst [vmem:[#allocation85_spill] sm:$0xff] %v8096_v14  ;;  %v3223_v14 = vadd.f32 %v8062_v25, %v2922_v19  ;;  %v2992_v25 = vadd.f32 %v8082_v56, %v8150_v46  ;;  %v3012_v56 = vadd.f32 %v8090_v4, %v8150_v46 }
 0x3bf   :  { %v8098_v42 = vpop.f32.mrf.mxu0  ;;  %v8100_v18 = vpop.f32.mrf.mxu1 }
 0x3c0   :  { %8832 = vst [vmem:[#allocation64_spill] sm:$0xff] %v8100_v18  ;;  %v2942_v18 = vadd.f32 %v8150_v46, %v2941_v16 }
 0x3c1   :  { %v8102_v57 = vpop.f32.mrf.mxu0  ;;  %v8104_v0 = vpop.f32.mrf.mxu1 }
 0x3c2   :  { %8833 = vst [vmem:[#allocation79_spill] sm:$0xff] %v8104_v0  ;;  %v3235_v16 = vadd.f32 %v8066_v38, %v2942_v18 }
 0x3c5   :  { %v8106_v48 = vpop.f32.mrf.mxu0 }
 0x3c6   :  { %v5608_v21 = vpop.f32.mrf.mxu1 }
 0x3c7   :  { %v8108_v39 = vpop.f32.mrf.mxu0 }
 0x3c8   :  { %v3610_v58 = vpop.f32.mrf.mxu1 }
 0x3cb   :  { %v8110_v13 = vpop.f32.mrf.mxu0 }
 0x3cc   :  { %v8112_v43 = vpop.f32.mrf.mxu1 }
 0x3cd   :  { %v8114_v1 = vpop.f32.mrf.mxu0 }
 0x3ce   :  { %8834 = vst [vmem:[#allocation80_spill] sm:$0xff] %v8114_v1  ;;  %v8116_v54 = vpop.f32.mrf.mxu1 }
 0x3d1   :  { %v5552_v26 = vpop.f32.mrf.mxu0  ;;  %v8118_v53 = vpop.f32.mrf.mxu1 }
 0x3d3   :  { %v3416_v20 = vpop.f32.mrf.mxu0  ;;  %v8120_v27 = vpop.f32.mrf.mxu1 }
 0x3d4   :  { %v3417_v1 = vadd.f32 %v3416_v20, %v3223_v14  ;;  %v2982_v20 = vadd.f32 %v8150_v46, %v8086_v40 }
 0x3d7   :  { %v5555_v62 = vpop.f32.mrf.mxu0  ;;  %v8122_v24 = vpop.f32.mrf.mxu1 }
 0x3d9   :  { %v3430_v12 = vpop.f32.mrf.mxu0  ;;  %v8124_v61 = vpop.f32.mrf.mxu1 }
 0x3dd   :  { %v5558_v35 = vpop.f32.mrf.mxu0  ;;  %v8126_v51 = vpop.f32.mrf.mxu1 }
 0x3df   :  { %v3444_v7 = vpop.f32.mrf.mxu0  ;;  %v8128_v32 = vpop.f32.mrf.mxu1 }
 0x3e0   :  { %8835 = vst [vmem:[#allocation76_spill] sm:$0xff] %v8128_v32 }
 0x3e3   :  { %v8130_v33 = vpop.f32.mrf.mxu0  ;;  %v8132_v9 = vpop.f32.mrf.mxu1 }
 0x3e4   :  { %8836 = vst [vmem:[#allocation86_spill] sm:$0xff] %v8132_v9 }
 0x3e5   :  { %v8134_v5 = vpop.f32.mrf.mxu0  ;;  %v8136_v31 = vpop.f32.mrf.mxu1 }
 0x3e6   :  { %8837 = vst [vmem:[#allocation65_spill] sm:$0xff] %v8136_v31  ;;  %v3229_v31 = vadd.f32 %v8060_v45, %v2932_v3 }
 0x3e8   :  { %v3424_v9 = vadd.f32 %v5552_v26, %v3229_v31 }
 0x3e9   :  { %v8138_v36 = vpop.f32.mrf.mxu0  ;;  %v8140_v41 = vpop.f32.mrf.mxu1 }
 0x3ea   :  { %8838 = vst [vmem:[#allocation81_spill] sm:$0xff] %v8140_v41  ;;  %v3619_v26 = vadd.f32 %v5608_v21, %v3424_v9 }
 0x3eb   :  { %v8142_v34 = vpop.f32.mrf.mxu0  ;;  %v8144_v22 = vpop.f32.mrf.mxu1 }
 0x3ec   :  { %8839 = vst [vmem:[#allocation66_spill] sm:$0xff] %v8144_v22  ;;  %v2952_v22 = vadd.f32 %v5443_v55, %v8150_v46  ;;  %v2962_v55 = vadd.f32 %v8150_v46, %v8078_v6 }
 0x3ee   :  { %v3241_v52 = vadd.f32 %v8064_v29, %v2952_v22  ;;  %v3611_v29 = vadd.f32 %v3610_v58, %v3417_v1  ;;  %v3247_v6 = vadd.f32 %v8070_v37, %v2962_v55 }
 0x3ef   :  { %v8146_v28 = vpop.f32.mrf.mxu0  ;;  %v8148_v23 = vpop.f32.mrf.mxu1 }
 0x3f0   :  { %8840 = vst [vmem:[#allocation77_spill] sm:$0xff] %v8148_v23  ;;  %v3438_v3 = vadd.f32 %v5555_v62, %v3241_v52  ;;  %v3445_v58 = vadd.f32 %v3444_v7, %v3247_v6  ;;  %v3032_v7 = vadd.f32 %v8098_v42, %v8150_v46 }
 0x3f1   :  { %v8152_v63 = vpop.f32.mrf.mxu0  ;;  %v8154_v17 = vpop.f32.mrf.mxu1 }
 0x3f2   :  { %8841 = vst [vmem:[#allocation78_spill] sm:$0xff] %v8154_v17  ;;  %v3635_v21 = vadd.f32 %v8112_v43, %v3438_v3 }
 0x3f5   :  { %v8157_v10 = vpop.f32.mrf.mxu0 }
 0x3f6   :  { %8842 = vst [vmem:[#allocation67_spill] sm:$0xff] %v8157_v10  ;;  %v5720_v41 = vpop.f32.mrf.mxu1  ;;  %v2972_v10 = vadd.f32 %v5446_v15, %v8150_v46 }
 0x3f7   :  { %v8160_v0 = vpop.f32.mrf.mxu0 }
 0x3f8   :  { %v4026_v23 = vpop.f32.mrf.mxu1  ;;  %v3253_v15 = vadd.f32 %v8068_v47, %v2972_v10 }
 0x3fa   :  { %v8166_v17 = vpop.f32.mrf.mxu0  ;;  %v3452_v52 = vadd.f32 %v5558_v35, %v3253_v15  ;;  %v3002_v35 = vadd.f32 %v8150_v46, %v8094_v60 }
 0x3fb   :  { %8843 = vst [vmem:[#allocation82_spill] sm:$0xff] %v8166_v17  ;;  %v5723_v2 = vpop.f32.mrf.mxu1  ;;  %v3431_v17 = vadd.f32 %v3430_v12, %v3235_v16  ;;  %v3265_v12 = vadd.f32 %v8072_v30, %v2992_v25 }
 0x3fc   :  { %v8170_v32 = vpop.f32.mrf.mxu0  ;;  %v3651_v3 = vadd.f32 %v8118_v53, %v3452_v52 }
 0x3fd   :  { %v4038_v45 = vpop.f32.mrf.mxu1  ;;  %v3627_v37 = vadd.f32 %v8116_v54, %v3431_v17  ;;  %v3466_v55 = vadd.f32 %v8130_v33, %v3265_v12  ;;  %v3022_v33 = vadd.f32 %v8150_v46, %v8102_v57  ;;  %v8846_v12 = vld [vmem:[#allocation85_spill] sm:$0xff] }
 0x3ff   :  { %v5664_v31 = vpop.f32.mrf.mxu0  ;;  %v5726_v19 = vpop.f32.mrf.mxu1  ;;  %v3667_v15 = vadd.f32 %v8122_v24, %v3466_v55 }
 0x400   :  { %v3856_v14 = vadd.f32 %v5664_v31, %v3619_v26  ;;  %v3643_v26 = vadd.f32 %v8120_v27, %v3445_v58 }
 0x401   :  { %v3849_v22 = vpop.f32.mrf.mxu0  ;;  %v4050_v62 = vpop.f32.mrf.mxu1 }
 0x402   :  { %v4033_v38 = vadd.f32 %v5720_v41, %v3856_v14  ;;  %v3850_v18 = vadd.f32 %v3849_v22, %v3611_v29  ;;  %v3259_v41 = vadd.f32 %v8074_v44, %v2982_v20 }
 0x403   :  { %v5667_v47 = vpop.f32.mrf.mxu0  ;;  %v5729_v9 = vpop.f32.mrf.mxu1 }
 0x404   :  { %4121 = vst [vmem:[#allocation11 + $0x8] sm:$0xff] %v4033_v38  ;;  %v4027_v1 = vadd.f32 %v4026_v23, %v3850_v18  ;;  %v3868_v40 = vadd.f32 %v5667_v47, %v3635_v21  ;;  %v3277_v23 = vadd.f32 %v8076_v49, %v3012_v56  ;;  %v3459_v60 = vadd.f32 %v8134_v5, %v3259_v41  ;;  %v8844_v18 = vld [vmem:[#allocation76_spill] sm:$0xff] }
 0x405   :  { %v3861_v10 = vpop.f32.mrf.mxu0  ;;  %v4062_v43 = vpop.f32.mrf.mxu1  ;;  %v3052_v5 = vadd.f32 %v8106_v48, %v8150_v46 }
 0x406   :  { %4120 = vst [vmem:[#allocation11] sm:$0xff] %v4027_v1  ;;  %v4045_v4 = vadd.f32 %v5723_v2, %v3868_v40  ;;  %v3862_v30 = vadd.f32 %v3861_v10, %v3627_v37  ;;  %v3271_v2 = vadd.f32 %v8080_v59, %v3002_v35  ;;  %v3480_v42 = vadd.f32 %v8138_v36, %v3277_v23  ;;  %v8848_v1 = vld [vmem:[#allocation86_spill] sm:$0xff]  ;;  %v8849_v37 = vld [vmem:[#allocation64_spill] sm:$0xff] }
 0x407   :  { %v5670_v54 = vpop.f32.mrf.mxu0  ;;  %v5732_v17 = vpop.f32.mrf.mxu1  ;;  %v3659_v20 = vadd.f32 %v8124_v61, %v3459_v60  ;;  %v3042_v36 = vadd.f32 %v8150_v46, %v8108_v39  ;;  %v8852_v23 = vld [vmem:[#allocation82_spill] sm:$0xff] }
 0x408   :  { %4123 = vst [vmem:[#allocation11 + $0x18] sm:$0xff] %v4045_v4  ;;  %v4039_v44 = vadd.f32 %v4038_v45, %v3862_v30  ;;  %v3880_v16 = vadd.f32 %v5670_v54, %v3651_v3  ;;  %v3289_v45 = vadd.f32 %v8084_v50, %v3032_v7  ;;  %v3473_v57 = vadd.f32 %v8142_v34, %v3271_v2  ;;  %v8851_v30 = vld [vmem:[#allocation79_spill] sm:$0xff] }
 0x409   :  { %v3873_v53 = vpop.f32.mrf.mxu0  ;;  %v4074_v25 = vpop.f32.mrf.mxu1  ;;  %v3683_v22 = vadd.f32 %v8126_v51, %v3480_v42  ;;  %v3072_v34 = vadd.f32 %v8110_v13, %v8150_v46  ;;  %v3295_v47 = vadd.f32 %v8846_v12, %v3042_v36 }
 0x40a   :  { %4122 = vst [vmem:[#allocation11 + $0x10] sm:$0xff] %v4039_v44  ;;  %v4057_v49 = vadd.f32 %v5726_v19, %v3880_v16  ;;  %v3874_v31 = vadd.f32 %v3873_v53, %v3643_v26  ;;  %v3283_v19 = vadd.f32 %v8088_v8, %v3022_v33  ;;  %v3494_v6 = vadd.f32 %v8146_v28, %v3289_v45  ;;  %v8845_v28 = vld [vmem:[#allocation80_spill] sm:$0xff]  ;;  %v8853_v44 = vld [vmem:[#allocation81_spill] sm:$0xff] }
 0x40b   :  { %v5673_v27 = vpop.f32.mrf.mxu0  ;;  %v5735_v14 = vpop.f32.mrf.mxu1  ;;  %v3675_v21 = vadd.f32 %v8844_v18, %v3473_v57  ;;  %v3062_v56 = vadd.f32 %v8150_v46, %v8845_v28  ;;  %v3501_v10 = vadd.f32 %v8160_v0, %v3295_v47  ;;  %v8850_v46 = vld [vmem:[#allocation65_spill] sm:$0xff] }
 0x40c   :  { %4125 = vst [vmem:[#allocation11 + $0x28] sm:$0xff] %v4057_v49  ;;  %v4051_v59 = vadd.f32 %v4050_v62, %v3874_v31  ;;  %v3892_v29 = vadd.f32 %v5673_v27, %v3667_v15  ;;  %v3301_v62 = vadd.f32 %v8092_v11, %v3052_v5  ;;  %v3487_v38 = vadd.f32 %v8152_v63, %v3283_v19  ;;  %v8855_v5 = vld [vmem:[#allocation77_spill] sm:$0xff] }
 0x40d   :  { %v3885_v24 = vpop.f32.mrf.mxu0  ;;  %v4086_v52 = vpop.f32.mrf.mxu1  ;;  %v3699_v40 = vadd.f32 %v8848_v1, %v3494_v6  ;;  %v3313_v63 = vadd.f32 %v8849_v37, %v3072_v34  ;;  %v3307_v3 = vadd.f32 %v8851_v30, %v3062_v56 }
 0x40e   :  { %4124 = vst [vmem:[#allocation11 + $0x20] sm:$0xff] %v4051_v59  ;;  %v4069_v48 = vadd.f32 %v5729_v9, %v3892_v29  ;;  %v3886_v50 = vadd.f32 %v3885_v24, %v3659_v20  ;;  %v8847_v9 = vld [vmem:[#allocation67_spill] sm:$0xff]  ;;  %v3691_v4 = vadd.f32 %v8850_v46, %v3487_v38  ;;  %v8856_v29 = vld [vmem:[#allocation78_spill] sm:$0xff] }
 0x40f   :  { %v5676_v61 = vpop.f32.mrf.mxu0  ;;  %v3508_v58 = vadd.f32 %v8847_v9, %v3301_v62  ;;  %v5738_v35 = vpop.f32.mrf.mxu1  ;;  %v3522_v54 = vadd.f32 %v8852_v23, %v3313_v63  ;;  %v3515_v2 = vadd.f32 %v8170_v32, %v3307_v3 }
 0x410   :  { %4127 = vst [vmem:[#allocation11 + $0x38] sm:$0xff] %v4069_v48  ;;  %v4063_v39 = vadd.f32 %v4062_v43, %v3886_v50  ;;  %v3904_v8 = vadd.f32 %v5676_v61, %v3683_v22 }
 0x411   :  { %v3897_v51 = vpop.f32.mrf.mxu0  ;;  %v3715_v16 = vadd.f32 %v8853_v44, %v3508_v58  ;;  %v4098_v26 = vpop.f32.mrf.mxu1  ;;  %v3731_v45 = vadd.f32 %v8855_v5, %v3522_v54  ;;  %v3723_v20 = vadd.f32 %v8856_v29, %v3515_v2 }
 0x412   :  { %4126 = vst [vmem:[#allocation11 + $0x30] sm:$0xff] %v4063_v39  ;;  %v4081_v13 = vadd.f32 %v5732_v17, %v3904_v8  ;;  %v3898_v11 = vadd.f32 %v3897_v51, %v3675_v21 }
 0x413   :  { %v5679_v41 = vpop.f32.mrf.mxu0  ;;  %v5741_v27 = vpop.f32.mrf.mxu1 }
 0x414   :  { %4129 = vst [vmem:[#allocation11 + $0x48] sm:$0xff] %v4081_v13  ;;  %v4075_v43 = vadd.f32 %v4074_v25, %v3898_v11  ;;  %v3916_v55 = vadd.f32 %v5679_v41, %v3699_v40  ;;  %v8854_v25 = vld [vmem:[#allocation66_spill] sm:$0xff] }
 0x415   :  { %v3909_v7 = vpop.f32.mrf.mxu0  ;;  %v3707_v42 = vadd.f32 %v8854_v25, %v3501_v10  ;;  %v4110_v24 = vpop.f32.mrf.mxu1 }
 0x416   :  { %4128 = vst [vmem:[#allocation11 + $0x40] sm:$0xff] %v4075_v43  ;;  %v4093_v17 = vadd.f32 %v5735_v14, %v3916_v55  ;;  %v3910_v60 = vadd.f32 %v3909_v7, %v3691_v4 }
 0x417   :  { %v5682_v33 = vpop.f32.mrf.mxu0 }
 0x418   :  { %4131 = vst [vmem:[#allocation11 + $0x58] sm:$0xff] %v4093_v17  ;;  %v4087_v0 = vadd.f32 %v4086_v52, %v3910_v60  ;;  %v3928_v53 = vadd.f32 %v5682_v33, %v3715_v16 }
 0x419   :  { %v3921_v49 = vpop.f32.mrf.mxu0 }
 0x41a   :  { %4130 = vst [vmem:[#allocation11 + $0x50] sm:$0xff] %v4087_v0  ;;  %v4105_v31 = vadd.f32 %v5738_v35, %v3928_v53  ;;  %v3922_v15 = vadd.f32 %v3921_v49, %v3707_v42 }
 0x41b   :  { %v5685_v14 = vpop.f32.mrf.mxu0 }
 0x41c   :  { %4133 = vst [vmem:[#allocation11 + $0x68] sm:$0xff] %v4105_v31  ;;  %v4099_v57 = vadd.f32 %v4098_v26, %v3922_v15  ;;  %v3940_v59 = vadd.f32 %v5685_v14, %v3731_v45 }
 0x41d   :  { %v3933_v36 = vpop.f32.mrf.mxu0 }
 0x41e   :  { %4132 = vst [vmem:[#allocation11 + $0x60] sm:$0xff] %v4099_v57  ;;  %v4117_v32 = vadd.f32 %v5741_v27, %v3940_v59  ;;  %v3934_v19 = vadd.f32 %v3933_v36, %v3723_v20 }
 0x420   :  { %4135 = vst [vmem:[#allocation11 + $0x78] sm:$0xff] %v4117_v32  ;;  %v4111_v6 = vadd.f32 %v4110_v24, %v3934_v19 }
 0x422   :  { %4134 = vst [vmem:[#allocation11 + $0x70] sm:$0xff] %v4111_v6 }
 0x423   :  { %5893 = shalt.err (!%p5890_p1)
}
 0x424   :  { %4147 = dma.vmem_to_hbm [thread:$0]  %s4142_s4, 2048, %s8242_s5, [#allocation4], %s5913_s28, %s5913_s28, %s5914_s29  }
 0x425   :  { %5908 = dma.done.wait [#allocation4], 2048  }
 0x426   :  { %5909 = vsyncadd [#allocation4], 4294965248 }
 0x427   :  { %4151 = vsyncpa [#allocation3], 1 }
 0x428   :  { %4152 = vsyncpa [#allocation6], 1 }
 0x429   :  { %4153 = vsyncpa [#allocation9], 1 }
 0x42a   :  { %4154 = vsyncpa [#allocation4], 1 }

</bundles_post_ra>
